<compile_context>
chip_gen: v6e
topology: v6e:2x2x1
jax: 0.10.0
libtpu: 0.0.40
codegen_flags: <defaults>
</compile_context>

<pallas_src>
import functools
import math

import numpy as np

import jax
import jax.numpy as jnp
from jax.experimental import pallas as pl
from jax.experimental.pallas import tpu as pltpu


ACT_DTYPE = jnp.bfloat16   # inter-layer activations / MXU inputs
ACC_DTYPE = jnp.float32    # accumulation + BN/residual/importance epilogue


# --------------------------------------------------------------------------
# generation-aware sizing
# --------------------------------------------------------------------------

def _vmem_budgets():
    """(per-grid-step activation budget, vmem_limit_bytes) by TPU generation."""
    kind = ""
    try:
        kind = jax.devices()[0].device_kind.lower()
    except Exception:
        pass
    if "v5 lite" in kind or "v5e" in kind or "v5lite" in kind:
        return 4 << 20, 14 << 20           # 16 MiB scoped default on v5e
    if "v6" in kind or "trillium" in kind:
        return 24 << 20, 96 << 20          # 128 MiB physical VMEM
    if "v7" in kind:
        return 10 << 20, 48 << 20          # 64 MiB physical, 2 TCs/chip
    return 8 << 20, 32 << 20               # conservative default


def _pick_tb(n, per_item_bytes, budget_bytes, m_unit, min_grid=2):
    """Largest batch tile (divisor of n) whose per-step working set fits the
    budget, with grid >= min_grid (so both v7x TensorCores get work) and a
    soft preference for M = TB*m_unit being a multiple of the MXU height."""
    cap = max(1, int(budget_bytes) // max(int(per_item_bytes), 1))
    if n >= min_grid:
        cap = min(cap, n // min_grid)
    cap = max(1, min(cap, n))
    divs = [d for d in range(1, cap + 1) if n % d == 0]
    best = max(divs)
    aligned = [d for d in divs if (d * m_unit) % 256 == 0]
    if aligned and max(aligned) * 2 >= best:
        best = max(aligned)
    return best


# --------------------------------------------------------------------------
# Pallas kernels
# --------------------------------------------------------------------------

def _stem_kernel(x_ref, w_ref, s_ref, b_ref, o_ref, *, TB, Hk, WCin):
    """conv_1_3x3 (stride 1, pad 1) + folded bn_1 + ReLU, one K=3*W*Cin dot."""
    xv = x_ref[...]                                        # (TB, H, W*Cin) bf16
    z = jnp.zeros((TB, 1, WCin), xv.dtype)
    up = jnp.concatenate([z, xv[:, :Hk - 1, :]], axis=1)   # row h-1 (zero at edge)
    dn = jnp.concatenate([xv[:, 1:, :], z], axis=1)        # row h+1
    lhs = jnp.concatenate([up, xv, dn], axis=-1).reshape(TB * Hk, 3 * WCin)
    y = jnp.dot(lhs, w_ref[...], preferred_element_type=ACC_DTYPE)
    y = jnp.maximum(y * s_ref[...] + b_ref[...], 0.0)
    o_ref[...] = y.reshape(TB, Hk, -1).astype(o_ref.dtype)


def _block_kernel(*refs, TB, Hk, Ho, WCin, WCout, C, stride, has_post, dual,
                  fuse_pool, last_relu, inv_hw):
    """Whole ResidualBlock fused:
        conv_a(3x3, stride) + bn_a + relu  ->  conv_b(3x3) + bn_b
        -> residual add (identity, or decimate+channel-pad via 0/1 matrix)
        -> [relu] -> [pre-importance copy] -> [importance scale]
        -> [fused global avg pools: raw = imp*mean(x), feat = mean(relu(x))]

    x layout: stride 1 -> (TB, H, W*Cin);  stride 2 -> (TB, Ho, 2*W*Cin)
    (row pairs [even | odd], a free reshape of the same HBM bytes).
    """
    it = iter(refs)
    x_ref, wa_ref, sa_ref, ba_ref = next(it), next(it), next(it), next(it)
    wb_ref, sb_ref, bb_ref = next(it), next(it), next(it)
    rmat_ref = next(it) if stride == 2 else None
    post_ref = next(it) if has_post else None
    pm_ref = next(it) if fuse_pool else None
    impr_ref = next(it) if fuse_pool else None
    out_ref = next(it)
    att_ref = next(it) if dual else None
    raw_ref = next(it) if fuse_pool else None
    feat_ref = next(it) if fuse_pool else None

    xv = x_ref[...]
    if stride == 1:
        z = jnp.zeros((TB, 1, WCin), xv.dtype)
        up = jnp.concatenate([z, xv[:, :Hk - 1, :]], axis=1)
        dn = jnp.concatenate([xv[:, 1:, :], z], axis=1)
        lhs_a = jnp.concatenate([up, xv, dn], axis=-1)      # (TB, Ho, 3*WCin)
        res = xv.reshape(TB * Ho, WCin).astype(ACC_DTYPE)   # identity residual
        even = None
    else:
        # xv = [even | odd] row pairs; rows 2ho-1, 2ho, 2ho+1 for output row ho.
        odd = xv[:, :, WCin:]
        z = jnp.zeros((TB, 1, WCin), xv.dtype)
        prev_odd = jnp.concatenate([z, odd[:, :Ho - 1, :]], axis=1)
        lhs_a = jnp.concatenate([prev_odd, xv], axis=-1)    # (TB, Ho, 3*WCin)
        even = xv[:, :, :WCin]                              # residual source rows
        res = None
    lhs_a = lhs_a.reshape(TB * Ho, 3 * WCin)

    # conv_a + bn_a + relu  (single K = 3*W*Cin MXU dot)
    ya = jnp.dot(lhs_a, wa_ref[...], preferred_element_type=ACC_DTYPE)
    ya = jnp.maximum(ya * sa_ref[...] + ba_ref[...], 0.0)
    ya = ya.astype(ACT_DTYPE).reshape(TB, Ho, WCout)        # stays in VMEM

    # conv_b + bn_b  (stride 1)
    z2 = jnp.zeros((TB, 1, WCout), ya.dtype)
    upb = jnp.concatenate([z2, ya[:, :Ho - 1, :]], axis=1)
    dnb = jnp.concatenate([ya[:, 1:, :], z2], axis=1)
    lhs_b = jnp.concatenate([upb, ya, dnb], axis=-1).reshape(TB * Ho, 3 * WCout)
    yb = jnp.dot(lhs_b, wb_ref[...], preferred_element_type=ACC_DTYPE)
    yb = yb * sb_ref[...] + bb_ref[...]

    # residual add
    if stride == 1:
        yb = yb + res
    else:
        r = even.reshape(TB * Ho, WCin)
        yb = yb + jnp.dot(r, rmat_ref[...], preferred_element_type=ACC_DTYPE)

    if last_relu:
        yb = jnp.maximum(yb, 0.0)

    if dual:                                                # pre-importance copy
        att_ref[...] = yb.reshape(TB, Ho, WCout).astype(att_ref.dtype)
    if has_post:                                            # Channel_Importance
        yb = yb * post_ref[...]
    out_ref[...] = yb.reshape(TB, Ho, WCout).astype(out_ref.dtype)

    if fuse_pool:                                           # end_features x2
        y3 = yb.reshape(TB, Ho, WCout)
        s_raw = jnp.sum(y3, axis=1)                         # (TB, Wo*C)
        s_rel = jnp.sum(jnp.maximum(y3, 0.0), axis=1)
        pm = pm_ref[...]                                    # (Wo*C, C) 0/1
        raw = jnp.dot(s_raw, pm, preferred_element_type=ACC_DTYPE) * inv_hw
        feat = jnp.dot(s_rel, pm, preferred_element_type=ACC_DTYPE) * inv_hw
        raw_ref[...] = (raw * impr_ref[...]).reshape(TB, 1, C)
        feat_ref[...] = feat.reshape(TB, 1, C)


# --------------------------------------------------------------------------
# kernel wrappers
# --------------------------------------------------------------------------

def stem_conv(x_rows, sw, scfg, budgets):
    N = int(x_rows.shape[0])
    H, WCin, WCout = scfg["H"], scfg["WCin"], scfg["WCout"]
    tile_budget, vmem_limit = budgets
    per_item = 4 * H * WCin + 2 * H * 3 * WCin + 12 * H * WCout
    tb = _pick_tb(N, per_item, tile_budget, m_unit=H)
    kernel = functools.partial(_stem_kernel, TB=tb, Hk=H, WCin=WCin)
    return pl.pallas_call(
        kernel,
        out_shape=jax.ShapeDtypeStruct((N, H, WCout), ACT_DTYPE),
        grid=(N // tb,),
        in_specs=[
            pl.BlockSpec((tb, H, WCin), lambda i: (i, 0, 0)),
            pl.BlockSpec((3 * WCin, WCout), lambda i: (0, 0)),
            pl.BlockSpec((1, WCout), lambda i: (0, 0)),
            pl.BlockSpec((1, WCout), lambda i: (0, 0)),
        ],
        out_specs=pl.BlockSpec((tb, H, WCout), lambda i: (i, 0, 0)),
        compiler_params=pltpu.CompilerParams(
            dimension_semantics=("parallel",),
            vmem_limit_bytes=vmem_limit),
    )(x_rows, sw["w"], sw["s"], sw["b"])


def fused_block(x_rows, bw, bcfg, budgets):
    """One ResidualBlock as a single pallas_call.  Returns a tuple of outputs:
    (x_flow, [att_pre_importance], [raw_features, features])."""
    N = int(x_rows.shape[0])
    stride, H, Ho, Wo = bcfg["stride"], bcfg["H"], bcfg["Ho"], bcfg["Wo"]
    WCin, WCout, C = bcfg["WCin"], bcfg["WCout"], bcfg["C"]
    dual = bcfg["att"] == "dual"
    has_post = bcfg["has_post"]
    fuse_pool = bcfg["fuse_pool"]
    tile_budget, vmem_limit = budgets

    if stride == 2:
        # Row-pair view of the same HBM bytes: (N, H, WC) -> (N, H/2, 2*WC).
        xk = x_rows.reshape(N, Ho, 2 * WCin)
        hk, x_last = Ho, 2 * WCin
    else:
        xk, hk, x_last = x_rows, H, WCin

    n_out = 2 if dual else 1
    per_item = (4 * hk * x_last            # x block (bf16, double-buffered)
                + 2 * Ho * 3 * WCin        # lhs_a bf16 temp
                + 6 * Ho * WCout           # ya f32 + bf16 temps
                + 2 * Ho * 3 * WCout       # lhs_b bf16 temp
                + 4 * Ho * WCout           # yb f32 temp
                + n_out * 4 * Ho * WCout)  # outputs (bf16, double-buffered)
    weight_bytes = 2 * 2 * (3 * WCin * WCout + 3 * WCout * WCout)
    tb = _pick_tb(N, per_item, max(tile_budget - weight_bytes, per_item),
                  m_unit=Ho)

    in_specs = [
        pl.BlockSpec((tb, hk, x_last), lambda i: (i, 0, 0)),
        pl.BlockSpec((3 * WCin, WCout), lambda i: (0, 0)),
        pl.BlockSpec((1, WCout), lambda i: (0, 0)),
        pl.BlockSpec((1, WCout), lambda i: (0, 0)),
        pl.BlockSpec((3 * WCout, WCout), lambda i: (0, 0)),
        pl.BlockSpec((1, WCout), lambda i: (0, 0)),
        pl.BlockSpec((1, WCout), lambda i: (0, 0)),
    ]
    args = [xk, bw["wa"], bw["sa"], bw["ba"], bw["wb"], bw["sb"], bw["bb"]]
    if stride == 2:
        in_specs.append(pl.BlockSpec((WCin, WCout), lambda i: (0, 0)))
        args.append(bw["rmat"])
    if has_post:
        in_specs.append(pl.BlockSpec((1, WCout), lambda i: (0, 0)))
        args.append(bw["post"])
    if fuse_pool:
        in_specs.append(pl.BlockSpec((WCout, C), lambda i: (0, 0)))
        args.append(bw["pm"])
        in_specs.append(pl.BlockSpec((1, C), lambda i: (0, 0)))
        args.append(bw["imp_raw"])

    out_shapes = [jax.ShapeDtypeStruct((N, Ho, WCout), ACT_DTYPE)]
    out_specs = [pl.BlockSpec((tb, Ho, WCout), lambda i: (i, 0, 0))]
    if dual:
        out_shapes.append(jax.ShapeDtypeStruct((N, Ho, WCout), ACT_DTYPE))
        out_specs.append(pl.BlockSpec((tb, Ho, WCout), lambda i: (i, 0, 0)))
    if fuse_pool:
        for _ in range(2):                                   # raw, feat
            out_shapes.append(jax.ShapeDtypeStruct((N, 1, C), jnp.float32))
            out_specs.append(pl.BlockSpec((tb, 1, C), lambda i: (i, 0, 0)))

    kernel = functools.partial(
        _block_kernel, TB=tb, Hk=hk, Ho=Ho, WCin=WCin, WCout=WCout, C=C,
        stride=stride, has_post=has_post, dual=dual, fuse_pool=fuse_pool,
        last_relu=False, inv_hw=1.0 / float(Ho * Wo))

    return pl.pallas_call(
        kernel,
        out_shape=tuple(out_shapes),
        grid=(N // tb,),
        in_specs=in_specs,
        out_specs=tuple(out_specs),
        compiler_params=pltpu.CompilerParams(
            dimension_semantics=("parallel",),
            vmem_limit_bytes=vmem_limit),
    )(*args)


# --------------------------------------------------------------------------
# one-time parameter preparation (expanded weights / folded BN / scatter mats)
# --------------------------------------------------------------------------

def _expand_conv_weight(w, w_in, stride):
    """(3,3,Cin,Cout) -> (3*w_in*Cin, (w_in//stride)*Cout): folds the kw taps,
    width zero-padding and the width stride so each 3x3 conv is one MXU dot of
    the row-shift-concatenated input slab against this matrix."""
    _, _, cin, cout = w.shape
    wo_n = w_in // stride
    sel = np.zeros((3, w_in, wo_n), np.float32)
    for kw in range(3):
        for wo in range(wo_n):
            wi = stride * wo + kw - 1
            if 0 <= wi < w_in:
                sel[kw, wi, wo] = 1.0
    wb = jnp.einsum("kio,hkcd->hicod", jnp.asarray(sel), w.astype(jnp.float32))
    return wb.reshape(3 * w_in * cin, wo_n * cout)


def _residual_matrix(w_in, cin, cout):
    """(W*Cin, (W//2)*Cout) 0/1 matrix: width-decimate (cols 0::2) AND zero-pad
    channels Cin -> Cout, i.e. DownsampleStride + torch.cat((x, x*0), 1)."""
    wo_n = w_in // 2
    m = np.zeros((w_in * cin, wo_n * cout), np.float32)
    for wo in range(wo_n):
        for c in range(cin):
            m[(2 * wo) * cin + c, wo * cout + c] = 1.0
    return jnp.asarray(m)


def _pool_matrix(wo_n, c):
    """(Wo*C, C) 0/1 matrix summing the width axis per channel (for the fused
    global average pool)."""
    m = np.zeros((wo_n * c, c), np.float32)
    for w in range(wo_n):
        for ci in range(c):
            m[w * c + ci, ci] = 1.0
    return jnp.asarray(m)


def _tile_vec(v, wo_n):
    """Per-channel vector -> (1, Wo*C) lane-dense epilogue vector (f32)."""
    return jnp.tile(jnp.asarray(v, ACC_DTYPE).reshape(-1), wo_n).reshape(1, -1)


def _prepare_block(bp, H, W, C, *, post=None, att=None, pool_imp=None):
    cin = int(bp["wa"].shape[2])
    planes = int(bp["wa"].shape[3])
    increase = planes != cin
    stride = 2 if increase else 1
    Ho, Wo = H // stride, W // stride
    wd = {
        "wa": _expand_conv_weight(bp["wa"], W, stride).astype(ACT_DTYPE),
        "sa": _tile_vec(bp["sa"], Wo),
        "ba": _tile_vec(bp["ba"], Wo),
        "wb": _expand_conv_weight(bp["wb"], Wo, 1).astype(ACT_DTYPE),
        "sb": _tile_vec(bp["sb"], Wo),
        "bb": _tile_vec(bp["bb"], Wo),
    }
    if increase:
        wd["rmat"] = _residual_matrix(W, cin, planes).astype(ACT_DTYPE)
    if post is not None:
        wd["post"] = _tile_vec(post, Wo)
    if pool_imp is not None:
        wd["pm"] = _pool_matrix(Wo, planes)
        wd["imp_raw"] = jnp.asarray(pool_imp, jnp.float32).reshape(1, planes)
    cfgb = {"stride": stride, "H": H, "Ho": Ho, "Wo": Wo,
            "WCin": W * cin, "WCout": Wo * planes, "C": planes,
            "has_post": post is not None, "att": att,
            "fuse_pool": pool_imp is not None}
    return cfgb, wd, Ho, Wo, planes


def prepare_model(params, H, W, channels):
    """Build (static cfg, device weights) once at parameter-load time."""
    nf = int(params["conv1_w"].shape[3])

    # Zero-pad conv1 input channels so W*Cin is a multiple of 128 (lane-dense).
    cpad = channels
    for c in range(channels, 129):
        if (W * c) % 128 == 0:
            cpad = c
            break
    w1 = params["conv1_w"]
    if cpad > channels:
        w1 = jnp.pad(w1, ((0, 0), (0, 0), (0, cpad - channels), (0, 0)))
    stem_w = {"w": _expand_conv_weight(w1, W, 1).astype(ACT_DTYPE),
              "s": _tile_vec(params["bn1_s"], W),
              "b": _tile_vec(params["bn1_b"], W)}
    stem_cfg = {"H": H, "W": W, "WCin": W * cpad, "WCout": W * nf}

    blocks_cfg, blocks_w = [], []
    curH, curW, curC = H, W, nf
    for sname, iname in (("stage1", "imp1"), ("stage2", "imp2"),
                         ("stage3", "imp3")):
        blist = params[sname]
        for bi, bp in enumerate(blist):
            last = bi == len(blist) - 1
            cfgb, wd, curH, curW, curC = _prepare_block(
                bp, curH, curW, curC,
                post=params[iname] if last else None,
                att="dual" if last else None)
            blocks_cfg.append(cfgb)
            blocks_w.append(wd)
    # stage_4: single block; attention is the post-importance output; the two
    # global average pools + raw_features importance are fused into it.
    cfgb, wd, curH, curW, curC = _prepare_block(
        params["stage4"], curH, curW, curC,
        post=params["imp4"], att="flow", pool_imp=params["imp_raw"])
    blocks_cfg.append(cfgb)
    blocks_w.append(wd)

    cfg = {"H": H, "W": W, "cpad": cpad, "stem": stem_cfg, "blocks": blocks_cfg}
    weights = {"stem": stem_w, "blocks": blocks_w}
    return cfg, weights


# --------------------------------------------------------------------------
# forward pass
# --------------------------------------------------------------------------

def cifar_resnet_forward(x_nchw, weights, cfg, budgets):
    """CifarResNet.forward (preact=False, downsampling='stride', avg pool,
    final_layer=None, classifier_no_act=True, all_attentions=False,
    last_relu=False); BatchNorm in inference mode (running stats folded)."""
    # TODO(synk): gradcam hooks, final_layer / weldon-pooling variants,
    # all_attentions=True and training-mode BatchNorm statistics are
    # config/training features not represented in this inference kernel.
    N = int(x_nchw.shape[0])
    H, W, cpad = cfg["H"], cfg["W"], cfg["cpad"]

    x = jnp.transpose(x_nchw, (0, 2, 3, 1))                 # NCHW -> NHWC
    cin0 = int(x.shape[-1])
    if cpad > cin0:
        x = jnp.pad(x, ((0, 0), (0, 0), (0, 0), (0, cpad - cin0)))
    x = x.reshape(N, H, W * cpad).astype(ACT_DTYPE)         # lane-dense rows

    x = stem_conv(x, weights["stem"], cfg["stem"], budgets)

    attention = []
    raw_features = features = None
    for bcfg, bw in zip(cfg["blocks"], weights["blocks"]):
        outs = fused_block(x, bw, bcfg, budgets)
        idx = 0
        x = outs[idx]
        idx += 1
        att = None
        if bcfg["att"] == "dual":                            # pre-importance
            att = outs[idx]
            idx += 1
        if bcfg["fuse_pool"]:
            raw_features = outs[idx][:, 0, :]
            idx += 1
            features = outs[idx][:, 0, :]
            idx += 1
        if bcfg["att"] == "flow":                            # post-importance
            att = x
        if att is not None:
            attention.append((att, bcfg))

    def to_nchw(a, bc):
        h, w, c = bc["Ho"], bc["Wo"], bc["C"]
        return jnp.transpose(a.reshape(-1, h, w, c), (0, 3, 1, 2)).astype(
            jnp.float32)

    attention = [to_nchw(a, bc) for a, bc in attention]
    return {"raw_features": raw_features, "features": features,
            "attention": attention}


# --------------------------------------------------------------------------
# deterministic parameter init (inference-mode folded BN)
# --------------------------------------------------------------------------

def _kaiming_conv(key, cin, cout, k=3):
    fan_out = k * k * cout
    std = math.sqrt(2.0 / fan_out)
    return (std * jax.random.normal(key, (k, k, cin, cout))).astype(jnp.float32)


def _bn_folded(key, c, eps=1e-5):
    k1, k2 = jax.random.split(key)
    gamma = 1.0 + 0.1 * jax.random.normal(k1, (c,))
    beta = 0.1 * jax.random.normal(k2, (c,))
    mean = jnp.zeros((c,), jnp.float32)
    var = jnp.ones((c,), jnp.float32)
    scale = gamma / jnp.sqrt(var + eps)
    bias = beta - mean * scale
    return scale.astype(jnp.float32), bias.astype(jnp.float32)


def _block_params(key, inplanes, increase_dim):
    planes = 2 * inplanes if increase_dim else inplanes
    ka, kab, kb, kbb = jax.random.split(key, 4)
    sa, ba = _bn_folded(kab, planes)
    sb, bb = _bn_folded(kbb, planes)
    return {"wa": _kaiming_conv(ka, inplanes, planes), "sa": sa, "ba": ba,
            "wb": _kaiming_conv(kb, planes, planes), "sb": sb, "bb": bb}


def init_params(key, n=2, nf=8, channels=3):
    keys = iter(jax.random.split(key, 64))
    params = {}
    params["conv1_w"] = _kaiming_conv(next(keys), channels, nf)
    params["bn1_s"], params["bn1_b"] = _bn_folded(next(keys), nf)

    params["stage1"] = [_block_params(next(keys), nf, False) for _ in range(n)]
    params["imp1"] = jnp.ones((nf,), jnp.float32)

    params["stage2"] = ([_block_params(next(keys), nf, True)] +
                        [_block_params(next(keys), 2 * nf, False)
                         for _ in range(n - 1)])
    params["imp2"] = jnp.ones((2 * nf,), jnp.float32)

    params["stage3"] = ([_block_params(next(keys), 2 * nf, True)] +
                        [_block_params(next(keys), 4 * nf, False)
                         for _ in range(n - 2)])
    params["imp3"] = jnp.ones((4 * nf,), jnp.float32)

    params["stage4"] = _block_params(next(keys), 4 * nf, False)
    params["imp4"] = jnp.ones((4 * nf,), jnp.float32)
    params["imp_raw"] = jnp.ones((4 * nf,), jnp.float32)
    return params


# --------------------------------------------------------------------------
# main
# --------------------------------------------------------------------------

if __name__ == "__main__":
    key = jax.random.PRNGKey(0)
    k_param, k_in = jax.random.split(key)

    N, C, H, W = 2, 3, 16, 16           # small CIFAR-like NCHW input
    n, nf = 2, 8                         # small depth/width for the test

    params = init_params(k_param, n=n, nf=nf, channels=C)
    cfg, weights = prepare_model(params, H=H, W=W, channels=C)
    budgets = _vmem_budgets()

    fwd = jax.jit(functools.partial(cifar_resnet_forward, cfg=cfg,
                                    budgets=budgets))
    x = jax.random.normal(k_in, (N, C, H, W), jnp.float32)

    out = fwd(x, weights)
    jax.block_until_ready(out)

    # sanity checks
    assert out["raw_features"].shape == (N, 4 * nf)
    assert out["features"].shape == (N, 4 * nf)
    assert out["attention"][0].shape == (N, nf, H, W)
    assert out["attention"][1].shape == (N, 2 * nf, H // 2, W // 2)
    assert out["attention"][2].shape == (N, 4 * nf, H // 4, W // 4)
    assert out["attention"][3].shape == (N, 4 * nf, H // 4, W // 4)
    assert bool(jnp.isfinite(out["raw_features"]).all())
    assert bool(jnp.isfinite(out["features"]).all())
    for a in out["attention"]:
        assert bool(jnp.isfinite(a).all())

    print("KERNEL_OK")
</pallas_src>

<mosaic_0001>
module attributes {stable_mosaic.version = 11 : i64} {
  func.func @_stem_kernel(%arg0: i32, %arg1: memref<1x16x128xbf16, #tpu.memory_space<vmem>>, %arg2: memref<384x128xbf16, #tpu.memory_space<vmem>>, %arg3: memref<1x128xf32, #tpu.memory_space<vmem>>, %arg4: memref<1x128xf32, #tpu.memory_space<vmem>>, %arg5: memref<1x16x128xbf16, #tpu.memory_space<vmem>>) attributes {dimension_semantics = [#tpu.dimension_semantics<parallel>], iteration_bounds = array<i64: 2>, scalar_prefetch = 0 : i64, scratch_operands = 0 : i64, tpu.core_type = #tpu.core_type<tc>, window_params = [{transform_indices = @transform_0, window_bounds = array<i64: 1, 16, 128>}, {pipeline_mode = #tpu.pipeline_mode<synchronous>, transform_indices = @transform_1, window_bounds = array<i64: 384, 128>}, {pipeline_mode = #tpu.pipeline_mode<synchronous>, transform_indices = @transform_2, window_bounds = array<i64: 1, 128>}, {pipeline_mode = #tpu.pipeline_mode<synchronous>, transform_indices = @transform_3, window_bounds = array<i64: 1, 128>}, {transform_indices = @transform_4, window_bounds = array<i64: 1, 16, 128>}]} {
    %c0 = arith.constant 0 : index
    %c0_0 = arith.constant 0 : index
    %c0_1 = arith.constant 0 : index
    %0 = vector.load %arg1[%c0, %c0_0, %c0_1] : memref<1x16x128xbf16, #tpu.memory_space<vmem>>, vector<1x16x128xbf16>
    %cst = arith.constant 0.000000e+00 : bf16
    %1 = vector.broadcast %cst : bf16 to vector<1x1x128xbf16>
    %2 = vector.extract_strided_slice %0 {offsets = [0, 0, 0], sizes = [1, 15, 128], strides = [1, 1, 1]} : vector<1x16x128xbf16> to vector<1x15x128xbf16>
    %3 = tpu.concatenate %1, %2 in 1 : vector<1x1x128xbf16>, vector<1x15x128xbf16> -> vector<1x16x128xbf16>
    %4 = vector.extract_strided_slice %0 {offsets = [0, 1, 0], sizes = [1, 15, 128], strides = [1, 1, 1]} : vector<1x16x128xbf16> to vector<1x15x128xbf16>
    %5 = tpu.concatenate %4, %1 in 1 : vector<1x15x128xbf16>, vector<1x1x128xbf16> -> vector<1x16x128xbf16>
    %6 = tpu.concatenate %3, %0, %5 in 2 : vector<1x16x128xbf16>, vector<1x16x128xbf16>, vector<1x16x128xbf16> -> vector<1x16x384xbf16>
    %7 = vector.shape_cast %6 : vector<1x16x384xbf16> to vector<16x384xbf16>
    %c0_2 = arith.constant 0 : index
    %c0_3 = arith.constant 0 : index
    %8 = vector.load %arg2[%c0_2, %c0_3] : memref<384x128xbf16, #tpu.memory_space<vmem>>, vector<384x128xbf16>
    %cst_4 = arith.constant dense<0.000000e+00> : vector<16x128xf32>
    %9 = tpu.matmul %7, %8, %cst_4 {dimension_numbers = #tpu.dot_dimension_numbers<[1], [0], [0], [1], [0, 0, 1, 1], [], []>} : vector<16x384xbf16>, vector<384x128xbf16>, vector<16x128xf32> -> vector<16x128xf32>
    %c0_5 = arith.constant 0 : index
    %c0_6 = arith.constant 0 : index
    %10 = vector.load %arg3[%c0_5, %c0_6] : memref<1x128xf32, #tpu.memory_space<vmem>>, vector<1x128xf32>
    %11 = vector.broadcast %10 : vector<1x128xf32> to vector<16x128xf32>
    %12 = arith.mulf %9, %11 : vector<16x128xf32>
    %c0_7 = arith.constant 0 : index
    %c0_8 = arith.constant 0 : index
    %13 = vector.load %arg4[%c0_7, %c0_8] : memref<1x128xf32, #tpu.memory_space<vmem>>, vector<1x128xf32>
    %14 = vector.broadcast %13 : vector<1x128xf32> to vector<16x128xf32>
    %15 = arith.addf %12, %14 : vector<16x128xf32>
    %cst_9 = arith.constant 0.000000e+00 : f32
    %16 = vector.broadcast %cst_9 : f32 to vector<16x128xf32>
    %17 = arith.maximumf %15, %16 : vector<16x128xf32>
    %18 = vector.shape_cast %17 : vector<16x128xf32> to vector<1x16x128xf32>
    %19 = arith.truncf %18 : vector<1x16x128xf32> to vector<1x16x128xbf16>
    %c0_10 = arith.constant 0 : index
    %c0_11 = arith.constant 0 : index
    %c0_12 = arith.constant 0 : index
    %20 = vector.load %arg5[%c0_10, %c0_11, %c0_12] : memref<1x16x128xbf16, #tpu.memory_space<vmem>>, vector<1x16x128xbf16>
    tpu.vector_store %arg5[%c0_10, %c0_11, %c0_12], %19 {strides = array<i32>} : memref<1x16x128xbf16, #tpu.memory_space<vmem>>, vector<1x16x128xbf16>,
    return
  }
  func.func @transform_0(%arg0: i32) -> (i32, i32, i32) {
    %c0_i32 = arith.constant 0 : i32
    %c0_i32_0 = arith.constant 0 : i32
    %c0_i32_1 = arith.constant 0 : i32
    return %arg0, %c0_i32, %c0_i32_0 : i32, i32, i32
  }
  func.func @transform_1(%arg0: i32) -> (i32, i32) {
    %c0_i32 = arith.constant 0 : i32
    %c0_i32_0 = arith.constant 0 : i32
    %c0_i32_1 = arith.constant 0 : i32
    return %c0_i32, %c0_i32_0 : i32, i32
  }
  func.func @transform_2(%arg0: i32) -> (i32, i32) {
    %c0_i32 = arith.constant 0 : i32
    %c0_i32_0 = arith.constant 0 : i32
    %c0_i32_1 = arith.constant 0 : i32
    return %c0_i32, %c0_i32_0 : i32, i32
  }
  func.func @transform_3(%arg0: i32) -> (i32, i32) {
    %c0_i32 = arith.constant 0 : i32
    %c0_i32_0 = arith.constant 0 : i32
    %c0_i32_1 = arith.constant 0 : i32
    return %c0_i32, %c0_i32_0 : i32, i32
  }
  func.func @transform_4(%arg0: i32) -> (i32, i32, i32) {
    %c0_i32 = arith.constant 0 : i32
    %c0_i32_0 = arith.constant 0 : i32
    %c0_i32_1 = arith.constant 0 : i32
    return %arg0, %c0_i32, %c0_i32_0 : i32, i32, i32
  }
}

module attributes {stable_mosaic.version = 11 : i64} {
  func.func @_block_kernel(%arg0: i32, %arg1: memref<1x16x128xbf16, #tpu.memory_space<vmem>>, %arg2: memref<384x128xbf16, #tpu.memory_space<vmem>>, %arg3: memref<1x128xf32, #tpu.memory_space<vmem>>, %arg4: memref<1x128xf32, #tpu.memory_space<vmem>>, %arg5: memref<384x128xbf16, #tpu.memory_space<vmem>>, %arg6: memref<1x128xf32, #tpu.memory_space<vmem>>, %arg7: memref<1x128xf32, #tpu.memory_space<vmem>>, %arg8: memref<1x16x128xbf16, #tpu.memory_space<vmem>>) attributes {dimension_semantics = [#tpu.dimension_semantics<parallel>], iteration_bounds = array<i64: 2>, scalar_prefetch = 0 : i64, scratch_operands = 0 : i64, tpu.core_type = #tpu.core_type<tc>, window_params = [{transform_indices = @transform_0, window_bounds = array<i64: 1, 16, 128>}, {pipeline_mode = #tpu.pipeline_mode<synchronous>, transform_indices = @transform_1, window_bounds = array<i64: 384, 128>}, {pipeline_mode = #tpu.pipeline_mode<synchronous>, transform_indices = @transform_2, window_bounds = array<i64: 1, 128>}, {pipeline_mode = #tpu.pipeline_mode<synchronous>, transform_indices = @transform_3, window_bounds = array<i64: 1, 128>}, {pipeline_mode = #tpu.pipeline_mode<synchronous>, transform_indices = @transform_4, window_bounds = array<i64: 384, 128>}, {pipeline_mode = #tpu.pipeline_mode<synchronous>, transform_indices = @transform_5, window_bounds = array<i64: 1, 128>}, {pipeline_mode = #tpu.pipeline_mode<synchronous>, transform_indices = @transform_6, window_bounds = array<i64: 1, 128>}, {transform_indices = @transform_7, window_bounds = array<i64: 1, 16, 128>}]} {
    %c0 = arith.constant 0 : index
    %c0_0 = arith.constant 0 : index
    %c0_1 = arith.constant 0 : index
    %0 = vector.load %arg1[%c0, %c0_0, %c0_1] : memref<1x16x128xbf16, #tpu.memory_space<vmem>>, vector<1x16x128xbf16>
    %cst = arith.constant 0.000000e+00 : bf16
    %1 = vector.broadcast %cst : bf16 to vector<1x1x128xbf16>
    %2 = vector.extract_strided_slice %0 {offsets = [0, 0, 0], sizes = [1, 15, 128], strides = [1, 1, 1]} : vector<1x16x128xbf16> to vector<1x15x128xbf16>
    %3 = tpu.concatenate %1, %2 in 1 : vector<1x1x128xbf16>, vector<1x15x128xbf16> -> vector<1x16x128xbf16>
    %4 = vector.extract_strided_slice %0 {offsets = [0, 1, 0], sizes = [1, 15, 128], strides = [1, 1, 1]} : vector<1x16x128xbf16> to vector<1x15x128xbf16>
    %5 = tpu.concatenate %4, %1 in 1 : vector<1x15x128xbf16>, vector<1x1x128xbf16> -> vector<1x16x128xbf16>
    %6 = tpu.concatenate %3, %0, %5 in 2 : vector<1x16x128xbf16>, vector<1x16x128xbf16>, vector<1x16x128xbf16> -> vector<1x16x384xbf16>
    %7 = vector.shape_cast %0 : vector<1x16x128xbf16> to vector<16x128xbf16>
    %8 = arith.extf %7 : vector<16x128xbf16> to vector<16x128xf32>
    %9 = vector.shape_cast %6 : vector<1x16x384xbf16> to vector<16x384xbf16>
    %c0_2 = arith.constant 0 : index
    %c0_3 = arith.constant 0 : index
    %10 = vector.load %arg2[%c0_2, %c0_3] : memref<384x128xbf16, #tpu.memory_space<vmem>>, vector<384x128xbf16>
    %cst_4 = arith.constant dense<0.000000e+00> : vector<16x128xf32>
    %11 = tpu.matmul %9, %10, %cst_4 {dimension_numbers = #tpu.dot_dimension_numbers<[1], [0], [0], [1], [0, 0, 1, 1], [], []>} : vector<16x384xbf16>, vector<384x128xbf16>, vector<16x128xf32> -> vector<16x128xf32>
    %c0_5 = arith.constant 0 : index
    %c0_6 = arith.constant 0 : index
    %12 = vector.load %arg3[%c0_5, %c0_6] : memref<1x128xf32, #tpu.memory_space<vmem>>, vector<1x128xf32>
    %13 = vector.broadcast %12 : vector<1x128xf32> to vector<16x128xf32>
    %14 = arith.mulf %11, %13 : vector<16x128xf32>
    %c0_7 = arith.constant 0 : index
    %c0_8 = arith.constant 0 : index
    %15 = vector.load %arg4[%c0_7, %c0_8] : memref<1x128xf32, #tpu.memory_space<vmem>>, vector<1x128xf32>
    %16 = vector.broadcast %15 : vector<1x128xf32> to vector<16x128xf32>
    %17 = arith.addf %14, %16 : vector<16x128xf32>
    %cst_9 = arith.constant 0.000000e+00 : f32
    %18 = vector.broadcast %cst_9 : f32 to vector<16x128xf32>
    %19 = arith.maximumf %17, %18 : vector<16x128xf32>
    %20 = arith.truncf %19 : vector<16x128xf32> to vector<16x128xbf16>
    %21 = vector.shape_cast %20 : vector<16x128xbf16> to vector<1x16x128xbf16>
    %cst_10 = arith.constant 0.000000e+00 : bf16
    %22 = vector.broadcast %cst_10 : bf16 to vector<1x1x128xbf16>
    %23 = vector.extract_strided_slice %21 {offsets = [0, 0, 0], sizes = [1, 15, 128], strides = [1, 1, 1]} : vector<1x16x128xbf16> to vector<1x15x128xbf16>
    %24 = tpu.concatenate %22, %23 in 1 : vector<1x1x128xbf16>, vector<1x15x128xbf16> -> vector<1x16x128xbf16>
    %25 = vector.extract_strided_slice %21 {offsets = [0, 1, 0], sizes = [1, 15, 128], strides = [1, 1, 1]} : vector<1x16x128xbf16> to vector<1x15x128xbf16>
    %26 = tpu.concatenate %25, %22 in 1 : vector<1x15x128xbf16>, vector<1x1x128xbf16> -> vector<1x16x128xbf16>
    %27 = tpu.concatenate %24, %21, %26 in 2 : vector<1x16x128xbf16>, vector<1x16x128xbf16>, vector<1x16x128xbf16> -> vector<1x16x384xbf16>
    %28 = vector.shape_cast %27 : vector<1x16x384xbf16> to vector<16x384xbf16>
    %c0_11 = arith.constant 0 : index
    %c0_12 = arith.constant 0 : index
    %29 = vector.load %arg5[%c0_11, %c0_12] : memref<384x128xbf16, #tpu.memory_space<vmem>>, vector<384x128xbf16>
    %cst_13 = arith.constant dense<0.000000e+00> : vector<16x128xf32>
    %30 = tpu.matmul %28, %29, %cst_13 {dimension_numbers = #tpu.dot_dimension_numbers<[1], [0], [0], [1], [0, 0, 1, 1], [], []>} : vector<16x384xbf16>, vector<384x128xbf16>, vector<16x128xf32> -> vector<16x128xf32>
    %c0_14 = arith.constant 0 : index
    %c0_15 = arith.constant 0 : index
    %31 = vector.load %arg6[%c0_14, %c0_15] : memref<1x128xf32, #tpu.memory_space<vmem>>, vector<1x128xf32>
    %32 = vector.broadcast %31 : vector<1x128xf32> to vector<16x128xf32>
    %33 = arith.mulf %30, %32 : vector<16x128xf32>
    %c0_16 = arith.constant 0 : index
    %c0_17 = arith.constant 0 : index
    %34 = vector.load %arg7[%c0_16, %c0_17] : memref<1x128xf32, #tpu.memory_space<vmem>>, vector<1x128xf32>
    %35 = vector.broadcast %34 : vector<1x128xf32> to vector<16x128xf32>
    %36 = arith.addf %33, %35 : vector<16x128xf32>
    %37 = arith.addf %36, %8 : vector<16x128xf32>
    %38 = vector.shape_cast %37 : vector<16x128xf32> to vector<1x16x128xf32>
    %39 = arith.truncf %38 : vector<1x16x128xf32> to vector<1x16x128xbf16>
    %c0_18 = arith.constant 0 : index
    %c0_19 = arith.constant 0 : index
    %c0_20 = arith.constant 0 : index
    %40 = vector.load %arg8[%c0_18, %c0_19, %c0_20] : memref<1x16x128xbf16, #tpu.memory_space<vmem>>, vector<1x16x128xbf16>
    tpu.vector_store %arg8[%c0_18, %c0_19, %c0_20], %39 {strides = array<i32>} : memref<1x16x128xbf16, #tpu.memory_space<vmem>>, vector<1x16x128xbf16>,
    return
  }
  func.func @transform_0(%arg0: i32) -> (i32, i32, i32) {
    %c0_i32 = arith.constant 0 : i32
    %c0_i32_0 = arith.constant 0 : i32
    %c0_i32_1 = arith.constant 0 : i32
    return %arg0, %c0_i32, %c0_i32_0 : i32, i32, i32
  }
  func.func @transform_1(%arg0: i32) -> (i32, i32) {
    %c0_i32 = arith.constant 0 : i32
    %c0_i32_0 = arith.constant 0 : i32
    %c0_i32_1 = arith.constant 0 : i32
    return %c0_i32, %c0_i32_0 : i32, i32
  }
  func.func @transform_2(%arg0: i32) -> (i32, i32) {
    %c0_i32 = arith.constant 0 : i32
    %c0_i32_0 = arith.constant 0 : i32
    %c0_i32_1 = arith.constant 0 : i32
    return %c0_i32, %c0_i32_0 : i32, i32
  }
  func.func @transform_3(%arg0: i32) -> (i32, i32) {
    %c0_i32 = arith.constant 0 : i32
    %c0_i32_0 = arith.constant 0 : i32
    %c0_i32_1 = arith.constant 0 : i32
    return %c0_i32, %c0_i32_0 : i32, i32
  }
  func.func @transform_4(%arg0: i32) -> (i32, i32) {
    %c0_i32 = arith.constant 0 : i32
    %c0_i32_0 = arith.constant 0 : i32
    %c0_i32_1 = arith.constant 0 : i32
    return %c0_i32, %c0_i32_0 : i32, i32
  }
  func.func @transform_5(%arg0: i32) -> (i32, i32) {
    %c0_i32 = arith.constant 0 : i32
    %c0_i32_0 = arith.constant 0 : i32
    %c0_i32_1 = arith.constant 0 : i32
    return %c0_i32, %c0_i32_0 : i32, i32
  }
  func.func @transform_6(%arg0: i32) -> (i32, i32) {
    %c0_i32 = arith.constant 0 : i32
    %c0_i32_0 = arith.constant 0 : i32
    %c0_i32_1 = arith.constant 0 : i32
    return %c0_i32, %c0_i32_0 : i32, i32
  }
  func.func @transform_7(%arg0: i32) -> (i32, i32, i32) {
    %c0_i32 = arith.constant 0 : i32
    %c0_i32_0 = arith.constant 0 : i32
    %c0_i32_1 = arith.constant 0 : i32
    return %arg0, %c0_i32, %c0_i32_0 : i32, i32, i32
  }
}

module attributes {stable_mosaic.version = 11 : i64} {
  func.func @_block_kernel(%arg0: i32, %arg1: memref<1x16x128xbf16, #tpu.memory_space<vmem>>, %arg2: memref<384x128xbf16, #tpu.memory_space<vmem>>, %arg3: memref<1x128xf32, #tpu.memory_space<vmem>>, %arg4: memref<1x128xf32, #tpu.memory_space<vmem>>, %arg5: memref<384x128xbf16, #tpu.memory_space<vmem>>, %arg6: memref<1x128xf32, #tpu.memory_space<vmem>>, %arg7: memref<1x128xf32, #tpu.memory_space<vmem>>, %arg8: memref<1x128xf32, #tpu.memory_space<vmem>>, %arg9: memref<1x16x128xbf16, #tpu.memory_space<vmem>>, %arg10: memref<1x16x128xbf16, #tpu.memory_space<vmem>>) attributes {dimension_semantics = [#tpu.dimension_semantics<parallel>], iteration_bounds = array<i64: 2>, scalar_prefetch = 0 : i64, scratch_operands = 0 : i64, tpu.core_type = #tpu.core_type<tc>, window_params = [{transform_indices = @transform_0, window_bounds = array<i64: 1, 16, 128>}, {pipeline_mode = #tpu.pipeline_mode<synchronous>, transform_indices = @transform_1, window_bounds = array<i64: 384, 128>}, {pipeline_mode = #tpu.pipeline_mode<synchronous>, transform_indices = @transform_2, window_bounds = array<i64: 1, 128>}, {pipeline_mode = #tpu.pipeline_mode<synchronous>, transform_indices = @transform_3, window_bounds = array<i64: 1, 128>}, {pipeline_mode = #tpu.pipeline_mode<synchronous>, transform_indices = @transform_4, window_bounds = array<i64: 384, 128>}, {pipeline_mode = #tpu.pipeline_mode<synchronous>, transform_indices = @transform_5, window_bounds = array<i64: 1, 128>}, {pipeline_mode = #tpu.pipeline_mode<synchronous>, transform_indices = @transform_6, window_bounds = array<i64: 1, 128>}, {pipeline_mode = #tpu.pipeline_mode<synchronous>, transform_indices = @transform_7, window_bounds = array<i64: 1, 128>}, {transform_indices = @transform_8, window_bounds = array<i64: 1, 16, 128>}, {transform_indices = @transform_9, window_bounds = array<i64: 1, 16, 128>}]} {
    %c0 = arith.constant 0 : index
    %c0_0 = arith.constant 0 : index
    %c0_1 = arith.constant 0 : index
    %0 = vector.load %arg1[%c0, %c0_0, %c0_1] : memref<1x16x128xbf16, #tpu.memory_space<vmem>>, vector<1x16x128xbf16>
    %cst = arith.constant 0.000000e+00 : bf16
    %1 = vector.broadcast %cst : bf16 to vector<1x1x128xbf16>
    %2 = vector.extract_strided_slice %0 {offsets = [0, 0, 0], sizes = [1, 15, 128], strides = [1, 1, 1]} : vector<1x16x128xbf16> to vector<1x15x128xbf16>
    %3 = tpu.concatenate %1, %2 in 1 : vector<1x1x128xbf16>, vector<1x15x128xbf16> -> vector<1x16x128xbf16>
    %4 = vector.extract_strided_slice %0 {offsets = [0, 1, 0], sizes = [1, 15, 128], strides = [1, 1, 1]} : vector<1x16x128xbf16> to vector<1x15x128xbf16>
    %5 = tpu.concatenate %4, %1 in 1 : vector<1x15x128xbf16>, vector<1x1x128xbf16> -> vector<1x16x128xbf16>
    %6 = tpu.concatenate %3, %0, %5 in 2 : vector<1x16x128xbf16>, vector<1x16x128xbf16>, vector<1x16x128xbf16> -> vector<1x16x384xbf16>
    %7 = vector.shape_cast %0 : vector<1x16x128xbf16> to vector<16x128xbf16>
    %8 = arith.extf %7 : vector<16x128xbf16> to vector<16x128xf32>
    %9 = vector.shape_cast %6 : vector<1x16x384xbf16> to vector<16x384xbf16>
    %c0_2 = arith.constant 0 : index
    %c0_3 = arith.constant 0 : index
    %10 = vector.load %arg2[%c0_2, %c0_3] : memref<384x128xbf16, #tpu.memory_space<vmem>>, vector<384x128xbf16>
    %cst_4 = arith.constant dense<0.000000e+00> : vector<16x128xf32>
    %11 = tpu.matmul %9, %10, %cst_4 {dimension_numbers = #tpu.dot_dimension_numbers<[1], [0], [0], [1], [0, 0, 1, 1], [], []>} : vector<16x384xbf16>, vector<384x128xbf16>, vector<16x128xf32> -> vector<16x128xf32>
    %c0_5 = arith.constant 0 : index
    %c0_6 = arith.constant 0 : index
    %12 = vector.load %arg3[%c0_5, %c0_6] : memref<1x128xf32, #tpu.memory_space<vmem>>, vector<1x128xf32>
    %13 = vector.broadcast %12 : vector<1x128xf32> to vector<16x128xf32>
    %14 = arith.mulf %11, %13 : vector<16x128xf32>
    %c0_7 = arith.constant 0 : index
    %c0_8 = arith.constant 0 : index
    %15 = vector.load %arg4[%c0_7, %c0_8] : memref<1x128xf32, #tpu.memory_space<vmem>>, vector<1x128xf32>
    %16 = vector.broadcast %15 : vector<1x128xf32> to vector<16x128xf32>
    %17 = arith.addf %14, %16 : vector<16x128xf32>
    %cst_9 = arith.constant 0.000000e+00 : f32
    %18 = vector.broadcast %cst_9 : f32 to vector<16x128xf32>
    %19 = arith.maximumf %17, %18 : vector<16x128xf32>
    %20 = arith.truncf %19 : vector<16x128xf32> to vector<16x128xbf16>
    %21 = vector.shape_cast %20 : vector<16x128xbf16> to vector<1x16x128xbf16>
    %cst_10 = arith.constant 0.000000e+00 : bf16
    %22 = vector.broadcast %cst_10 : bf16 to vector<1x1x128xbf16>
    %23 = vector.extract_strided_slice %21 {offsets = [0, 0, 0], sizes = [1, 15, 128], strides = [1, 1, 1]} : vector<1x16x128xbf16> to vector<1x15x128xbf16>
    %24 = tpu.concatenate %22, %23 in 1 : vector<1x1x128xbf16>, vector<1x15x128xbf16> -> vector<1x16x128xbf16>
    %25 = vector.extract_strided_slice %21 {offsets = [0, 1, 0], sizes = [1, 15, 128], strides = [1, 1, 1]} : vector<1x16x128xbf16> to vector<1x15x128xbf16>
    %26 = tpu.concatenate %25, %22 in 1 : vector<1x15x128xbf16>, vector<1x1x128xbf16> -> vector<1x16x128xbf16>
    %27 = tpu.concatenate %24, %21, %26 in 2 : vector<1x16x128xbf16>, vector<1x16x128xbf16>, vector<1x16x128xbf16> -> vector<1x16x384xbf16>
    %28 = vector.shape_cast %27 : vector<1x16x384xbf16> to vector<16x384xbf16>
    %c0_11 = arith.constant 0 : index
    %c0_12 = arith.constant 0 : index
    %29 = vector.load %arg5[%c0_11, %c0_12] : memref<384x128xbf16, #tpu.memory_space<vmem>>, vector<384x128xbf16>
    %cst_13 = arith.constant dense<0.000000e+00> : vector<16x128xf32>
    %30 = tpu.matmul %28, %29, %cst_13 {dimension_numbers = #tpu.dot_dimension_numbers<[1], [0], [0], [1], [0, 0, 1, 1], [], []>} : vector<16x384xbf16>, vector<384x128xbf16>, vector<16x128xf32> -> vector<16x128xf32>
    %c0_14 = arith.constant 0 : index
    %c0_15 = arith.constant 0 : index
    %31 = vector.load %arg6[%c0_14, %c0_15] : memref<1x128xf32, #tpu.memory_space<vmem>>, vector<1x128xf32>
    %32 = vector.broadcast %31 : vector<1x128xf32> to vector<16x128xf32>
    %33 = arith.mulf %30, %32 : vector<16x128xf32>
    %c0_16 = arith.constant 0 : index
    %c0_17 = arith.constant 0 : index
    %34 = vector.load %arg7[%c0_16, %c0_17] : memref<1x128xf32, #tpu.memory_space<vmem>>, vector<1x128xf32>
    %35 = vector.broadcast %34 : vector<1x128xf32> to vector<16x128xf32>
    %36 = arith.addf %33, %35 : vector<16x128xf32>
    %37 = arith.addf %36, %8 : vector<16x128xf32>
    %38 = vector.shape_cast %37 : vector<16x128xf32> to vector<1x16x128xf32>
    %39 = arith.truncf %38 : vector<1x16x128xf32> to vector<1x16x128xbf16>
    %c0_18 = arith.constant 0 : index
    %c0_19 = arith.constant 0 : index
    %c0_20 = arith.constant 0 : index
    %40 = vector.load %arg10[%c0_18, %c0_19, %c0_20] : memref<1x16x128xbf16, #tpu.memory_space<vmem>>, vector<1x16x128xbf16>
    tpu.vector_store %arg10[%c0_18, %c0_19, %c0_20], %39 {strides = array<i32>} : memref<1x16x128xbf16, #tpu.memory_space<vmem>>, vector<1x16x128xbf16>,
    %c0_21 = arith.constant 0 : index
    %c0_22 = arith.constant 0 : index
    %41 = vector.load %arg8[%c0_21, %c0_22] : memref<1x128xf32, #tpu.memory_space<vmem>>, vector<1x128xf32>
    %42 = vector.broadcast %41 : vector<1x128xf32> to vector<16x128xf32>
    %43 = arith.mulf %37, %42 : vector<16x128xf32>
    %44 = vector.shape_cast %43 : vector<16x128xf32> to vector<1x16x128xf32>
    %45 = arith.truncf %44 : vector<1x16x128xf32> to vector<1x16x128xbf16>
    %c0_23 = arith.constant 0 : index
    %c0_24 = arith.constant 0 : index
    %c0_25 = arith.constant 0 : index
    %46 = vector.load %arg9[%c0_23, %c0_24, %c0_25] : memref<1x16x128xbf16, #tpu.memory_space<vmem>>, vector<1x16x128xbf16>
    tpu.vector_store %arg9[%c0_23, %c0_24, %c0_25], %45 {strides = array<i32>} : memref<1x16x128xbf16, #tpu.memory_space<vmem>>, vector<1x16x128xbf16>,
    return
  }
  func.func @transform_0(%arg0: i32) -> (i32, i32, i32) {
    %c0_i32 = arith.constant 0 : i32
    %c0_i32_0 = arith.constant 0 : i32
    %c0_i32_1 = arith.constant 0 : i32
    return %arg0, %c0_i32, %c0_i32_0 : i32, i32, i32
  }
  func.func @transform_1(%arg0: i32) -> (i32, i32) {
    %c0_i32 = arith.constant 0 : i32
    %c0_i32_0 = arith.constant 0 : i32
    %c0_i32_1 = arith.constant 0 : i32
    return %c0_i32, %c0_i32_0 : i32, i32
  }
  func.func @transform_2(%arg0: i32) -> (i32, i32) {
    %c0_i32 = arith.constant 0 : i32
    %c0_i32_0 = arith.constant 0 : i32
    %c0_i32_1 = arith.constant 0 : i32
    return %c0_i32, %c0_i32_0 : i32, i32
  }
  func.func @transform_3(%arg0: i32) -> (i32, i32) {
    %c0_i32 = arith.constant 0 : i32
    %c0_i32_0 = arith.constant 0 : i32
    %c0_i32_1 = arith.constant 0 : i32
    return %c0_i32, %c0_i32_0 : i32, i32
  }
  func.func @transform_4(%arg0: i32) -> (i32, i32) {
    %c0_i32 = arith.constant 0 : i32
    %c0_i32_0 = arith.constant 0 : i32
    %c0_i32_1 = arith.constant 0 : i32
    return %c0_i32, %c0_i32_0 : i32, i32
  }
  func.func @transform_5(%arg0: i32) -> (i32, i32) {
    %c0_i32 = arith.constant 0 : i32
    %c0_i32_0 = arith.constant 0 : i32
    %c0_i32_1 = arith.constant 0 : i32
    return %c0_i32, %c0_i32_0 : i32, i32
  }
  func.func @transform_6(%arg0: i32) -> (i32, i32) {
    %c0_i32 = arith.constant 0 : i32
    %c0_i32_0 = arith.constant 0 : i32
    %c0_i32_1 = arith.constant 0 : i32
    return %c0_i32, %c0_i32_0 : i32, i32
  }
  func.func @transform_7(%arg0: i32) -> (i32, i32) {
    %c0_i32 = arith.constant 0 : i32
    %c0_i32_0 = arith.constant 0 : i32
    %c0_i32_1 = arith.constant 0 : i32
    return %c0_i32, %c0_i32_0 : i32, i32
  }
  func.func @transform_8(%arg0: i32) -> (i32, i32, i32) {
    %c0_i32 = arith.constant 0 : i32
    %c0_i32_0 = arith.constant 0 : i32
    %c0_i32_1 = arith.constant 0 : i32
    return %arg0, %c0_i32, %c0_i32_0 : i32, i32, i32
  }
  func.func @transform_9(%arg0: i32) -> (i32, i32, i32) {
    %c0_i32 = arith.constant 0 : i32
    %c0_i32_0 = arith.constant 0 : i32
    %c0_i32_1 = arith.constant 0 : i32
    return %arg0, %c0_i32, %c0_i32_0 : i32, i32, i32
  }
}

module attributes {stable_mosaic.version = 11 : i64} {
  func.func @_block_kernel(%arg0: i32, %arg1: memref<1x8x256xbf16, #tpu.memory_space<vmem>>, %arg2: memref<384x128xbf16, #tpu.memory_space<vmem>>, %arg3: memref<1x128xf32, #tpu.memory_space<vmem>>, %arg4: memref<1x128xf32, #tpu.memory_space<vmem>>, %arg5: memref<384x128xbf16, #tpu.memory_space<vmem>>, %arg6: memref<1x128xf32, #tpu.memory_space<vmem>>, %arg7: memref<1x128xf32, #tpu.memory_space<vmem>>, %arg8: memref<128x128xbf16, #tpu.memory_space<vmem>>, %arg9: memref<1x8x128xbf16, #tpu.memory_space<vmem>>) attributes {dimension_semantics = [#tpu.dimension_semantics<parallel>], iteration_bounds = array<i64: 2>, scalar_prefetch = 0 : i64, scratch_operands = 0 : i64, tpu.core_type = #tpu.core_type<tc>, window_params = [{transform_indices = @transform_0, window_bounds = array<i64: 1, 8, 256>}, {pipeline_mode = #tpu.pipeline_mode<synchronous>, transform_indices = @transform_1, window_bounds = array<i64: 384, 128>}, {pipeline_mode = #tpu.pipeline_mode<synchronous>, transform_indices = @transform_2, window_bounds = array<i64: 1, 128>}, {pipeline_mode = #tpu.pipeline_mode<synchronous>, transform_indices = @transform_3, window_bounds = array<i64: 1, 128>}, {pipeline_mode = #tpu.pipeline_mode<synchronous>, transform_indices = @transform_4, window_bounds = array<i64: 384, 128>}, {pipeline_mode = #tpu.pipeline_mode<synchronous>, transform_indices = @transform_5, window_bounds = array<i64: 1, 128>}, {pipeline_mode = #tpu.pipeline_mode<synchronous>, transform_indices = @transform_6, window_bounds = array<i64: 1, 128>}, {pipeline_mode = #tpu.pipeline_mode<synchronous>, transform_indices = @transform_7, window_bounds = array<i64: 128, 128>}, {transform_indices = @transform_8, window_bounds = array<i64: 1, 8, 128>}]} {
    %c0 = arith.constant 0 : index
    %c0_0 = arith.constant 0 : index
    %c0_1 = arith.constant 0 : index
    %0 = vector.load %arg1[%c0, %c0_0, %c0_1] : memref<1x8x256xbf16, #tpu.memory_space<vmem>>, vector<1x8x256xbf16>
    %1 = vector.extract_strided_slice %0 {offsets = [0, 0, 128], sizes = [1, 8, 128], strides = [1, 1, 1]} : vector<1x8x256xbf16> to vector<1x8x128xbf16>
    %cst = arith.constant 0.000000e+00 : bf16
    %2 = vector.broadcast %cst : bf16 to vector<1x1x128xbf16>
    %3 = vector.extract_strided_slice %1 {offsets = [0, 0, 0], sizes = [1, 7, 128], strides = [1, 1, 1]} : vector<1x8x128xbf16> to vector<1x7x128xbf16>
    %4 = tpu.concatenate %2, %3 in 1 : vector<1x1x128xbf16>, vector<1x7x128xbf16> -> vector<1x8x128xbf16>
    %5 = tpu.concatenate %4, %0 in 2 : vector<1x8x128xbf16>, vector<1x8x256xbf16> -> vector<1x8x384xbf16>
    %6 = vector.extract_strided_slice %0 {offsets = [0, 0, 0], sizes = [1, 8, 128], strides = [1, 1, 1]} : vector<1x8x256xbf16> to vector<1x8x128xbf16>
    %7 = vector.shape_cast %5 : vector<1x8x384xbf16> to vector<8x384xbf16>
    %c0_2 = arith.constant 0 : index
    %c0_3 = arith.constant 0 : index
    %8 = vector.load %arg2[%c0_2, %c0_3] : memref<384x128xbf16, #tpu.memory_space<vmem>>, vector<384x128xbf16>
    %cst_4 = arith.constant dense<0.000000e+00> : vector<8x128xf32>
    %9 = tpu.matmul %7, %8, %cst_4 {dimension_numbers = #tpu.dot_dimension_numbers<[1], [0], [0], [1], [0, 0, 1, 1], [], []>} : vector<8x384xbf16>, vector<384x128xbf16>, vector<8x128xf32> -> vector<8x128xf32>
    %c0_5 = arith.constant 0 : index
    %c0_6 = arith.constant 0 : index
    %10 = vector.load %arg3[%c0_5, %c0_6] : memref<1x128xf32, #tpu.memory_space<vmem>>, vector<1x128xf32>
    %11 = vector.broadcast %10 : vector<1x128xf32> to vector<8x128xf32>
    %12 = arith.mulf %9, %11 : vector<8x128xf32>
    %c0_7 = arith.constant 0 : index
    %c0_8 = arith.constant 0 : index
    %13 = vector.load %arg4[%c0_7, %c0_8] : memref<1x128xf32, #tpu.memory_space<vmem>>, vector<1x128xf32>
    %14 = vector.broadcast %13 : vector<1x128xf32> to vector<8x128xf32>
    %15 = arith.addf %12, %14 : vector<8x128xf32>
    %cst_9 = arith.constant 0.000000e+00 : f32
    %16 = vector.broadcast %cst_9 : f32 to vector<8x128xf32>
    %17 = arith.maximumf %15, %16 : vector<8x128xf32>
    %18 = arith.truncf %17 : vector<8x128xf32> to vector<8x128xbf16>
    %19 = vector.shape_cast %18 : vector<8x128xbf16> to vector<1x8x128xbf16>
    %cst_10 = arith.constant 0.000000e+00 : bf16
    %20 = vector.broadcast %cst_10 : bf16 to vector<1x1x128xbf16>
    %21 = vector.extract_strided_slice %19 {offsets = [0, 0, 0], sizes = [1, 7, 128], strides = [1, 1, 1]} : vector<1x8x128xbf16> to vector<1x7x128xbf16>
    %22 = tpu.concatenate %20, %21 in 1 : vector<1x1x128xbf16>, vector<1x7x128xbf16> -> vector<1x8x128xbf16>
    %23 = vector.extract_strided_slice %19 {offsets = [0, 1, 0], sizes = [1, 7, 128], strides = [1, 1, 1]} : vector<1x8x128xbf16> to vector<1x7x128xbf16>
    %24 = tpu.concatenate %23, %20 in 1 : vector<1x7x128xbf16>, vector<1x1x128xbf16> -> vector<1x8x128xbf16>
    %25 = tpu.concatenate %22, %19, %24 in 2 : vector<1x8x128xbf16>, vector<1x8x128xbf16>, vector<1x8x128xbf16> -> vector<1x8x384xbf16>
    %26 = vector.shape_cast %25 : vector<1x8x384xbf16> to vector<8x384xbf16>
    %c0_11 = arith.constant 0 : index
    %c0_12 = arith.constant 0 : index
    %27 = vector.load %arg5[%c0_11, %c0_12] : memref<384x128xbf16, #tpu.memory_space<vmem>>, vector<384x128xbf16>
    %cst_13 = arith.constant dense<0.000000e+00> : vector<8x128xf32>
    %28 = tpu.matmul %26, %27, %cst_13 {dimension_numbers = #tpu.dot_dimension_numbers<[1], [0], [0], [1], [0, 0, 1, 1], [], []>} : vector<8x384xbf16>, vector<384x128xbf16>, vector<8x128xf32> -> vector<8x128xf32>
    %c0_14 = arith.constant 0 : index
    %c0_15 = arith.constant 0 : index
    %29 = vector.load %arg6[%c0_14, %c0_15] : memref<1x128xf32, #tpu.memory_space<vmem>>, vector<1x128xf32>
    %30 = vector.broadcast %29 : vector<1x128xf32> to vector<8x128xf32>
    %31 = arith.mulf %28, %30 : vector<8x128xf32>
    %c0_16 = arith.constant 0 : index
    %c0_17 = arith.constant 0 : index
    %32 = vector.load %arg7[%c0_16, %c0_17] : memref<1x128xf32, #tpu.memory_space<vmem>>, vector<1x128xf32>
    %33 = vector.broadcast %32 : vector<1x128xf32> to vector<8x128xf32>
    %34 = arith.addf %31, %33 : vector<8x128xf32>
    %35 = vector.shape_cast %6 : vector<1x8x128xbf16> to vector<8x128xbf16>
    %c0_18 = arith.constant 0 : index
    %c0_19 = arith.constant 0 : index
    %36 = vector.load %arg8[%c0_18, %c0_19] : memref<128x128xbf16, #tpu.memory_space<vmem>>, vector<128x128xbf16>
    %cst_20 = arith.constant dense<0.000000e+00> : vector<8x128xf32>
    %37 = tpu.matmul %35, %36, %cst_20 {dimension_numbers = #tpu.dot_dimension_numbers<[1], [0], [0], [1], [0, 0, 1, 1], [], []>} : vector<8x128xbf16>, vector<128x128xbf16>, vector<8x128xf32> -> vector<8x128xf32>
    %38 = arith.addf %34, %37 : vector<8x128xf32>
    %39 = vector.shape_cast %38 : vector<8x128xf32> to vector<1x8x128xf32>
    %40 = arith.truncf %39 : vector<1x8x128xf32> to vector<1x8x128xbf16>
    %c0_21 = arith.constant 0 : index
    %c0_22 = arith.constant 0 : index
    %c0_23 = arith.constant 0 : index
    %41 = vector.load %arg9[%c0_21, %c0_22, %c0_23] : memref<1x8x128xbf16, #tpu.memory_space<vmem>>, vector<1x8x128xbf16>
    tpu.vector_store %arg9[%c0_21, %c0_22, %c0_23], %40 {strides = array<i32>} : memref<1x8x128xbf16, #tpu.memory_space<vmem>>, vector<1x8x128xbf16>,
    return
  }
  func.func @transform_0(%arg0: i32) -> (i32, i32, i32) {
    %c0_i32 = arith.constant 0 : i32
    %c0_i32_0 = arith.constant 0 : i32
    %c0_i32_1 = arith.constant 0 : i32
    return %arg0, %c0_i32, %c0_i32_0 : i32, i32, i32
  }
  func.func @transform_1(%arg0: i32) -> (i32, i32) {
    %c0_i32 = arith.constant 0 : i32
    %c0_i32_0 = arith.constant 0 : i32
    %c0_i32_1 = arith.constant 0 : i32
    return %c0_i32, %c0_i32_0 : i32, i32
  }
  func.func @transform_2(%arg0: i32) -> (i32, i32) {
    %c0_i32 = arith.constant 0 : i32
    %c0_i32_0 = arith.constant 0 : i32
    %c0_i32_1 = arith.constant 0 : i32
    return %c0_i32, %c0_i32_0 : i32, i32
  }
  func.func @transform_3(%arg0: i32) -> (i32, i32) {
    %c0_i32 = arith.constant 0 : i32
    %c0_i32_0 = arith.constant 0 : i32
    %c0_i32_1 = arith.constant 0 : i32
    return %c0_i32, %c0_i32_0 : i32, i32
  }
  func.func @transform_4(%arg0: i32) -> (i32, i32) {
    %c0_i32 = arith.constant 0 : i32
    %c0_i32_0 = arith.constant 0 : i32
    %c0_i32_1 = arith.constant 0 : i32
    return %c0_i32, %c0_i32_0 : i32, i32
  }
  func.func @transform_5(%arg0: i32) -> (i32, i32) {
    %c0_i32 = arith.constant 0 : i32
    %c0_i32_0 = arith.constant 0 : i32
    %c0_i32_1 = arith.constant 0 : i32
    return %c0_i32, %c0_i32_0 : i32, i32
  }
  func.func @transform_6(%arg0: i32) -> (i32, i32) {
    %c0_i32 = arith.constant 0 : i32
    %c0_i32_0 = arith.constant 0 : i32
    %c0_i32_1 = arith.constant 0 : i32
    return %c0_i32, %c0_i32_0 : i32, i32
  }
  func.func @transform_7(%arg0: i32) -> (i32, i32) {
    %c0_i32 = arith.constant 0 : i32
    %c0_i32_0 = arith.constant 0 : i32
    %c0_i32_1 = arith.constant 0 : i32
    return %c0_i32, %c0_i32_0 : i32, i32
  }
  func.func @transform_8(%arg0: i32) -> (i32, i32, i32) {
    %c0_i32 = arith.constant 0 : i32
    %c0_i32_0 = arith.constant 0 : i32
    %c0_i32_1 = arith.constant 0 : i32
    return %arg0, %c0_i32, %c0_i32_0 : i32, i32, i32
  }
}

module attributes {stable_mosaic.version = 11 : i64} {
  func.func @_block_kernel(%arg0: i32, %arg1: memref<1x8x128xbf16, #tpu.memory_space<vmem>>, %arg2: memref<384x128xbf16, #tpu.memory_space<vmem>>, %arg3: memref<1x128xf32, #tpu.memory_space<vmem>>, %arg4: memref<1x128xf32, #tpu.memory_space<vmem>>, %arg5: memref<384x128xbf16, #tpu.memory_space<vmem>>, %arg6: memref<1x128xf32, #tpu.memory_space<vmem>>, %arg7: memref<1x128xf32, #tpu.memory_space<vmem>>, %arg8: memref<1x128xf32, #tpu.memory_space<vmem>>, %arg9: memref<1x8x128xbf16, #tpu.memory_space<vmem>>, %arg10: memref<1x8x128xbf16, #tpu.memory_space<vmem>>) attributes {dimension_semantics = [#tpu.dimension_semantics<parallel>], iteration_bounds = array<i64: 2>, scalar_prefetch = 0 : i64, scratch_operands = 0 : i64, tpu.core_type = #tpu.core_type<tc>, window_params = [{transform_indices = @transform_0, window_bounds = array<i64: 1, 8, 128>}, {pipeline_mode = #tpu.pipeline_mode<synchronous>, transform_indices = @transform_1, window_bounds = array<i64: 384, 128>}, {pipeline_mode = #tpu.pipeline_mode<synchronous>, transform_indices = @transform_2, window_bounds = array<i64: 1, 128>}, {pipeline_mode = #tpu.pipeline_mode<synchronous>, transform_indices = @transform_3, window_bounds = array<i64: 1, 128>}, {pipeline_mode = #tpu.pipeline_mode<synchronous>, transform_indices = @transform_4, window_bounds = array<i64: 384, 128>}, {pipeline_mode = #tpu.pipeline_mode<synchronous>, transform_indices = @transform_5, window_bounds = array<i64: 1, 128>}, {pipeline_mode = #tpu.pipeline_mode<synchronous>, transform_indices = @transform_6, window_bounds = array<i64: 1, 128>}, {pipeline_mode = #tpu.pipeline_mode<synchronous>, transform_indices = @transform_7, window_bounds = array<i64: 1, 128>}, {transform_indices = @transform_8, window_bounds = array<i64: 1, 8, 128>}, {transform_indices = @transform_9, window_bounds = array<i64: 1, 8, 128>}]} {
    %c0 = arith.constant 0 : index
    %c0_0 = arith.constant 0 : index
    %c0_1 = arith.constant 0 : index
    %0 = vector.load %arg1[%c0, %c0_0, %c0_1] : memref<1x8x128xbf16, #tpu.memory_space<vmem>>, vector<1x8x128xbf16>
    %cst = arith.constant 0.000000e+00 : bf16
    %1 = vector.broadcast %cst : bf16 to vector<1x1x128xbf16>
    %2 = vector.extract_strided_slice %0 {offsets = [0, 0, 0], sizes = [1, 7, 128], strides = [1, 1, 1]} : vector<1x8x128xbf16> to vector<1x7x128xbf16>
    %3 = tpu.concatenate %1, %2 in 1 : vector<1x1x128xbf16>, vector<1x7x128xbf16> -> vector<1x8x128xbf16>
    %4 = vector.extract_strided_slice %0 {offsets = [0, 1, 0], sizes = [1, 7, 128], strides = [1, 1, 1]} : vector<1x8x128xbf16> to vector<1x7x128xbf16>
    %5 = tpu.concatenate %4, %1 in 1 : vector<1x7x128xbf16>, vector<1x1x128xbf16> -> vector<1x8x128xbf16>
    %6 = tpu.concatenate %3, %0, %5 in 2 : vector<1x8x128xbf16>, vector<1x8x128xbf16>, vector<1x8x128xbf16> -> vector<1x8x384xbf16>
    %7 = vector.shape_cast %0 : vector<1x8x128xbf16> to vector<8x128xbf16>
    %8 = arith.extf %7 : vector<8x128xbf16> to vector<8x128xf32>
    %9 = vector.shape_cast %6 : vector<1x8x384xbf16> to vector<8x384xbf16>
    %c0_2 = arith.constant 0 : index
    %c0_3 = arith.constant 0 : index
    %10 = vector.load %arg2[%c0_2, %c0_3] : memref<384x128xbf16, #tpu.memory_space<vmem>>, vector<384x128xbf16>
    %cst_4 = arith.constant dense<0.000000e+00> : vector<8x128xf32>
    %11 = tpu.matmul %9, %10, %cst_4 {dimension_numbers = #tpu.dot_dimension_numbers<[1], [0], [0], [1], [0, 0, 1, 1], [], []>} : vector<8x384xbf16>, vector<384x128xbf16>, vector<8x128xf32> -> vector<8x128xf32>
    %c0_5 = arith.constant 0 : index
    %c0_6 = arith.constant 0 : index
    %12 = vector.load %arg3[%c0_5, %c0_6] : memref<1x128xf32, #tpu.memory_space<vmem>>, vector<1x128xf32>
    %13 = vector.broadcast %12 : vector<1x128xf32> to vector<8x128xf32>
    %14 = arith.mulf %11, %13 : vector<8x128xf32>
    %c0_7 = arith.constant 0 : index
    %c0_8 = arith.constant 0 : index
    %15 = vector.load %arg4[%c0_7, %c0_8] : memref<1x128xf32, #tpu.memory_space<vmem>>, vector<1x128xf32>
    %16 = vector.broadcast %15 : vector<1x128xf32> to vector<8x128xf32>
    %17 = arith.addf %14, %16 : vector<8x128xf32>
    %cst_9 = arith.constant 0.000000e+00 : f32
    %18 = vector.broadcast %cst_9 : f32 to vector<8x128xf32>
    %19 = arith.maximumf %17, %18 : vector<8x128xf32>
    %20 = arith.truncf %19 : vector<8x128xf32> to vector<8x128xbf16>
    %21 = vector.shape_cast %20 : vector<8x128xbf16> to vector<1x8x128xbf16>
    %cst_10 = arith.constant 0.000000e+00 : bf16
    %22 = vector.broadcast %cst_10 : bf16 to vector<1x1x128xbf16>
    %23 = vector.extract_strided_slice %21 {offsets = [0, 0, 0], sizes = [1, 7, 128], strides = [1, 1, 1]} : vector<1x8x128xbf16> to vector<1x7x128xbf16>
    %24 = tpu.concatenate %22, %23 in 1 : vector<1x1x128xbf16>, vector<1x7x128xbf16> -> vector<1x8x128xbf16>
    %25 = vector.extract_strided_slice %21 {offsets = [0, 1, 0], sizes = [1, 7, 128], strides = [1, 1, 1]} : vector<1x8x128xbf16> to vector<1x7x128xbf16>
    %26 = tpu.concatenate %25, %22 in 1 : vector<1x7x128xbf16>, vector<1x1x128xbf16> -> vector<1x8x128xbf16>
    %27 = tpu.concatenate %24, %21, %26 in 2 : vector<1x8x128xbf16>, vector<1x8x128xbf16>, vector<1x8x128xbf16> -> vector<1x8x384xbf16>
    %28 = vector.shape_cast %27 : vector<1x8x384xbf16> to vector<8x384xbf16>
    %c0_11 = arith.constant 0 : index
    %c0_12 = arith.constant 0 : index
    %29 = vector.load %arg5[%c0_11, %c0_12] : memref<384x128xbf16, #tpu.memory_space<vmem>>, vector<384x128xbf16>
    %cst_13 = arith.constant dense<0.000000e+00> : vector<8x128xf32>
    %30 = tpu.matmul %28, %29, %cst_13 {dimension_numbers = #tpu.dot_dimension_numbers<[1], [0], [0], [1], [0, 0, 1, 1], [], []>} : vector<8x384xbf16>, vector<384x128xbf16>, vector<8x128xf32> -> vector<8x128xf32>
    %c0_14 = arith.constant 0 : index
    %c0_15 = arith.constant 0 : index
    %31 = vector.load %arg6[%c0_14, %c0_15] : memref<1x128xf32, #tpu.memory_space<vmem>>, vector<1x128xf32>
    %32 = vector.broadcast %31 : vector<1x128xf32> to vector<8x128xf32>
    %33 = arith.mulf %30, %32 : vector<8x128xf32>
    %c0_16 = arith.constant 0 : index
    %c0_17 = arith.constant 0 : index
    %34 = vector.load %arg7[%c0_16, %c0_17] : memref<1x128xf32, #tpu.memory_space<vmem>>, vector<1x128xf32>
    %35 = vector.broadcast %34 : vector<1x128xf32> to vector<8x128xf32>
    %36 = arith.addf %33, %35 : vector<8x128xf32>
    %37 = arith.addf %36, %8 : vector<8x128xf32>
    %38 = vector.shape_cast %37 : vector<8x128xf32> to vector<1x8x128xf32>
    %39 = arith.truncf %38 : vector<1x8x128xf32> to vector<1x8x128xbf16>
    %c0_18 = arith.constant 0 : index
    %c0_19 = arith.constant 0 : index
    %c0_20 = arith.constant 0 : index
    %40 = vector.load %arg10[%c0_18, %c0_19, %c0_20] : memref<1x8x128xbf16, #tpu.memory_space<vmem>>, vector<1x8x128xbf16>
    tpu.vector_store %arg10[%c0_18, %c0_19, %c0_20], %39 {strides = array<i32>} : memref<1x8x128xbf16, #tpu.memory_space<vmem>>, vector<1x8x128xbf16>,
    %c0_21 = arith.constant 0 : index
    %c0_22 = arith.constant 0 : index
    %41 = vector.load %arg8[%c0_21, %c0_22] : memref<1x128xf32, #tpu.memory_space<vmem>>, vector<1x128xf32>
    %42 = vector.broadcast %41 : vector<1x128xf32> to vector<8x128xf32>
    %43 = arith.mulf %37, %42 : vector<8x128xf32>
    %44 = vector.shape_cast %43 : vector<8x128xf32> to vector<1x8x128xf32>
    %45 = arith.truncf %44 : vector<1x8x128xf32> to vector<1x8x128xbf16>
    %c0_23 = arith.constant 0 : index
    %c0_24 = arith.constant 0 : index
    %c0_25 = arith.constant 0 : index
    %46 = vector.load %arg9[%c0_23, %c0_24, %c0_25] : memref<1x8x128xbf16, #tpu.memory_space<vmem>>, vector<1x8x128xbf16>
    tpu.vector_store %arg9[%c0_23, %c0_24, %c0_25], %45 {strides = array<i32>} : memref<1x8x128xbf16, #tpu.memory_space<vmem>>, vector<1x8x128xbf16>,
    return
  }
  func.func @transform_0(%arg0: i32) -> (i32, i32, i32) {
    %c0_i32 = arith.constant 0 : i32
    %c0_i32_0 = arith.constant 0 : i32
    %c0_i32_1 = arith.constant 0 : i32
    return %arg0, %c0_i32, %c0_i32_0 : i32, i32, i32
  }
  func.func @transform_1(%arg0: i32) -> (i32, i32) {
    %c0_i32 = arith.constant 0 : i32
    %c0_i32_0 = arith.constant 0 : i32
    %c0_i32_1 = arith.constant 0 : i32
    return %c0_i32, %c0_i32_0 : i32, i32
  }
  func.func @transform_2(%arg0: i32) -> (i32, i32) {
    %c0_i32 = arith.constant 0 : i32
    %c0_i32_0 = arith.constant 0 : i32
    %c0_i32_1 = arith.constant 0 : i32
    return %c0_i32, %c0_i32_0 : i32, i32
  }
  func.func @transform_3(%arg0: i32) -> (i32, i32) {
    %c0_i32 = arith.constant 0 : i32
    %c0_i32_0 = arith.constant 0 : i32
    %c0_i32_1 = arith.constant 0 : i32
    return %c0_i32, %c0_i32_0 : i32, i32
  }
  func.func @transform_4(%arg0: i32) -> (i32, i32) {
    %c0_i32 = arith.constant 0 : i32
    %c0_i32_0 = arith.constant 0 : i32
    %c0_i32_1 = arith.constant 0 : i32
    return %c0_i32, %c0_i32_0 : i32, i32
  }
  func.func @transform_5(%arg0: i32) -> (i32, i32) {
    %c0_i32 = arith.constant 0 : i32
    %c0_i32_0 = arith.constant 0 : i32
    %c0_i32_1 = arith.constant 0 : i32
    return %c0_i32, %c0_i32_0 : i32, i32
  }
  func.func @transform_6(%arg0: i32) -> (i32, i32) {
    %c0_i32 = arith.constant 0 : i32
    %c0_i32_0 = arith.constant 0 : i32
    %c0_i32_1 = arith.constant 0 : i32
    return %c0_i32, %c0_i32_0 : i32, i32
  }
  func.func @transform_7(%arg0: i32) -> (i32, i32) {
    %c0_i32 = arith.constant 0 : i32
    %c0_i32_0 = arith.constant 0 : i32
    %c0_i32_1 = arith.constant 0 : i32
    return %c0_i32, %c0_i32_0 : i32, i32
  }
  func.func @transform_8(%arg0: i32) -> (i32, i32, i32) {
    %c0_i32 = arith.constant 0 : i32
    %c0_i32_0 = arith.constant 0 : i32
    %c0_i32_1 = arith.constant 0 : i32
    return %arg0, %c0_i32, %c0_i32_0 : i32, i32, i32
  }
  func.func @transform_9(%arg0: i32) -> (i32, i32, i32) {
    %c0_i32 = arith.constant 0 : i32
    %c0_i32_0 = arith.constant 0 : i32
    %c0_i32_1 = arith.constant 0 : i32
    return %arg0, %c0_i32, %c0_i32_0 : i32, i32, i32
  }
}

module attributes {stable_mosaic.version = 11 : i64} {
  func.func @_block_kernel(%arg0: i32, %arg1: memref<1x4x256xbf16, #tpu.memory_space<vmem>>, %arg2: memref<384x128xbf16, #tpu.memory_space<vmem>>, %arg3: memref<1x128xf32, #tpu.memory_space<vmem>>, %arg4: memref<1x128xf32, #tpu.memory_space<vmem>>, %arg5: memref<384x128xbf16, #tpu.memory_space<vmem>>, %arg6: memref<1x128xf32, #tpu.memory_space<vmem>>, %arg7: memref<1x128xf32, #tpu.memory_space<vmem>>, %arg8: memref<128x128xbf16, #tpu.memory_space<vmem>>, %arg9: memref<1x128xf32, #tpu.memory_space<vmem>>, %arg10: memref<1x4x128xbf16, #tpu.memory_space<vmem>>, %arg11: memref<1x4x128xbf16, #tpu.memory_space<vmem>>) attributes {dimension_semantics = [#tpu.dimension_semantics<parallel>], iteration_bounds = array<i64: 2>, scalar_prefetch = 0 : i64, scratch_operands = 0 : i64, tpu.core_type = #tpu.core_type<tc>, window_params = [{transform_indices = @transform_0, window_bounds = array<i64: 1, 4, 256>}, {pipeline_mode = #tpu.pipeline_mode<synchronous>, transform_indices = @transform_1, window_bounds = array<i64: 384, 128>}, {pipeline_mode = #tpu.pipeline_mode<synchronous>, transform_indices = @transform_2, window_bounds = array<i64: 1, 128>}, {pipeline_mode = #tpu.pipeline_mode<synchronous>, transform_indices = @transform_3, window_bounds = array<i64: 1, 128>}, {pipeline_mode = #tpu.pipeline_mode<synchronous>, transform_indices = @transform_4, window_bounds = array<i64: 384, 128>}, {pipeline_mode = #tpu.pipeline_mode<synchronous>, transform_indices = @transform_5, window_bounds = array<i64: 1, 128>}, {pipeline_mode = #tpu.pipeline_mode<synchronous>, transform_indices = @transform_6, window_bounds = array<i64: 1, 128>}, {pipeline_mode = #tpu.pipeline_mode<synchronous>, transform_indices = @transform_7, window_bounds = array<i64: 128, 128>}, {pipeline_mode = #tpu.pipeline_mode<synchronous>, transform_indices = @transform_8, window_bounds = array<i64: 1, 128>}, {transform_indices = @transform_9, window_bounds = array<i64: 1, 4, 128>}, {transform_indices = @transform_10, window_bounds = array<i64: 1, 4, 128>}]} {
    %c0 = arith.constant 0 : index
    %c0_0 = arith.constant 0 : index
    %c0_1 = arith.constant 0 : index
    %0 = vector.load %arg1[%c0, %c0_0, %c0_1] : memref<1x4x256xbf16, #tpu.memory_space<vmem>>, vector<1x4x256xbf16>
    %1 = vector.extract_strided_slice %0 {offsets = [0, 0, 128], sizes = [1, 4, 128], strides = [1, 1, 1]} : vector<1x4x256xbf16> to vector<1x4x128xbf16>
    %cst = arith.constant 0.000000e+00 : bf16
    %2 = vector.broadcast %cst : bf16 to vector<1x1x128xbf16>
    %3 = vector.extract_strided_slice %1 {offsets = [0, 0, 0], sizes = [1, 3, 128], strides = [1, 1, 1]} : vector<1x4x128xbf16> to vector<1x3x128xbf16>
    %4 = tpu.concatenate %2, %3 in 1 : vector<1x1x128xbf16>, vector<1x3x128xbf16> -> vector<1x4x128xbf16>
    %5 = tpu.concatenate %4, %0 in 2 : vector<1x4x128xbf16>, vector<1x4x256xbf16> -> vector<1x4x384xbf16>
    %6 = vector.extract_strided_slice %0 {offsets = [0, 0, 0], sizes = [1, 4, 128], strides = [1, 1, 1]} : vector<1x4x256xbf16> to vector<1x4x128xbf16>
    %7 = vector.shape_cast %5 : vector<1x4x384xbf16> to vector<4x384xbf16>
    %c0_2 = arith.constant 0 : index
    %c0_3 = arith.constant 0 : index
    %8 = vector.load %arg2[%c0_2, %c0_3] : memref<384x128xbf16, #tpu.memory_space<vmem>>, vector<384x128xbf16>
    %cst_4 = arith.constant dense<0.000000e+00> : vector<4x128xf32>
    %9 = tpu.matmul %7, %8, %cst_4 {dimension_numbers = #tpu.dot_dimension_numbers<[1], [0], [0], [1], [0, 0, 1, 1], [], []>} : vector<4x384xbf16>, vector<384x128xbf16>, vector<4x128xf32> -> vector<4x128xf32>
    %c0_5 = arith.constant 0 : index
    %c0_6 = arith.constant 0 : index
    %10 = vector.load %arg3[%c0_5, %c0_6] : memref<1x128xf32, #tpu.memory_space<vmem>>, vector<1x128xf32>
    %11 = vector.broadcast %10 : vector<1x128xf32> to vector<4x128xf32>
    %12 = arith.mulf %9, %11 : vector<4x128xf32>
    %c0_7 = arith.constant 0 : index
    %c0_8 = arith.constant 0 : index
    %13 = vector.load %arg4[%c0_7, %c0_8] : memref<1x128xf32, #tpu.memory_space<vmem>>, vector<1x128xf32>
    %14 = vector.broadcast %13 : vector<1x128xf32> to vector<4x128xf32>
    %15 = arith.addf %12, %14 : vector<4x128xf32>
    %cst_9 = arith.constant 0.000000e+00 : f32
    %16 = vector.broadcast %cst_9 : f32 to vector<4x128xf32>
    %17 = arith.maximumf %15, %16 : vector<4x128xf32>
    %18 = arith.truncf %17 : vector<4x128xf32> to vector<4x128xbf16>
    %19 = vector.shape_cast %18 : vector<4x128xbf16> to vector<1x4x128xbf16>
    %cst_10 = arith.constant 0.000000e+00 : bf16
    %20 = vector.broadcast %cst_10 : bf16 to vector<1x1x128xbf16>
    %21 = vector.extract_strided_slice %19 {offsets = [0, 0, 0], sizes = [1, 3, 128], strides = [1, 1, 1]} : vector<1x4x128xbf16> to vector<1x3x128xbf16>
    %22 = tpu.concatenate %20, %21 in 1 : vector<1x1x128xbf16>, vector<1x3x128xbf16> -> vector<1x4x128xbf16>
    %23 = vector.extract_strided_slice %19 {offsets = [0, 1, 0], sizes = [1, 3, 128], strides = [1, 1, 1]} : vector<1x4x128xbf16> to vector<1x3x128xbf16>
    %24 = tpu.concatenate %23, %20 in 1 : vector<1x3x128xbf16>, vector<1x1x128xbf16> -> vector<1x4x128xbf16>
    %25 = tpu.concatenate %22, %19, %24 in 2 : vector<1x4x128xbf16>, vector<1x4x128xbf16>, vector<1x4x128xbf16> -> vector<1x4x384xbf16>
    %26 = vector.shape_cast %25 : vector<1x4x384xbf16> to vector<4x384xbf16>
    %c0_11 = arith.constant 0 : index
    %c0_12 = arith.constant 0 : index
    %27 = vector.load %arg5[%c0_11, %c0_12] : memref<384x128xbf16, #tpu.memory_space<vmem>>, vector<384x128xbf16>
    %cst_13 = arith.constant dense<0.000000e+00> : vector<4x128xf32>
    %28 = tpu.matmul %26, %27, %cst_13 {dimension_numbers = #tpu.dot_dimension_numbers<[1], [0], [0], [1], [0, 0, 1, 1], [], []>} : vector<4x384xbf16>, vector<384x128xbf16>, vector<4x128xf32> -> vector<4x128xf32>
    %c0_14 = arith.constant 0 : index
    %c0_15 = arith.constant 0 : index
    %29 = vector.load %arg6[%c0_14, %c0_15] : memref<1x128xf32, #tpu.memory_space<vmem>>, vector<1x128xf32>
    %30 = vector.broadcast %29 : vector<1x128xf32> to vector<4x128xf32>
    %31 = arith.mulf %28, %30 : vector<4x128xf32>
    %c0_16 = arith.constant 0 : index
    %c0_17 = arith.constant 0 : index
    %32 = vector.load %arg7[%c0_16, %c0_17] : memref<1x128xf32, #tpu.memory_space<vmem>>, vector<1x128xf32>
    %33 = vector.broadcast %32 : vector<1x128xf32> to vector<4x128xf32>
    %34 = arith.addf %31, %33 : vector<4x128xf32>
    %35 = vector.shape_cast %6 : vector<1x4x128xbf16> to vector<4x128xbf16>
    %c0_18 = arith.constant 0 : index
    %c0_19 = arith.constant 0 : index
    %36 = vector.load %arg8[%c0_18, %c0_19] : memref<128x128xbf16, #tpu.memory_space<vmem>>, vector<128x128xbf16>
    %cst_20 = arith.constant dense<0.000000e+00> : vector<4x128xf32>
    %37 = tpu.matmul %35, %36, %cst_20 {dimension_numbers = #tpu.dot_dimension_numbers<[1], [0], [0], [1], [0, 0, 1, 1], [], []>} : vector<4x128xbf16>, vector<128x128xbf16>, vector<4x128xf32> -> vector<4x128xf32>
    %38 = arith.addf %34, %37 : vector<4x128xf32>
    %39 = vector.shape_cast %38 : vector<4x128xf32> to vector<1x4x128xf32>
    %40 = arith.truncf %39 : vector<1x4x128xf32> to vector<1x4x128xbf16>
    %c0_21 = arith.constant 0 : index
    %c0_22 = arith.constant 0 : index
    %c0_23 = arith.constant 0 : index
    %41 = vector.load %arg11[%c0_21, %c0_22, %c0_23] : memref<1x4x128xbf16, #tpu.memory_space<vmem>>, vector<1x4x128xbf16>
    tpu.vector_store %arg11[%c0_21, %c0_22, %c0_23], %40 {strides = array<i32>} : memref<1x4x128xbf16, #tpu.memory_space<vmem>>, vector<1x4x128xbf16>,
    %c0_24 = arith.constant 0 : index
    %c0_25 = arith.constant 0 : index
    %42 = vector.load %arg9[%c0_24, %c0_25] : memref<1x128xf32, #tpu.memory_space<vmem>>, vector<1x128xf32>
    %43 = vector.broadcast %42 : vector<1x128xf32> to vector<4x128xf32>
    %44 = arith.mulf %38, %43 : vector<4x128xf32>
    %45 = vector.shape_cast %44 : vector<4x128xf32> to vector<1x4x128xf32>
    %46 = arith.truncf %45 : vector<1x4x128xf32> to vector<1x4x128xbf16>
    %c0_26 = arith.constant 0 : index
    %c0_27 = arith.constant 0 : index
    %c0_28 = arith.constant 0 : index
    %47 = vector.load %arg10[%c0_26, %c0_27, %c0_28] : memref<1x4x128xbf16, #tpu.memory_space<vmem>>, vector<1x4x128xbf16>
    tpu.vector_store %arg10[%c0_26, %c0_27, %c0_28], %46 {strides = array<i32>} : memref<1x4x128xbf16, #tpu.memory_space<vmem>>, vector<1x4x128xbf16>,
    return
  }
  func.func @transform_0(%arg0: i32) -> (i32, i32, i32) {
    %c0_i32 = arith.constant 0 : i32
    %c0_i32_0 = arith.constant 0 : i32
    %c0_i32_1 = arith.constant 0 : i32
    return %arg0, %c0_i32, %c0_i32_0 : i32, i32, i32
  }
  func.func @transform_1(%arg0: i32) -> (i32, i32) {
    %c0_i32 = arith.constant 0 : i32
    %c0_i32_0 = arith.constant 0 : i32
    %c0_i32_1 = arith.constant 0 : i32
    return %c0_i32, %c0_i32_0 : i32, i32
  }
  func.func @transform_2(%arg0: i32) -> (i32, i32) {
    %c0_i32 = arith.constant 0 : i32
    %c0_i32_0 = arith.constant 0 : i32
    %c0_i32_1 = arith.constant 0 : i32
    return %c0_i32, %c0_i32_0 : i32, i32
  }
  func.func @transform_3(%arg0: i32) -> (i32, i32) {
    %c0_i32 = arith.constant 0 : i32
    %c0_i32_0 = arith.constant 0 : i32
    %c0_i32_1 = arith.constant 0 : i32
    return %c0_i32, %c0_i32_0 : i32, i32
  }
  func.func @transform_4(%arg0: i32) -> (i32, i32) {
    %c0_i32 = arith.constant 0 : i32
    %c0_i32_0 = arith.constant 0 : i32
    %c0_i32_1 = arith.constant 0 : i32
    return %c0_i32, %c0_i32_0 : i32, i32
  }
  func.func @transform_5(%arg0: i32) -> (i32, i32) {
    %c0_i32 = arith.constant 0 : i32
    %c0_i32_0 = arith.constant 0 : i32
    %c0_i32_1 = arith.constant 0 : i32
    return %c0_i32, %c0_i32_0 : i32, i32
  }
  func.func @transform_6(%arg0: i32) -> (i32, i32) {
    %c0_i32 = arith.constant 0 : i32
    %c0_i32_0 = arith.constant 0 : i32
    %c0_i32_1 = arith.constant 0 : i32
    return %c0_i32, %c0_i32_0 : i32, i32
  }
  func.func @transform_7(%arg0: i32) -> (i32, i32) {
    %c0_i32 = arith.constant 0 : i32
    %c0_i32_0 = arith.constant 0 : i32
    %c0_i32_1 = arith.constant 0 : i32
    return %c0_i32, %c0_i32_0 : i32, i32
  }
  func.func @transform_8(%arg0: i32) -> (i32, i32) {
    %c0_i32 = arith.constant 0 : i32
    %c0_i32_0 = arith.constant 0 : i32
    %c0_i32_1 = arith.constant 0 : i32
    return %c0_i32, %c0_i32_0 : i32, i32
  }
  func.func @transform_9(%arg0: i32) -> (i32, i32, i32) {
    %c0_i32 = arith.constant 0 : i32
    %c0_i32_0 = arith.constant 0 : i32
    %c0_i32_1 = arith.constant 0 : i32
    return %arg0, %c0_i32, %c0_i32_0 : i32, i32, i32
  }
  func.func @transform_10(%arg0: i32) -> (i32, i32, i32) {
    %c0_i32 = arith.constant 0 : i32
    %c0_i32_0 = arith.constant 0 : i32
    %c0_i32_1 = arith.constant 0 : i32
    return %arg0, %c0_i32, %c0_i32_0 : i32, i32, i32
  }
}

module attributes {stable_mosaic.version = 11 : i64} {
  func.func @_block_kernel(%arg0: i32, %arg1: memref<1x4x128xbf16, #tpu.memory_space<vmem>>, %arg2: memref<384x128xbf16, #tpu.memory_space<vmem>>, %arg3: memref<1x128xf32, #tpu.memory_space<vmem>>, %arg4: memref<1x128xf32, #tpu.memory_space<vmem>>, %arg5: memref<384x128xbf16, #tpu.memory_space<vmem>>, %arg6: memref<1x128xf32, #tpu.memory_space<vmem>>, %arg7: memref<1x128xf32, #tpu.memory_space<vmem>>, %arg8: memref<1x128xf32, #tpu.memory_space<vmem>>, %arg9: memref<128x32xf32, #tpu.memory_space<vmem>>, %arg10: memref<1x32xf32, #tpu.memory_space<vmem>>, %arg11: memref<1x4x128xbf16, #tpu.memory_space<vmem>>, %arg12: memref<1x1x32xf32, #tpu.memory_space<vmem>>, %arg13: memref<1x1x32xf32, #tpu.memory_space<vmem>>) attributes {dimension_semantics = [#tpu.dimension_semantics<parallel>], iteration_bounds = array<i64: 2>, scalar_prefetch = 0 : i64, scratch_operands = 0 : i64, tpu.core_type = #tpu.core_type<tc>, window_params = [{transform_indices = @transform_0, window_bounds = array<i64: 1, 4, 128>}, {pipeline_mode = #tpu.pipeline_mode<synchronous>, transform_indices = @transform_1, window_bounds = array<i64: 384, 128>}, {pipeline_mode = #tpu.pipeline_mode<synchronous>, transform_indices = @transform_2, window_bounds = array<i64: 1, 128>}, {pipeline_mode = #tpu.pipeline_mode<synchronous>, transform_indices = @transform_3, window_bounds = array<i64: 1, 128>}, {pipeline_mode = #tpu.pipeline_mode<synchronous>, transform_indices = @transform_4, window_bounds = array<i64: 384, 128>}, {pipeline_mode = #tpu.pipeline_mode<synchronous>, transform_indices = @transform_5, window_bounds = array<i64: 1, 128>}, {pipeline_mode = #tpu.pipeline_mode<synchronous>, transform_indices = @transform_6, window_bounds = array<i64: 1, 128>}, {pipeline_mode = #tpu.pipeline_mode<synchronous>, transform_indices = @transform_7, window_bounds = array<i64: 1, 128>}, {pipeline_mode = #tpu.pipeline_mode<synchronous>, transform_indices = @transform_8, window_bounds = array<i64: 128, 32>}, {pipeline_mode = #tpu.pipeline_mode<synchronous>, transform_indices = @transform_9, window_bounds = array<i64: 1, 32>}, {transform_indices = @transform_10, window_bounds = array<i64: 1, 4, 128>}, {transform_indices = @transform_11, window_bounds = array<i64: 1, 1, 32>}, {transform_indices = @transform_12, window_bounds = array<i64: 1, 1, 32>}]} {
    %c0 = arith.constant 0 : index
    %c0_0 = arith.constant 0 : index
    %c0_1 = arith.constant 0 : index
    %0 = vector.load %arg1[%c0, %c0_0, %c0_1] : memref<1x4x128xbf16, #tpu.memory_space<vmem>>, vector<1x4x128xbf16>
    %cst = arith.constant 0.000000e+00 : bf16
    %1 = vector.broadcast %cst : bf16 to vector<1x1x128xbf16>
    %2 = vector.extract_strided_slice %0 {offsets = [0, 0, 0], sizes = [1, 3, 128], strides = [1, 1, 1]} : vector<1x4x128xbf16> to vector<1x3x128xbf16>
    %3 = tpu.concatenate %1, %2 in 1 : vector<1x1x128xbf16>, vector<1x3x128xbf16> -> vector<1x4x128xbf16>
    %4 = vector.extract_strided_slice %0 {offsets = [0, 1, 0], sizes = [1, 3, 128], strides = [1, 1, 1]} : vector<1x4x128xbf16> to vector<1x3x128xbf16>
    %5 = tpu.concatenate %4, %1 in 1 : vector<1x3x128xbf16>, vector<1x1x128xbf16> -> vector<1x4x128xbf16>
    %6 = tpu.concatenate %3, %0, %5 in 2 : vector<1x4x128xbf16>, vector<1x4x128xbf16>, vector<1x4x128xbf16> -> vector<1x4x384xbf16>
    %7 = vector.shape_cast %0 : vector<1x4x128xbf16> to vector<4x128xbf16>
    %8 = arith.extf %7 : vector<4x128xbf16> to vector<4x128xf32>
    %9 = vector.shape_cast %6 : vector<1x4x384xbf16> to vector<4x384xbf16>
    %c0_2 = arith.constant 0 : index
    %c0_3 = arith.constant 0 : index
    %10 = vector.load %arg2[%c0_2, %c0_3] : memref<384x128xbf16, #tpu.memory_space<vmem>>, vector<384x128xbf16>
    %cst_4 = arith.constant dense<0.000000e+00> : vector<4x128xf32>
    %11 = tpu.matmul %9, %10, %cst_4 {dimension_numbers = #tpu.dot_dimension_numbers<[1], [0], [0], [1], [0, 0, 1, 1], [], []>} : vector<4x384xbf16>, vector<384x128xbf16>, vector<4x128xf32> -> vector<4x128xf32>
    %c0_5 = arith.constant 0 : index
    %c0_6 = arith.constant 0 : index
    %12 = vector.load %arg3[%c0_5, %c0_6] : memref<1x128xf32, #tpu.memory_space<vmem>>, vector<1x128xf32>
    %13 = vector.broadcast %12 : vector<1x128xf32> to vector<4x128xf32>
    %14 = arith.mulf %11, %13 : vector<4x128xf32>
    %c0_7 = arith.constant 0 : index
    %c0_8 = arith.constant 0 : index
    %15 = vector.load %arg4[%c0_7, %c0_8] : memref<1x128xf32, #tpu.memory_space<vmem>>, vector<1x128xf32>
    %16 = vector.broadcast %15 : vector<1x128xf32> to vector<4x128xf32>
    %17 = arith.addf %14, %16 : vector<4x128xf32>
    %cst_9 = arith.constant 0.000000e+00 : f32
    %18 = vector.broadcast %cst_9 : f32 to vector<4x128xf32>
    %19 = arith.maximumf %17, %18 : vector<4x128xf32>
    %20 = arith.truncf %19 : vector<4x128xf32> to vector<4x128xbf16>
    %21 = vector.shape_cast %20 : vector<4x128xbf16> to vector<1x4x128xbf16>
    %cst_10 = arith.constant 0.000000e+00 : bf16
    %22 = vector.broadcast %cst_10 : bf16 to vector<1x1x128xbf16>
    %23 = vector.extract_strided_slice %21 {offsets = [0, 0, 0], sizes = [1, 3, 128], strides = [1, 1, 1]} : vector<1x4x128xbf16> to vector<1x3x128xbf16>
    %24 = tpu.concatenate %22, %23 in 1 : vector<1x1x128xbf16>, vector<1x3x128xbf16> -> vector<1x4x128xbf16>
    %25 = vector.extract_strided_slice %21 {offsets = [0, 1, 0], sizes = [1, 3, 128], strides = [1, 1, 1]} : vector<1x4x128xbf16> to vector<1x3x128xbf16>
    %26 = tpu.concatenate %25, %22 in 1 : vector<1x3x128xbf16>, vector<1x1x128xbf16> -> vector<1x4x128xbf16>
    %27 = tpu.concatenate %24, %21, %26 in 2 : vector<1x4x128xbf16>, vector<1x4x128xbf16>, vector<1x4x128xbf16> -> vector<1x4x384xbf16>
    %28 = vector.shape_cast %27 : vector<1x4x384xbf16> to vector<4x384xbf16>
    %c0_11 = arith.constant 0 : index
    %c0_12 = arith.constant 0 : index
    %29 = vector.load %arg5[%c0_11, %c0_12] : memref<384x128xbf16, #tpu.memory_space<vmem>>, vector<384x128xbf16>
    %cst_13 = arith.constant dense<0.000000e+00> : vector<4x128xf32>
    %30 = tpu.matmul %28, %29, %cst_13 {dimension_numbers = #tpu.dot_dimension_numbers<[1], [0], [0], [1], [0, 0, 1, 1], [], []>} : vector<4x384xbf16>, vector<384x128xbf16>, vector<4x128xf32> -> vector<4x128xf32>
    %c0_14 = arith.constant 0 : index
    %c0_15 = arith.constant 0 : index
    %31 = vector.load %arg6[%c0_14, %c0_15] : memref<1x128xf32, #tpu.memory_space<vmem>>, vector<1x128xf32>
    %32 = vector.broadcast %31 : vector<1x128xf32> to vector<4x128xf32>
    %33 = arith.mulf %30, %32 : vector<4x128xf32>
    %c0_16 = arith.constant 0 : index
    %c0_17 = arith.constant 0 : index
    %34 = vector.load %arg7[%c0_16, %c0_17] : memref<1x128xf32, #tpu.memory_space<vmem>>, vector<1x128xf32>
    %35 = vector.broadcast %34 : vector<1x128xf32> to vector<4x128xf32>
    %36 = arith.addf %33, %35 : vector<4x128xf32>
    %37 = arith.addf %36, %8 : vector<4x128xf32>
    %c0_18 = arith.constant 0 : index
    %c0_19 = arith.constant 0 : index
    %38 = vector.load %arg8[%c0_18, %c0_19] : memref<1x128xf32, #tpu.memory_space<vmem>>, vector<1x128xf32>
    %39 = vector.broadcast %38 : vector<1x128xf32> to vector<4x128xf32>
    %40 = arith.mulf %37, %39 : vector<4x128xf32>
    %41 = vector.shape_cast %40 : vector<4x128xf32> to vector<1x4x128xf32>
    %42 = arith.truncf %41 : vector<1x4x128xf32> to vector<1x4x128xbf16>
    %c0_20 = arith.constant 0 : index
    %c0_21 = arith.constant 0 : index
    %c0_22 = arith.constant 0 : index
    %43 = vector.load %arg11[%c0_20, %c0_21, %c0_22] : memref<1x4x128xbf16, #tpu.memory_space<vmem>>, vector<1x4x128xbf16>
    tpu.vector_store %arg11[%c0_20, %c0_21, %c0_22], %42 {strides = array<i32>} : memref<1x4x128xbf16, #tpu.memory_space<vmem>>, vector<1x4x128xbf16>,
    %44 = vector.shape_cast %40 : vector<4x128xf32> to vector<1x4x128xf32>
    %cst_23 = arith.constant dense<0.000000e+00> : vector<1x128xf32>
    %45 = vector.multi_reduction <add>, %44, %cst_23 [1] : vector<1x4x128xf32> to vector<1x128xf32>
    %cst_24 = arith.constant 0.000000e+00 : f32
    %46 = vector.broadcast %cst_24 : f32 to vector<1x4x128xf32>
    %47 = arith.maximumf %44, %46 : vector<1x4x128xf32>
    %cst_25 = arith.constant dense<0.000000e+00> : vector<1x128xf32>
    %48 = vector.multi_reduction <add>, %47, %cst_25 [1] : vector<1x4x128xf32> to vector<1x128xf32>
    %c0_26 = arith.constant 0 : index
    %c0_27 = arith.constant 0 : index
    %49 = vector.load %arg9[%c0_26, %c0_27] : memref<128x32xf32, #tpu.memory_space<vmem>>, vector<128x32xf32>
    %cst_28 = arith.constant dense<0.000000e+00> : vector<1x32xf32>
    %50 = tpu.matmul %45, %49, %cst_28 {dimension_numbers = #tpu.dot_dimension_numbers<[1], [0], [0], [1], [0, 0, 1, 1], [], []>} : vector<1x128xf32>, vector<128x32xf32>, vector<1x32xf32> -> vector<1x32xf32>
    %cst_29 = arith.constant 6.250000e-02 : f32
    %51 = vector.broadcast %cst_29 : f32 to vector<1x32xf32>
    %52 = arith.mulf %50, %51 : vector<1x32xf32>
    %cst_30 = arith.constant dense<0.000000e+00> : vector<1x32xf32>
    %53 = tpu.matmul %48, %49, %cst_30 {dimension_numbers = #tpu.dot_dimension_numbers<[1], [0], [0], [1], [0, 0, 1, 1], [], []>} : vector<1x128xf32>, vector<128x32xf32>, vector<1x32xf32> -> vector<1x32xf32>
    %cst_31 = arith.constant 6.250000e-02 : f32
    %54 = vector.broadcast %cst_31 : f32 to vector<1x32xf32>
    %55 = arith.mulf %53, %54 : vector<1x32xf32>
    %c0_32 = arith.constant 0 : index
    %c0_33 = arith.constant 0 : index
    %56 = vector.load %arg10[%c0_32, %c0_33] : memref<1x32xf32, #tpu.memory_space<vmem>>, vector<1x32xf32>
    %57 = arith.mulf %52, %56 : vector<1x32xf32>
    %58 = vector.shape_cast %57 : vector<1x32xf32> to vector<1x1x32xf32>
    %c0_34 = arith.constant 0 : index
    %c0_35 = arith.constant 0 : index
    %c0_36 = arith.constant 0 : index
    %59 = vector.load %arg12[%c0_34, %c0_35, %c0_36] : memref<1x1x32xf32, #tpu.memory_space<vmem>>, vector<1x1x32xf32>
    tpu.vector_store %arg12[%c0_34, %c0_35, %c0_36], %58 {strides = array<i32>} : memref<1x1x32xf32, #tpu.memory_space<vmem>>, vector<1x1x32xf32>,
    %60 = vector.shape_cast %55 : vector<1x32xf32> to vector<1x1x32xf32>
    %c0_37 = arith.constant 0 : index
    %c0_38 = arith.constant 0 : index
    %c0_39 = arith.constant 0 : index
    %61 = vector.load %arg13[%c0_37, %c0_38, %c0_39] : memref<1x1x32xf32, #tpu.memory_space<vmem>>, vector<1x1x32xf32>
    tpu.vector_store %arg13[%c0_37, %c0_38, %c0_39], %60 {strides = array<i32>} : memref<1x1x32xf32, #tpu.memory_space<vmem>>, vector<1x1x32xf32>,
    return
  }
  func.func @transform_0(%arg0: i32) -> (i32, i32, i32) {
    %c0_i32 = arith.constant 0 : i32
    %c0_i32_0 = arith.constant 0 : i32
    %c0_i32_1 = arith.constant 0 : i32
    return %arg0, %c0_i32, %c0_i32_0 : i32, i32, i32
  }
  func.func @transform_1(%arg0: i32) -> (i32, i32) {
    %c0_i32 = arith.constant 0 : i32
    %c0_i32_0 = arith.constant 0 : i32
    %c0_i32_1 = arith.constant 0 : i32
    return %c0_i32, %c0_i32_0 : i32, i32
  }
  func.func @transform_2(%arg0: i32) -> (i32, i32) {
    %c0_i32 = arith.constant 0 : i32
    %c0_i32_0 = arith.constant 0 : i32
    %c0_i32_1 = arith.constant 0 : i32
    return %c0_i32, %c0_i32_0 : i32, i32
  }
  func.func @transform_3(%arg0: i32) -> (i32, i32) {
    %c0_i32 = arith.constant 0 : i32
    %c0_i32_0 = arith.constant 0 : i32
    %c0_i32_1 = arith.constant 0 : i32
    return %c0_i32, %c0_i32_0 : i32, i32
  }
  func.func @transform_4(%arg0: i32) -> (i32, i32) {
    %c0_i32 = arith.constant 0 : i32
    %c0_i32_0 = arith.constant 0 : i32
    %c0_i32_1 = arith.constant 0 : i32
    return %c0_i32, %c0_i32_0 : i32, i32
  }
  func.func @transform_5(%arg0: i32) -> (i32, i32) {
    %c0_i32 = arith.constant 0 : i32
    %c0_i32_0 = arith.constant 0 : i32
    %c0_i32_1 = arith.constant 0 : i32
    return %c0_i32, %c0_i32_0 : i32, i32
  }
  func.func @transform_6(%arg0: i32) -> (i32, i32) {
    %c0_i32 = arith.constant 0 : i32
    %c0_i32_0 = arith.constant 0 : i32
    %c0_i32_1 = arith.constant 0 : i32
    return %c0_i32, %c0_i32_0 : i32, i32
  }
  func.func @transform_7(%arg0: i32) -> (i32, i32) {
    %c0_i32 = arith.constant 0 : i32
    %c0_i32_0 = arith.constant 0 : i32
    %c0_i32_1 = arith.constant 0 : i32
    return %c0_i32, %c0_i32_0 : i32, i32
  }
  func.func @transform_8(%arg0: i32) -> (i32, i32) {
    %c0_i32 = arith.constant 0 : i32
    %c0_i32_0 = arith.constant 0 : i32
    %c0_i32_1 = arith.constant 0 : i32
    return %c0_i32, %c0_i32_0 : i32, i32
  }
  func.func @transform_9(%arg0: i32) -> (i32, i32) {
    %c0_i32 = arith.constant 0 : i32
    %c0_i32_0 = arith.constant 0 : i32
    %c0_i32_1 = arith.constant 0 : i32
    return %c0_i32, %c0_i32_0 : i32, i32
  }
  func.func @transform_10(%arg0: i32) -> (i32, i32, i32) {
    %c0_i32 = arith.constant 0 : i32
    %c0_i32_0 = arith.constant 0 : i32
    %c0_i32_1 = arith.constant 0 : i32
    return %arg0, %c0_i32, %c0_i32_0 : i32, i32, i32
  }
  func.func @transform_11(%arg0: i32) -> (i32, i32, i32) {
    %c0_i32 = arith.constant 0 : i32
    %c0_i32_0 = arith.constant 0 : i32
    %c0_i32_1 = arith.constant 0 : i32
    return %arg0, %c0_i32, %c0_i32_0 : i32, i32, i32
  }
  func.func @transform_12(%arg0: i32) -> (i32, i32, i32) {
    %c0_i32 = arith.constant 0 : i32
    %c0_i32_0 = arith.constant 0 : i32
    %c0_i32_1 = arith.constant 0 : i32
    return %arg0, %c0_i32, %c0_i32_0 : i32, i32, i32
  }
}

</mosaic_0001>

<bundles_post_ra>
// kernel: cifar_resnet_forward.7
= control target key start
LH: loop header
LB: loop body
LE: loop exit
PB: predicated region body
PF: predicated region fallthrough
CT: control target
= control target key end

     0   :  { %s755_s15 = smov 0   ;;  %s870_s0 = inlined_call_operand.vmem [shape: bf16[2,16,128], index: 0, kind: input, shape index: {}]   ;;  %s871_s1 = inlined_call_operand.vmem [shape: bf16[384,128], index: 1, kind: input, shape index: {}]   ;;  %s872_s2 = inlined_call_operand.vmem [shape: f32[1,128], index: 2, kind: input, shape index: {}]   ;;  %s873_s3 = inlined_call_operand.vmem [shape: f32[1,128], index: 3, kind: input, shape index: {}]   ;;  %s874_s4 = inlined_call_operand.vmem [shape: bf16[2,16,128], index: 4, kind: output, shape index: {}]  }
   0x1 LB: > { %s585_s16 = sadd.s32 4294967295, %s726_s15   ;;  %p589_p0 = scmp.ge.s32.totalorder %s726_s15, 1  ;;  %s726_s15 = sphi %s755_s15, %s14_s15  }
   0x2   : > { %p162_p1 = scmp.lt.s32.totalorder %s726_s15, 3 }
   0x4   : > { %p163_p2 = pnand %p589_p0, %p162_p1 }
   0x5   : > { %p188_p3 = scmp.lt.s32.totalorder (!%p163_p2), %s585_s16, 1 }
   0x6   : > { %166 = sbr.rel (%p163_p2) target bundleno = 257 (0x101), region = 36 }
   0xb   : > { %v695_v0 = vld [vmem:[%s871_s1 + $0x78] sm:$0xff]   ;;  %v728_v1 = vmov 0.0   ;;  %vm729_vm0 = vmmov 0   ;;  %v698_v4 = vld [vmem:[%s871_s1 + $0x70] sm:$0xff]   ;;  %v701_v7 = vld [vmem:[%s871_s1 + $0x68] sm:$0xff]   ;;  %s876_s16 = smov (!%p188_p3, %s585_s16), 1 }
   0xc   : > { %665 = vmatprep.subr.bf16.mxu1 %v728_v1  ;;  %v696_v2 = vld [vmem:[%s871_s1 + $0xb8] sm:$0xff]   ;;  %634 = vmatprep.subr.bf16.mxu0 %v695_v0  ;;  %v699_v5 = vld [vmem:[%s871_s1 + $0xb0] sm:$0xff]   ;;  %v702_v8 = vld [vmem:[%s871_s1 + $0xa8] sm:$0xff]   ;;  %s625_s25 = sshll.u32 %s876_s16, 3  ;;  %vm221_vm1 = vcmask 1047552   ;;  %vm214_vm3 = vcmask 1040384  }
   0xd   : > { %v697_v3 = vld [vmem:[%s871_s1 + $0x38] sm:$0xff]   ;;  %681 = vmatprep.mubr.msk.bf16.mxu1 %vm729_vm0, %v728_v1  ;;  %666 = vmatpush3.bf16.msra.mxu1 %v696_v2  ;;  %v700_v6 = vld [vmem:[%s871_s1 + $0x30] sm:$0xff]   ;;  %v703_v9 = vld [vmem:[%s871_s1 + $0x28] sm:$0xff]   ;;  %s192_s8 = scalar_lea.vmem %s870_s0, %s625_s25  ;;  %vm222_vm2 = vsmask.f32 7424  ;;  %s197_s28 = scalar_lea.vmem %s874_s4, %s625_s25 }
   0xe   : > { %635 = vmatpush3.bf16.msra.mxu0 %v697_v3  ;;  %667 = vmatprep.subr.bf16.mxu1 %v728_v1  ;;  %v704_v10 = vld [vmem:[%s871_s1 + $0x60] sm:$0xff]   ;;  %v707_v13 = vld [vmem:[%s871_s1 + $0x58] sm:$0xff]   ;;  %v710_v16 = vld [vmem:[%s871_s1 + $0x50] sm:$0xff]   ;;  %vm215_vm4 = vsmask.f32 256 }
   0xf   : > { %636 = vmatprep.subr.bf16.mxu0 %v698_v4  ;;  %v705_v11 = vld [vmem:[%s871_s1 + $0xa0] sm:$0xff]   ;;  %v708_v14 = vld [vmem:[%s871_s1 + $0x98] sm:$0xff]   ;;  %v711_v17 = vld [vmem:[%s871_s1 + $0x90] sm:$0xff]  }
  0x10   : > { %v706_v12 = vld [vmem:[%s871_s1 + $0x20] sm:$0xff]   ;;  %v709_v15 = vld [vmem:[%s871_s1 + $0x18] sm:$0xff]   ;;  %v712_v18 = vld [vmem:[%s871_s1 + $0x10] sm:$0xff]  }
  0x11   : > { %668 = vmatpush3.bf16.msra.mxu1 %v699_v5  ;;  %v713_v19 = vld [vmem:[%s871_s1 + $0x48] sm:$0xff]   ;;  %v719_v22 = vld [vmem:[%s192_s8] sm:$0xff]   ;;  %vm223_vm5 = vmand %vm221_vm1, %vm222_vm2 }
  0x12   : > { %637 = vmatpush3.bf16.msra.mxu0 %v700_v6  ;;  %669 = vmatprep.subr.bf16.mxu1 %v728_v1  ;;  %v714_v20 = vld [vmem:[%s871_s1 + $0x88] sm:$0xff]   ;;  %v716_v23 = vld [vmem:[%s871_s1 + $0x40] sm:$0xff]   ;;  %v207_v24 = vshrl.u32 %v719_v22, 16  ;;  %v210_v25 = vshll.u32 %v719_v22, 16  ;;  %vm216_vm6 = vmand %vm214_vm3, %vm215_vm4 }
  0x13   : > { %638 = vmatprep.subr.bf16.mxu0 %v701_v7  ;;  %v715_v21 = vld [vmem:[%s871_s1 + $0x8] sm:$0xff]   ;;  %450 = vmatprep.mubr.bf16.mxu0 %v719_v22  ;;  %v717_v26 = vld [vmem:[%s871_s1 + $0x80] sm:$0xff]  }
  0x14   : > { %v718_v27 = vld [vmem:[%s871_s1] sm:$0xff]   ;;  %v218_v28 = vrot.slane %v210_v25, 1  ;;  %v209_v29 = vrot.slane %v207_v24, 7 }
  0x15   : > { %670 = vmatpush3.bf16.msra.mxu1 %v702_v8  ;;  %v619_v40 = vld [vmem:[%s872_s2] ss:$0 sm:$0xff] }
  0x16   : > { %639 = vmatpush3.bf16.msra.mxu0 %v703_v9  ;;  %671 = vmatprep.subr.bf16.mxu1 %v728_v1  ;;  %v219_v30 = vor.u32 %v218_v28, %v207_v24  ;;  %v212_v31 = vor.u32 %v210_v25, %v209_v29  ;;  %v620_v47 = vld [vmem:[%s873_s3] ss:$0 sm:$0xff] }
  0x17   : > { %640 = vmatprep.subr.bf16.mxu0 %v704_v10 }
  0x18   : > { %v224_v32 = vsel %vm223_vm5, %v219_v30, 0  ;;  %v217_v33 = vsel %vm216_vm6, 0, %v212_v31 }
  0x19   : > { %672 = vmatpush3.bf16.msra.mxu1 %v705_v11 }
  0x1a   : > { %641 = vmatpush3.bf16.msra.mxu0 %v706_v12  ;;  %673 = vmatprep.subr.bf16.mxu1 %v728_v1 }
  0x1b   : > { %642 = vmatprep.subr.bf16.mxu0 %v707_v13 }
  0x1d   : > { %674 = vmatpush3.bf16.msra.mxu1 %v708_v14 }
  0x1e   : > { %643 = vmatpush3.bf16.msra.mxu0 %v709_v15  ;;  %675 = vmatprep.subr.bf16.mxu1 %v728_v1 }
  0x1f   : > { %644 = vmatprep.subr.bf16.mxu0 %v710_v16 }
  0x21   : > { %676 = vmatpush3.bf16.msra.mxu1 %v711_v17 }
  0x22   : > { %645 = vmatpush3.bf16.msra.mxu0 %v712_v18  ;;  %677 = vmatprep.subr.bf16.mxu1 %v728_v1 }
  0x23   : > { %646 = vmatprep.subr.bf16.mxu0 %v713_v19 }
  0x25   : > { %678 = vmatpush3.bf16.msra.mxu1 %v714_v20 }
  0x26   : > { %647 = vmatpush3.bf16.msra.mxu0 %v715_v21  ;;  %679 = vmatprep.subr.bf16.mxu1 %v728_v1 }
  0x27   : > { %648 = vmatprep.subr.bf16.mxu0 %v716_v23 }
  0x29   : > { %680 = vmatpush3.bf16.msra.mxu1 %v717_v26 }
  0x2a   : > { %649 = vmatpush3.bf16.msra.mxu0 %v718_v27 }
  0x2c   : > { %682 = vmatmul.mubr.bf16.vlgmr.msra.gmra.mxu1 %v224_v32 }
  0x2d   : > { %451 = vmatmul.mubr.bf16.vlgmr.msra.gmra.mxu0 %v217_v33 }
  0xec   : > { %v493_v34 = vpop.f32.mrf.mxu1 }
  0xed   : > { %v650_v35 = vpop.f32.mrf.mxu0 }
  0xee   : > { %v683_v36 = vpop.f32.mrf.mxu1 }
  0xef   : > { %v651_v37 = vpop.f32.mrf.mxu0 }
  0xf0   : > { %v652_v38 = vadd.f32 %v651_v37, %v650_v35  ;;  %v496_v39 = vpop.f32.mrf.mxu1 }
  0xf1   : > { %v653_v41 = vpop.f32.mrf.mxu0 }
  0xf2   : > { %v494_v42 = vadd.f32 %v652_v38, %v493_v34  ;;  %v684_v43 = vpop.f32.mrf.mxu1 }
  0xf3   : > { %v654_v44 = vpop.f32.mrf.mxu0 }
  0xf4   : > { %v507_v45 = vmul.f32 %v619_v40, %v494_v42  ;;  %v655_v46 = vadd.f32 %v654_v44, %v653_v41 }
  0xf6   : > { %v497_v48 = vadd.f32 %v655_v46, %v496_v39  ;;  %v516_v49 = vadd.f32 %v620_v47, %v507_v45 }
  0xf8   : > { %v508_v50 = vmul.f32 %v619_v40, %v497_v48  ;;  %v518_v52 = vmax.f32 %v516_v49, 0.0 }
  0xfa   : > { %v517_v51 = vadd.f32 %v620_v47, %v508_v50 }
  0xfc   : > { %v519_v53 = vmax.f32 %v517_v51, 0.0 }
  0xfe   : > { %v632_v54 = vpack.c.bf16 %v519_v53, %v518_v52 }
 0x100   : > { %633 = vst [vmem:[%s197_s28] sm:$0xff] %v632_v54  }
 0x101 PF: > { %s14_s15 = sadd.s32 1, %s726_s15  }
 0x102   : > { %p11_p4 = scmp.ge.s32.totalorder %s14_s15, 4  }
 0x104   :  { %13 = sbr.rel (!%p11_p4) target bundleno = 1 (0x1), region = 66 }

// kernel: cifar_resnet_forward.8
= control target key start
LH: loop header
LB: loop body
LE: loop exit
PB: predicated region body
PF: predicated region fallthrough
CT: control target
= control target key end

     0   :  { %s1263_s24 = smov 0   ;;  %s1490_s0 = inlined_call_operand.vmem [shape: bf16[2,16,128], index: 0, kind: input, shape index: {}]   ;;  %s1491_s1 = inlined_call_operand.vmem [shape: bf16[384,128], index: 1, kind: input, shape index: {}]   ;;  %s1492_s2 = inlined_call_operand.vmem [shape: f32[1,128], index: 2, kind: input, shape index: {}]   ;;  %s1493_s3 = inlined_call_operand.vmem [shape: f32[1,128], index: 3, kind: input, shape index: {}]   ;;  %s1494_s4 = inlined_call_operand.vmem [shape: bf16[384,128], index: 4, kind: input, shape index: {}]   ;;  %s1495_s5 = inlined_call_operand.vmem [shape: f32[1,128], index: 5, kind: input, shape index: {}]   ;;  %s1496_s6 = inlined_call_operand.vmem [shape: f32[1,128], index: 6, kind: input, shape index: {}]   ;;  %s1497_s7 = inlined_call_operand.vmem [shape: bf16[2,16,128], index: 7, kind: output, shape index: {}]  }
   0x1 LB: > { %s976_s25 = sadd.s32 4294967295, %s1219_s24   ;;  %p980_p0 = scmp.ge.s32.totalorder %s1219_s24, 1  ;;  %s1219_s24 = sphi %s1263_s24, %s17_s24  }
   0x2   : > { %p237_p1 = scmp.lt.s32.totalorder %s1219_s24, 3 }
   0x4   : > { %p238_p2 = pnand %p980_p0, %p237_p1 }
   0x5   : > { %p269_p3 = scmp.lt.s32.totalorder (!%p238_p2), %s976_s25, 1 }
   0x6   : > { %241 = sbr.rel (%p238_p2) target bundleno = 475 (0x1db), region = 48 }
   0xb   : > { %v1163_v0 = vld [vmem:[%s1491_s1 + $0x78] sm:$0xff]   ;;  %v1221_v1 = vmov 0.0   ;;  %vm1222_vm0 = vmmov 0   ;;  %v1166_v4 = vld [vmem:[%s1491_s1 + $0x70] sm:$0xff]   ;;  %v1169_v7 = vld [vmem:[%s1491_s1 + $0x68] sm:$0xff]   ;;  %s1503_s25 = smov (!%p269_p3, %s976_s25), 1 }
   0xc   : > { %1113 = vmatprep.subr.bf16.mxu1 %v1221_v1  ;;  %v1164_v2 = vld [vmem:[%s1491_s1 + $0xb8] sm:$0xff]   ;;  %1051 = vmatprep.subr.bf16.mxu0 %v1163_v0  ;;  %v1167_v5 = vld [vmem:[%s1491_s1 + $0xb0] sm:$0xff]   ;;  %v1170_v8 = vld [vmem:[%s1491_s1 + $0xa8] sm:$0xff]   ;;  %s1042_s14 = sshll.u32 %s1503_s25, 3  ;;  %vm302_vm1 = vcmask 1047552   ;;  %vm295_vm3 = vcmask 1040384  }
   0xd   : > { %v1165_v3 = vld [vmem:[%s1491_s1 + $0x38] sm:$0xff]   ;;  %1129 = vmatprep.mubr.msk.bf16.mxu1 %vm1222_vm0, %v1221_v1  ;;  %1114 = vmatpush3.bf16.msra.mxu1 %v1164_v2  ;;  %v1168_v6 = vld [vmem:[%s1491_s1 + $0x30] sm:$0xff]   ;;  %v1171_v9 = vld [vmem:[%s1491_s1 + $0x28] sm:$0xff]   ;;  %s273_s23 = scalar_lea.vmem %s1490_s0, %s1042_s14  ;;  %vm303_vm2 = vsmask.f32 7424  ;;  %s278_s11 = scalar_lea.vmem %s1497_s7, %s1042_s14 }
   0xe   : > { %1052 = vmatpush3.bf16.msra.mxu0 %v1165_v3  ;;  %1115 = vmatprep.subr.bf16.mxu1 %v1221_v1  ;;  %v1172_v10 = vld [vmem:[%s1491_s1 + $0x60] sm:$0xff]   ;;  %v1175_v13 = vld [vmem:[%s1491_s1 + $0x58] sm:$0xff]   ;;  %v1178_v16 = vld [vmem:[%s1491_s1 + $0x50] sm:$0xff]   ;;  %vm296_vm4 = vsmask.f32 256 }
   0xf   : > { %1053 = vmatprep.subr.bf16.mxu0 %v1166_v4  ;;  %v1173_v11 = vld [vmem:[%s1491_s1 + $0xa0] sm:$0xff]   ;;  %v1176_v14 = vld [vmem:[%s1491_s1 + $0x98] sm:$0xff]   ;;  %v1179_v17 = vld [vmem:[%s1491_s1 + $0x90] sm:$0xff]  }
  0x10   : > { %v1174_v12 = vld [vmem:[%s1491_s1 + $0x20] sm:$0xff]   ;;  %v1177_v15 = vld [vmem:[%s1491_s1 + $0x18] sm:$0xff]   ;;  %v1180_v18 = vld [vmem:[%s1491_s1 + $0x10] sm:$0xff]  }
  0x11   : > { %1116 = vmatpush3.bf16.msra.mxu1 %v1167_v5  ;;  %v1181_v19 = vld [vmem:[%s1491_s1 + $0x48] sm:$0xff]   ;;  %v1184_v22 = vld [vmem:[%s1491_s1 + $0x40] sm:$0xff]   ;;  %vm1369_vm5 = vmand %vm302_vm1, %vm303_vm2 }
  0x12   : > { %1054 = vmatpush3.bf16.msra.mxu0 %v1168_v6  ;;  %1117 = vmatprep.subr.bf16.mxu1 %v1221_v1  ;;  %v1182_v20 = vld [vmem:[%s1491_s1 + $0x88] sm:$0xff]   ;;  %v1358_v23 = vld [vmem:[%s273_s23] sm:$0xff]   ;;  %v1188_v29 = vld [vmem:[%s1494_s4 + $0x78] sm:$0xff]  }
  0x13   : > { %1055 = vmatprep.subr.bf16.mxu0 %v1169_v7  ;;  %v1183_v21 = vld [vmem:[%s1491_s1 + $0x8] sm:$0xff]   ;;  %v1185_v24 = vld [vmem:[%s1491_s1 + $0x80] sm:$0xff]   ;;  %533 = vmatprep.mubr.bf16.mxu0 %v1358_v23  ;;  %v288_v26 = vshrl.u32 %v1358_v23, 16  ;;  %v291_v27 = vshll.u32 %v1358_v23, 16  ;;  %vm1377_vm6 = vmand %vm295_vm3, %vm296_vm4 }
  0x14   : > { %v1186_v25 = vld [vmem:[%s1491_s1] sm:$0xff]   ;;  %v1190_v33 = vld [vmem:[%s1494_s4 + $0xb8] sm:$0xff]   ;;  %v1191_v37 = vld [vmem:[%s1494_s4 + $0x70] sm:$0xff]  }
  0x15   : > { %1118 = vmatpush3.bf16.msra.mxu1 %v1170_v8  ;;  %v299_v30 = vrot.slane %v291_v27, 1  ;;  %v290_v31 = vrot.slane %v288_v26, 7  ;;  %v1189_v34 = vld [vmem:[%s1494_s4 + $0x38] sm:$0xff]   ;;  %v1192_v40 = vld [vmem:[%s1494_s4 + $0x30] sm:$0xff]   ;;  %v1194_v42 = vld [vmem:[%s1494_s4 + $0x68] sm:$0xff]  }
  0x16   : > { %1056 = vmatpush3.bf16.msra.mxu0 %v1171_v9  ;;  %1119 = vmatprep.subr.bf16.mxu1 %v1221_v1  ;;  %v1193_v41 = vld [vmem:[%s1494_s4 + $0xb0] sm:$0xff]   ;;  %v1195_v43 = vld [vmem:[%s1494_s4 + $0x28] sm:$0xff]   ;;  %v1197_v45 = vld [vmem:[%s1494_s4 + $0x60] sm:$0xff]  }
  0x17   : > { %1057 = vmatprep.subr.bf16.mxu0 %v1172_v10  ;;  %v300_v35 = vor.u32 %v299_v30, %v288_v26  ;;  %v293_v36 = vor.u32 %v291_v27, %v290_v31  ;;  %v1196_v44 = vld [vmem:[%s1494_s4 + $0xa8] sm:$0xff]   ;;  %v1198_v46 = vld [vmem:[%s1494_s4 + $0x20] sm:$0xff]   ;;  %v1200_v48 = vld [vmem:[%s1494_s4 + $0x58] sm:$0xff]  }
  0x18   : > { %v1199_v47 = vld [vmem:[%s1494_s4 + $0xa0] sm:$0xff]   ;;  %v1201_v49 = vld [vmem:[%s1494_s4 + $0x18] sm:$0xff]   ;;  %v1203_v51 = vld [vmem:[%s1494_s4 + $0x50] sm:$0xff]  }
  0x19   : > { %1120 = vmatpush3.bf16.msra.mxu1 %v1173_v11  ;;  %v305_v38 = vsel %vm1369_vm5, %v300_v35, 0  ;;  %v298_v39 = vsel %vm1377_vm6, 0, %v293_v36  ;;  %v1202_v50 = vld [vmem:[%s1494_s4 + $0x98] sm:$0xff]   ;;  %v1204_v52 = vld [vmem:[%s1494_s4 + $0x10] sm:$0xff]   ;;  %v1206_v54 = vld [vmem:[%s1494_s4 + $0x48] sm:$0xff]  }
  0x1a   : > { %1058 = vmatpush3.bf16.msra.mxu0 %v1174_v12  ;;  %1121 = vmatprep.subr.bf16.mxu1 %v1221_v1  ;;  %v1205_v53 = vld [vmem:[%s1494_s4 + $0x90] sm:$0xff]   ;;  %v1207_v55 = vld [vmem:[%s1494_s4 + $0x8] sm:$0xff]   ;;  %v1209_v57 = vld [vmem:[%s1494_s4 + $0x40] sm:$0xff]  }
  0x1b   : > { %1059 = vmatprep.subr.bf16.mxu0 %v1175_v13  ;;  %v1208_v56 = vld [vmem:[%s1494_s4 + $0x88] sm:$0xff]   ;;  %v1210_v58 = vld [vmem:[%s1494_s4] sm:$0xff]  }
  0x1c   : > { %v1211_v59 = vld [vmem:[%s1494_s4 + $0x80] sm:$0xff]  }
  0x1d   : > { %1122 = vmatpush3.bf16.msra.mxu1 %v1176_v14  ;;  %v1010_v3 = vld [vmem:[%s1492_s2] ss:$0 sm:$0xff] }
  0x1e   : > { %1060 = vmatpush3.bf16.msra.mxu0 %v1177_v15  ;;  %1123 = vmatprep.subr.bf16.mxu1 %v1221_v1 }
  0x1f   : > { %1061 = vmatprep.subr.bf16.mxu0 %v1178_v16 }
  0x21   : > { %1124 = vmatpush3.bf16.msra.mxu1 %v1179_v17 }
  0x22   : > { %1062 = vmatpush3.bf16.msra.mxu0 %v1180_v18  ;;  %1125 = vmatprep.subr.bf16.mxu1 %v1221_v1 }
  0x23   : > { %1063 = vmatprep.subr.bf16.mxu0 %v1181_v19 }
  0x25   : > { %1126 = vmatpush3.bf16.msra.mxu1 %v1182_v20 }
  0x26   : > { %1064 = vmatpush3.bf16.msra.mxu0 %v1183_v21  ;;  %1127 = vmatprep.subr.bf16.mxu1 %v1221_v1 }
  0x27   : > { %1065 = vmatprep.subr.bf16.mxu0 %v1184_v22 }
  0x29   : > { %1128 = vmatpush3.bf16.msra.mxu1 %v1185_v24 }
  0x2a   : > { %1066 = vmatpush3.bf16.msra.mxu0 %v1186_v25  ;;  %1133 = vmatprep.subr.bf16.mxu1 %v1221_v1 }
  0x2b   : > { %1082 = vmatprep.subr.bf16.mxu0 %v1188_v29 }
  0x2c   : > { %1130 = vmatmul.mubr.bf16.vlgmr.msra.gmra.mxu1 %v305_v38 }
  0x2d   : > { %534 = vmatmul.mubr.bf16.vlgmr.msra.gmra.mxu0 %v298_v39  ;;  %1134 = vmatpush3.bf16.msra.mxu1 %v1190_v33  ;;  %v1036_v33 = vld [vmem:[%s1495_s5] ss:$0 sm:$0xff] }
  0x2e   : > { %1083 = vmatpush3.bf16.msra.mxu0 %v1189_v34  ;;  %1135 = vmatprep.subr.bf16.mxu1 %v1221_v1  ;;  %v1037_v39 = vld [vmem:[%s1496_s6] ss:$0 sm:$0xff] }
  0x2f   : > { %1084 = vmatprep.subr.bf16.mxu0 %v1191_v37  ;;  %1149 = vmatprep.mubr.msk.bf16.mxu1 %vm1222_vm0, %v1221_v1 }
  0x31   : > { %1136 = vmatpush3.bf16.msra.mxu1 %v1193_v41  ;;  %v307_v41 = vunpack.c.l.bf16 %v1358_v23 }
  0x32   : > { %1085 = vmatpush3.bf16.msra.mxu0 %v1192_v40  ;;  %1137 = vmatprep.subr.bf16.mxu1 %v1221_v1 }
  0x33   : > { %1086 = vmatprep.subr.bf16.mxu0 %v1194_v42  ;;  %v308_v42 = vunpack.c.h.bf16 %v1358_v23 }
  0x35   : > { %1138 = vmatpush3.bf16.msra.mxu1 %v1196_v44 }
  0x36   : > { %1087 = vmatpush3.bf16.msra.mxu0 %v1195_v43  ;;  %1139 = vmatprep.subr.bf16.mxu1 %v1221_v1 }
  0x37   : > { %1088 = vmatprep.subr.bf16.mxu0 %v1197_v45 }
  0x39   : > { %1140 = vmatpush3.bf16.msra.mxu1 %v1199_v47 }
  0x3a   : > { %1089 = vmatpush3.bf16.msra.mxu0 %v1198_v46  ;;  %1141 = vmatprep.subr.bf16.mxu1 %v1221_v1 }
  0x3b   : > { %1090 = vmatprep.subr.bf16.mxu0 %v1200_v48 }
  0x3d   : > { %1142 = vmatpush3.bf16.msra.mxu1 %v1202_v50 }
  0x3e   : > { %1091 = vmatpush3.bf16.msra.mxu0 %v1201_v49  ;;  %1143 = vmatprep.subr.bf16.mxu1 %v1221_v1 }
  0x3f   : > { %1092 = vmatprep.subr.bf16.mxu0 %v1203_v51 }
  0x41   : > { %1144 = vmatpush3.bf16.msra.mxu1 %v1205_v53 }
  0x42   : > { %1093 = vmatpush3.bf16.msra.mxu0 %v1204_v52  ;;  %1145 = vmatprep.subr.bf16.mxu1 %v1221_v1 }
  0x43   : > { %1094 = vmatprep.subr.bf16.mxu0 %v1206_v54 }
  0x45   : > { %1146 = vmatpush3.bf16.msra.mxu1 %v1208_v56 }
  0x46   : > { %1095 = vmatpush3.bf16.msra.mxu0 %v1207_v55  ;;  %1147 = vmatprep.subr.bf16.mxu1 %v1221_v1  ;;  %v1011_v1 = vld [vmem:[%s1493_s3] ss:$0 sm:$0xff] }
  0x47   : > { %1096 = vmatprep.subr.bf16.mxu0 %v1209_v57 }
  0x49   : > { %1148 = vmatpush3.bf16.msra.mxu1 %v1211_v59 }
  0x4a   : > { %1097 = vmatpush3.bf16.msra.mxu0 %v1210_v58 }
  0xec   : > { %v576_v60 = vpop.f32.mrf.mxu1 }
  0xed   : > { %v1067_v61 = vpop.f32.mrf.mxu0 }
  0xee   : > { %v1131_v62 = vpop.f32.mrf.mxu1 }
  0xef   : > { %v1068_v63 = vpop.f32.mrf.mxu0 }
  0xf0   : > { %v1069_v0 = vadd.f32 %v1068_v63, %v1067_v61  ;;  %v579_v2 = vpop.f32.mrf.mxu1 }
  0xf1   : > { %v1070_v4 = vpop.f32.mrf.mxu0 }
  0xf2   : > { %v577_v5 = vadd.f32 %v1069_v0, %v576_v60  ;;  %v1132_v6 = vpop.f32.mrf.mxu1 }
  0xf3   : > { %v1071_v7 = vpop.f32.mrf.mxu0 }
  0xf4   : > { %v590_v8 = vmul.f32 %v1010_v3, %v577_v5  ;;  %v1072_v9 = vadd.f32 %v1071_v7, %v1070_v4 }
  0xf6   : > { %v580_v10 = vadd.f32 %v1072_v9, %v579_v2  ;;  %v599_v12 = vadd.f32 %v1011_v1, %v590_v8 }
  0xf8   : > { %v591_v11 = vmul.f32 %v1010_v3, %v580_v10  ;;  %v601_v14 = vmax.f32 %v599_v12, 0.0 }
  0xfa   : > { %v600_v13 = vadd.f32 %v1011_v1, %v591_v11 }
  0xfc   : > { %v602_v15 = vmax.f32 %v600_v13, 0.0 }
  0xfe   : > { %v603_v16 = vpack.c.bf16 %v602_v15, %v601_v14 }
 0x100   : > { %v605_v17 = vshrl.u32 %v603_v16, 16  ;;  %841 = vmatprep.mubr.bf16.mxu0 %v603_v16  ;;  %v608_v18 = vshll.u32 %v603_v16, 16 }
 0x102   : > { %v607_v19 = vrot.slane %v605_v17, 7  ;;  %v613_v20 = vrot.slane %v608_v18, 1 }
 0x104   : > { %v610_v21 = vor.u32 %v608_v18, %v607_v19  ;;  %v614_v22 = vor.u32 %v613_v20, %v605_v17 }
 0x106   : > { %v612_v24 = vsel %vm1377_vm6, 0, %v610_v21  ;;  %v616_v25 = vsel %vm1369_vm5, %v614_v22, 0 }
 0x107   : > { %842 = vmatmul.mubr.bf16.vlgmr.msra.gmra.mxu0 %v612_v24  ;;  %1150 = vmatmul.mubr.bf16.vlgmr.msra.gmra.mxu1 %v616_v25 }
 0x1c7   : > { %v1098_v26 = vpop.f32.mrf.mxu0  ;;  %v884_v27 = vpop.f32.mrf.mxu1 }
 0x1c9   : > { %v1099_v29 = vpop.f32.mrf.mxu0  ;;  %v1151_v30 = vpop.f32.mrf.mxu1 }
 0x1ca   : > { %v1100_v31 = vadd.f32 %v1099_v29, %v1098_v26 }
 0x1cb   : > { %v1101_v34 = vpop.f32.mrf.mxu0  ;;  %v887_v35 = vpop.f32.mrf.mxu1 }
 0x1cc   : > { %v885_v36 = vadd.f32 %v1100_v31, %v884_v27 }
 0x1cd   : > { %v1102_v32 = vpop.f32.mrf.mxu0  ;;  %v1152_v37 = vpop.f32.mrf.mxu1 }
 0x1ce   : > { %v898_v38 = vmul.f32 %v1036_v33, %v885_v36  ;;  %v1103_v28 = vadd.f32 %v1102_v32, %v1101_v34 }
 0x1d0   : > { %v888_v40 = vadd.f32 %v1103_v28, %v887_v35  ;;  %v907_v43 = vadd.f32 %v1037_v39, %v898_v38 }
 0x1d2   : > { %v899_v44 = vmul.f32 %v1036_v33, %v888_v40  ;;  %v909_v46 = vadd.f32 %v907_v43, %v307_v41 }
 0x1d4   : > { %v908_v45 = vadd.f32 %v1037_v39, %v899_v44 }
 0x1d6   : > { %v910_v47 = vadd.f32 %v908_v45, %v308_v42 }
 0x1d8   : > { %v1049_v48 = vpack.c.bf16 %v910_v47, %v909_v46 }
 0x1da   : > { %1050 = vst [vmem:[%s278_s11] sm:$0xff] %v1049_v48  }
 0x1db PF: > { %s17_s24 = sadd.s32 1, %s1219_s24  }
 0x1dc   : > { %p14_p4 = scmp.ge.s32.totalorder %s17_s24, 4  }
 0x1de   :  { %16 = sbr.rel (!%p14_p4) target bundleno = 1 (0x1), region = 78 }

// kernel: cifar_resnet_forward.9
= control target key start
LH: loop header
LB: loop body
LE: loop exit
PB: predicated region body
PF: predicated region fallthrough
CT: control target
= control target key end

     0   :  { %s1405_s30 = smov 0   ;;  %s1636_s0 = inlined_call_operand.vmem [shape: bf16[2,16,128], index: 0, kind: input, shape index: {}]   ;;  %s1637_s1 = inlined_call_operand.vmem [shape: bf16[384,128], index: 1, kind: input, shape index: {}]   ;;  %s1638_s2 = inlined_call_operand.vmem [shape: f32[1,128], index: 2, kind: input, shape index: {}]   ;;  %s1639_s3 = inlined_call_operand.vmem [shape: f32[1,128], index: 3, kind: input, shape index: {}]   ;;  %s1640_s4 = inlined_call_operand.vmem [shape: bf16[384,128], index: 4, kind: input, shape index: {}]   ;;  %s1641_s5 = inlined_call_operand.vmem [shape: f32[1,128], index: 5, kind: input, shape index: {}]   ;;  %s1642_s6 = inlined_call_operand.vmem [shape: f32[1,128], index: 6, kind: input, shape index: {}]   ;;  %s1643_s7 = inlined_call_operand.vmem [shape: f32[1,128], index: 7, kind: input, shape index: {}]   ;;  %s1644_s8 = inlined_call_operand.vmem [shape: bf16[2,16,128], index: 8, kind: output, shape index: {0}]   ;;  %s1645_s9 = inlined_call_operand.vmem [shape: bf16[2,16,128], index: 9, kind: output, shape index: {1}]  }
   0x1 LB: > { %s1095_s10 = sadd.s32 4294967295, %s1351_s30   ;;  %p1099_p0 = scmp.ge.s32.totalorder %s1351_s30, 1  ;;  %s1351_s30 = sphi %s1405_s30, %s20_s30  }
   0x2   : > { %p290_p1 = scmp.lt.s32.totalorder %s1351_s30, 3 }
   0x4   : > { %p291_p2 = pnand %p1099_p0, %p290_p1 }
   0x5   : > { %p331_p3 = scmp.lt.s32.totalorder (!%p291_p2), %s1095_s10, 1 }
   0x6   : > { %294 = sbr.rel (%p291_p2) target bundleno = 477 (0x1dd), region = 52 }
   0xb   : > { %v1295_v0 = vld [vmem:[%s1637_s1 + $0x78] sm:$0xff]   ;;  %v1353_v1 = vmov 0.0   ;;  %vm1354_vm0 = vmmov 0   ;;  %v1298_v4 = vld [vmem:[%s1637_s1 + $0x70] sm:$0xff]   ;;  %v1301_v7 = vld [vmem:[%s1637_s1 + $0x68] sm:$0xff]   ;;  %s1651_s10 = smov (!%p331_p3, %s1095_s10), 1 }
   0xc   : > { %1245 = vmatprep.subr.bf16.mxu1 %v1353_v1  ;;  %v1296_v2 = vld [vmem:[%s1637_s1 + $0xb8] sm:$0xff]   ;;  %1183 = vmatprep.subr.bf16.mxu0 %v1295_v0  ;;  %v1299_v5 = vld [vmem:[%s1637_s1 + $0xb0] sm:$0xff]   ;;  %v1302_v8 = vld [vmem:[%s1637_s1 + $0xa8] sm:$0xff]   ;;  %s1472_s24 = sshll.u32 %s1651_s10, 3  ;;  %vm369_vm1 = vcmask 1047552   ;;  %vm362_vm3 = vcmask 1040384  }
   0xd   : > { %v1297_v3 = vld [vmem:[%s1637_s1 + $0x38] sm:$0xff]   ;;  %1261 = vmatprep.mubr.msk.bf16.mxu1 %vm1354_vm0, %v1353_v1  ;;  %1246 = vmatpush3.bf16.msra.mxu1 %v1296_v2  ;;  %v1300_v6 = vld [vmem:[%s1637_s1 + $0x30] sm:$0xff]   ;;  %v1303_v9 = vld [vmem:[%s1637_s1 + $0x28] sm:$0xff]   ;;  %s335_s13 = scalar_lea.vmem %s1636_s0, %s1472_s24  ;;  %vm370_vm2 = vsmask.f32 7424  ;;  %s345_s28 = scalar_lea.vmem %s1645_s9, %s1472_s24 }
   0xe   : > { %1184 = vmatpush3.bf16.msra.mxu0 %v1297_v3  ;;  %1247 = vmatprep.subr.bf16.mxu1 %v1353_v1  ;;  %v1304_v10 = vld [vmem:[%s1637_s1 + $0x60] sm:$0xff]   ;;  %v1307_v13 = vld [vmem:[%s1637_s1 + $0x58] sm:$0xff]   ;;  %v1310_v16 = vld [vmem:[%s1637_s1 + $0x50] sm:$0xff]   ;;  %vm363_vm4 = vsmask.f32 256  ;;  %s340_s10 = scalar_lea.vmem %s1644_s8, %s1472_s24 }
   0xf   : > { %1185 = vmatprep.subr.bf16.mxu0 %v1298_v4  ;;  %v1305_v11 = vld [vmem:[%s1637_s1 + $0xa0] sm:$0xff]   ;;  %v1308_v14 = vld [vmem:[%s1637_s1 + $0x98] sm:$0xff]   ;;  %v1311_v17 = vld [vmem:[%s1637_s1 + $0x90] sm:$0xff]  }
  0x10   : > { %v1306_v12 = vld [vmem:[%s1637_s1 + $0x20] sm:$0xff]   ;;  %v1309_v15 = vld [vmem:[%s1637_s1 + $0x18] sm:$0xff]   ;;  %v1312_v18 = vld [vmem:[%s1637_s1 + $0x10] sm:$0xff]  }
  0x11   : > { %1248 = vmatpush3.bf16.msra.mxu1 %v1299_v5  ;;  %v1313_v19 = vld [vmem:[%s1637_s1 + $0x48] sm:$0xff]   ;;  %v1316_v22 = vld [vmem:[%s1637_s1 + $0x40] sm:$0xff]   ;;  %vm1509_vm5 = vmand %vm369_vm1, %vm370_vm2 }
  0x12   : > { %1186 = vmatpush3.bf16.msra.mxu0 %v1300_v6  ;;  %1249 = vmatprep.subr.bf16.mxu1 %v1353_v1  ;;  %v1314_v20 = vld [vmem:[%s1637_s1 + $0x88] sm:$0xff]   ;;  %v1498_v23 = vld [vmem:[%s335_s13] sm:$0xff]   ;;  %v1320_v29 = vld [vmem:[%s1640_s4 + $0x78] sm:$0xff]  }
  0x13   : > { %1187 = vmatprep.subr.bf16.mxu0 %v1301_v7  ;;  %v1315_v21 = vld [vmem:[%s1637_s1 + $0x8] sm:$0xff]   ;;  %v1317_v24 = vld [vmem:[%s1637_s1 + $0x80] sm:$0xff]   ;;  %600 = vmatprep.mubr.bf16.mxu0 %v1498_v23  ;;  %v355_v26 = vshrl.u32 %v1498_v23, 16  ;;  %v358_v27 = vshll.u32 %v1498_v23, 16  ;;  %vm1517_vm6 = vmand %vm362_vm3, %vm363_vm4 }
  0x14   : > { %v1318_v25 = vld [vmem:[%s1637_s1] sm:$0xff]   ;;  %v1322_v33 = vld [vmem:[%s1640_s4 + $0xb8] sm:$0xff]   ;;  %v1323_v37 = vld [vmem:[%s1640_s4 + $0x70] sm:$0xff]  }
  0x15   : > { %1250 = vmatpush3.bf16.msra.mxu1 %v1302_v8  ;;  %v366_v30 = vrot.slane %v358_v27, 1  ;;  %v357_v31 = vrot.slane %v355_v26, 7  ;;  %v1321_v34 = vld [vmem:[%s1640_s4 + $0x38] sm:$0xff]   ;;  %v1324_v40 = vld [vmem:[%s1640_s4 + $0x30] sm:$0xff]   ;;  %v1326_v42 = vld [vmem:[%s1640_s4 + $0x68] sm:$0xff]  }
  0x16   : > { %1188 = vmatpush3.bf16.msra.mxu0 %v1303_v9  ;;  %1251 = vmatprep.subr.bf16.mxu1 %v1353_v1  ;;  %v1325_v41 = vld [vmem:[%s1640_s4 + $0xb0] sm:$0xff]   ;;  %v1327_v43 = vld [vmem:[%s1640_s4 + $0x28] sm:$0xff]   ;;  %v1329_v45 = vld [vmem:[%s1640_s4 + $0x60] sm:$0xff]  }
  0x17   : > { %1189 = vmatprep.subr.bf16.mxu0 %v1304_v10  ;;  %v367_v35 = vor.u32 %v366_v30, %v355_v26  ;;  %v360_v36 = vor.u32 %v358_v27, %v357_v31  ;;  %v1328_v44 = vld [vmem:[%s1640_s4 + $0xa8] sm:$0xff]   ;;  %v1330_v46 = vld [vmem:[%s1640_s4 + $0x20] sm:$0xff]   ;;  %v1332_v48 = vld [vmem:[%s1640_s4 + $0x58] sm:$0xff]  }
  0x18   : > { %v1331_v47 = vld [vmem:[%s1640_s4 + $0xa0] sm:$0xff]   ;;  %v1333_v49 = vld [vmem:[%s1640_s4 + $0x18] sm:$0xff]   ;;  %v1335_v51 = vld [vmem:[%s1640_s4 + $0x50] sm:$0xff]  }
  0x19   : > { %1252 = vmatpush3.bf16.msra.mxu1 %v1305_v11  ;;  %v372_v38 = vsel %vm1509_vm5, %v367_v35, 0  ;;  %v365_v39 = vsel %vm1517_vm6, 0, %v360_v36  ;;  %v1334_v50 = vld [vmem:[%s1640_s4 + $0x98] sm:$0xff]   ;;  %v1336_v52 = vld [vmem:[%s1640_s4 + $0x10] sm:$0xff]   ;;  %v1338_v54 = vld [vmem:[%s1640_s4 + $0x48] sm:$0xff]  }
  0x1a   : > { %1190 = vmatpush3.bf16.msra.mxu0 %v1306_v12  ;;  %1253 = vmatprep.subr.bf16.mxu1 %v1353_v1  ;;  %v1337_v53 = vld [vmem:[%s1640_s4 + $0x90] sm:$0xff]   ;;  %v1339_v55 = vld [vmem:[%s1640_s4 + $0x8] sm:$0xff]   ;;  %v1341_v57 = vld [vmem:[%s1640_s4 + $0x40] sm:$0xff]  }
  0x1b   : > { %1191 = vmatprep.subr.bf16.mxu0 %v1307_v13  ;;  %v1340_v56 = vld [vmem:[%s1640_s4 + $0x88] sm:$0xff]   ;;  %v1342_v58 = vld [vmem:[%s1640_s4] sm:$0xff]  }
  0x1c   : > { %v1343_v59 = vld [vmem:[%s1640_s4 + $0x80] sm:$0xff]  }
  0x1d   : > { %1254 = vmatpush3.bf16.msra.mxu1 %v1308_v14  ;;  %v1131_v3 = vld [vmem:[%s1638_s2] ss:$0 sm:$0xff] }
  0x1e   : > { %1192 = vmatpush3.bf16.msra.mxu0 %v1309_v15  ;;  %1255 = vmatprep.subr.bf16.mxu1 %v1353_v1  ;;  %v1158_v28 = vld [vmem:[%s1642_s6] ss:$0 sm:$0xff] }
  0x1f   : > { %1193 = vmatprep.subr.bf16.mxu0 %v1310_v16 }
  0x21   : > { %1256 = vmatpush3.bf16.msra.mxu1 %v1311_v17 }
  0x22   : > { %1194 = vmatpush3.bf16.msra.mxu0 %v1312_v18  ;;  %1257 = vmatprep.subr.bf16.mxu1 %v1353_v1 }
  0x23   : > { %1195 = vmatprep.subr.bf16.mxu0 %v1313_v19 }
  0x25   : > { %1258 = vmatpush3.bf16.msra.mxu1 %v1314_v20 }
  0x26   : > { %1196 = vmatpush3.bf16.msra.mxu0 %v1315_v21  ;;  %1259 = vmatprep.subr.bf16.mxu1 %v1353_v1 }
  0x27   : > { %1197 = vmatprep.subr.bf16.mxu0 %v1316_v22 }
  0x29   : > { %1260 = vmatpush3.bf16.msra.mxu1 %v1317_v24 }
  0x2a   : > { %1198 = vmatpush3.bf16.msra.mxu0 %v1318_v25  ;;  %1265 = vmatprep.subr.bf16.mxu1 %v1353_v1 }
  0x2b   : > { %1214 = vmatprep.subr.bf16.mxu0 %v1320_v29 }
  0x2c   : > { %1262 = vmatmul.mubr.bf16.vlgmr.msra.gmra.mxu1 %v372_v38 }
  0x2d   : > { %601 = vmatmul.mubr.bf16.vlgmr.msra.gmra.mxu0 %v365_v39  ;;  %1266 = vmatpush3.bf16.msra.mxu1 %v1322_v33  ;;  %v1157_v33 = vld [vmem:[%s1641_s5] ss:$0 sm:$0xff] }
  0x2e   : > { %1215 = vmatpush3.bf16.msra.mxu0 %v1321_v34  ;;  %1267 = vmatprep.subr.bf16.mxu1 %v1353_v1 }
  0x2f   : > { %1216 = vmatprep.subr.bf16.mxu0 %v1323_v37  ;;  %1281 = vmatprep.mubr.msk.bf16.mxu1 %vm1354_vm0, %v1353_v1 }
  0x31   : > { %1268 = vmatpush3.bf16.msra.mxu1 %v1325_v41 }
  0x32   : > { %1217 = vmatpush3.bf16.msra.mxu0 %v1324_v40  ;;  %1269 = vmatprep.subr.bf16.mxu1 %v1353_v1  ;;  %v374_v40 = vunpack.c.l.bf16 %v1498_v23 }
  0x33   : > { %1218 = vmatprep.subr.bf16.mxu0 %v1326_v42 }
  0x35   : > { %1270 = vmatpush3.bf16.msra.mxu1 %v1328_v44 }
  0x36   : > { %1219 = vmatpush3.bf16.msra.mxu0 %v1327_v43  ;;  %1271 = vmatprep.subr.bf16.mxu1 %v1353_v1  ;;  %v375_v43 = vunpack.c.h.bf16 %v1498_v23 }
  0x37   : > { %1220 = vmatprep.subr.bf16.mxu0 %v1329_v45 }
  0x39   : > { %1272 = vmatpush3.bf16.msra.mxu1 %v1331_v47  ;;  %v1161_v47 = vld [vmem:[%s1643_s7] ss:$0 sm:$0xff] }
  0x3a   : > { %1221 = vmatpush3.bf16.msra.mxu0 %v1330_v46  ;;  %1273 = vmatprep.subr.bf16.mxu1 %v1353_v1 }
  0x3b   : > { %1222 = vmatprep.subr.bf16.mxu0 %v1332_v48 }
  0x3d   : > { %1274 = vmatpush3.bf16.msra.mxu1 %v1334_v50 }
  0x3e   : > { %1223 = vmatpush3.bf16.msra.mxu0 %v1333_v49  ;;  %1275 = vmatprep.subr.bf16.mxu1 %v1353_v1 }
  0x3f   : > { %1224 = vmatprep.subr.bf16.mxu0 %v1335_v51 }
  0x41   : > { %1276 = vmatpush3.bf16.msra.mxu1 %v1337_v53 }
  0x42   : > { %1225 = vmatpush3.bf16.msra.mxu0 %v1336_v52  ;;  %1277 = vmatprep.subr.bf16.mxu1 %v1353_v1 }
  0x43   : > { %1226 = vmatprep.subr.bf16.mxu0 %v1338_v54 }
  0x45   : > { %1278 = vmatpush3.bf16.msra.mxu1 %v1340_v56 }
  0x46   : > { %1227 = vmatpush3.bf16.msra.mxu0 %v1339_v55  ;;  %1279 = vmatprep.subr.bf16.mxu1 %v1353_v1  ;;  %v1132_v1 = vld [vmem:[%s1639_s3] ss:$0 sm:$0xff] }
  0x47   : > { %1228 = vmatprep.subr.bf16.mxu0 %v1341_v57 }
  0x49   : > { %1280 = vmatpush3.bf16.msra.mxu1 %v1343_v59 }
  0x4a   : > { %1229 = vmatpush3.bf16.msra.mxu0 %v1342_v58 }
  0xec   : > { %v643_v60 = vpop.f32.mrf.mxu1 }
  0xed   : > { %v1199_v61 = vpop.f32.mrf.mxu0 }
  0xee   : > { %v1263_v62 = vpop.f32.mrf.mxu1 }
  0xef   : > { %v1200_v63 = vpop.f32.mrf.mxu0 }
  0xf0   : > { %v1201_v0 = vadd.f32 %v1200_v63, %v1199_v61  ;;  %v646_v2 = vpop.f32.mrf.mxu1 }
  0xf1   : > { %v1202_v4 = vpop.f32.mrf.mxu0 }
  0xf2   : > { %v644_v5 = vadd.f32 %v1201_v0, %v643_v60  ;;  %v1264_v6 = vpop.f32.mrf.mxu1 }
  0xf3   : > { %v1203_v7 = vpop.f32.mrf.mxu0 }
  0xf4   : > { %v657_v8 = vmul.f32 %v1131_v3, %v644_v5  ;;  %v1204_v9 = vadd.f32 %v1203_v7, %v1202_v4 }
  0xf6   : > { %v647_v10 = vadd.f32 %v1204_v9, %v646_v2  ;;  %v666_v12 = vadd.f32 %v1132_v1, %v657_v8 }
  0xf8   : > { %v658_v11 = vmul.f32 %v1131_v3, %v647_v10  ;;  %v668_v14 = vmax.f32 %v666_v12, 0.0 }
  0xfa   : > { %v667_v13 = vadd.f32 %v1132_v1, %v658_v11 }
  0xfc   : > { %v669_v15 = vmax.f32 %v667_v13, 0.0 }
  0xfe   : > { %v670_v16 = vpack.c.bf16 %v669_v15, %v668_v14 }
 0x100   : > { %v672_v17 = vshrl.u32 %v670_v16, 16  ;;  %908 = vmatprep.mubr.bf16.mxu0 %v670_v16  ;;  %v675_v18 = vshll.u32 %v670_v16, 16 }
 0x102   : > { %v674_v19 = vrot.slane %v672_v17, 7  ;;  %v680_v20 = vrot.slane %v675_v18, 1 }
 0x104   : > { %v677_v21 = vor.u32 %v675_v18, %v674_v19  ;;  %v681_v22 = vor.u32 %v680_v20, %v672_v17 }
 0x106   : > { %v679_v24 = vsel %vm1517_vm6, 0, %v677_v21  ;;  %v683_v25 = vsel %vm1509_vm5, %v681_v22, 0 }
 0x107   : > { %909 = vmatmul.mubr.bf16.vlgmr.msra.gmra.mxu0 %v679_v24  ;;  %1282 = vmatmul.mubr.bf16.vlgmr.msra.gmra.mxu1 %v683_v25 }
 0x1c7   : > { %v1230_v26 = vpop.f32.mrf.mxu0  ;;  %v951_v27 = vpop.f32.mrf.mxu1 }
 0x1c9   : > { %v1231_v29 = vpop.f32.mrf.mxu0  ;;  %v1283_v30 = vpop.f32.mrf.mxu1 }
 0x1ca   : > { %v1232_v31 = vadd.f32 %v1231_v29, %v1230_v26 }
 0x1cb   : > { %v1233_v34 = vpop.f32.mrf.mxu0  ;;  %v954_v35 = vpop.f32.mrf.mxu1 }
 0x1cc   : > { %v952_v36 = vadd.f32 %v1232_v31, %v951_v27 }
 0x1cd   : > { %v1234_v32 = vpop.f32.mrf.mxu0  ;;  %v1284_v37 = vpop.f32.mrf.mxu1 }
 0x1ce   : > { %v965_v38 = vmul.f32 %v1157_v33, %v952_v36  ;;  %v1235_v39 = vadd.f32 %v1234_v32, %v1233_v34 }
 0x1d0   : > { %v974_v41 = vadd.f32 %v1158_v28, %v965_v38  ;;  %v955_v42 = vadd.f32 %v1235_v39, %v954_v35 }
 0x1d2   : > { %v966_v44 = vmul.f32 %v1157_v33, %v955_v42  ;;  %v976_v45 = vadd.f32 %v974_v41, %v374_v40 }
 0x1d4   : > { %v975_v46 = vadd.f32 %v1158_v28, %v966_v44  ;;  %v995_v49 = vmul.f32 %v1161_v47, %v976_v45 }
 0x1d6   : > { %v977_v48 = vadd.f32 %v975_v46, %v375_v43 }
 0x1d8   : > { %v1176_v50 = vpack.c.bf16 %v977_v48, %v976_v45  ;;  %v996_v51 = vmul.f32 %v1161_v47, %v977_v48 }
 0x1da   : > { %1177 = vst [vmem:[%s345_s28] sm:$0xff] %v1176_v50   ;;  %v1181_v23 = vpack.c.bf16 %v996_v51, %v995_v49 }
 0x1dc   : > { %1182 = vst [vmem:[%s340_s10] sm:$0xff] %v1181_v23  }
 0x1dd PF: > { %s20_s30 = sadd.s32 1, %s1351_s30  }
 0x1de   : > { %p17_p4 = scmp.ge.s32.totalorder %s20_s30, 4  }
 0x1e0   :  { %19 = sbr.rel (!%p17_p4) target bundleno = 1 (0x1), region = 94 }

// kernel: cifar_resnet_forward.10
= control target key start
LH: loop header
LB: loop body
LE: loop exit
PB: predicated region body
PF: predicated region fallthrough
CT: control target
= control target key end

     0   :  { %s1406_s27 = smov 0   ;;  %s1656_s0 = inlined_call_operand.vmem [shape: bf16[2,8,256], index: 0, kind: input, shape index: {}]   ;;  %s1657_s1 = inlined_call_operand.vmem [shape: bf16[384,128], index: 1, kind: input, shape index: {}]   ;;  %s1658_s2 = inlined_call_operand.vmem [shape: f32[1,128], index: 2, kind: input, shape index: {}]   ;;  %s1659_s3 = inlined_call_operand.vmem [shape: f32[1,128], index: 3, kind: input, shape index: {}]   ;;  %s1660_s4 = inlined_call_operand.vmem [shape: bf16[384,128], index: 4, kind: input, shape index: {}]   ;;  %s1661_s5 = inlined_call_operand.vmem [shape: f32[1,128], index: 5, kind: input, shape index: {}]   ;;  %s1662_s6 = inlined_call_operand.vmem [shape: f32[1,128], index: 6, kind: input, shape index: {}]   ;;  %s1663_s7 = inlined_call_operand.vmem [shape: bf16[128,128], index: 7, kind: input, shape index: {}]   ;;  %s1664_s8 = inlined_call_operand.vmem [shape: bf16[2,8,128], index: 8, kind: output, shape index: {}]  }
   0x1 LB: > { %s1079_s28 = sadd.s32 4294967295, %s1357_s27   ;;  %p1083_p0 = scmp.ge.s32.totalorder %s1357_s27, 1  ;;  %s1357_s27 = sphi %s1406_s27, %s18_s27  }
   0x2   : > { %p262_p1 = scmp.lt.s32.totalorder %s1357_s27, 3 }
   0x4   : > { %p263_p2 = pnand %p1083_p0, %p262_p1 }
   0x5   : > { %p295_p3 = scmp.lt.s32.totalorder (!%p263_p2), %s1079_s28, 1 }
   0x6   : > { %266 = sbr.rel (%p263_p2) target bundleno = 490 (0x1ea), region = 52 }
   0xb   : > { %v1293_v0 = vld [vmem:[%s1657_s1 + $0x78] sm:$0xff]   ;;  %v1359_v1 = vmov 0.0   ;;  %vm1360_vm0 = vmmov 0   ;;  %v1296_v4 = vld [vmem:[%s1657_s1 + $0x70] sm:$0xff]   ;;  %v1299_v7 = vld [vmem:[%s1657_s1 + $0x68] sm:$0xff]   ;;  %s1668_s28 = smov (!%p295_p3, %s1079_s28), 1 }
   0xc   : > { %1223 = vmatprep.subr.bf16.mxu1 %v1359_v1  ;;  %v1294_v2 = vld [vmem:[%s1657_s1 + $0xb8] sm:$0xff]   ;;  %1152 = vmatprep.subr.bf16.mxu0 %v1293_v0  ;;  %v1297_v5 = vld [vmem:[%s1657_s1 + $0xb0] sm:$0xff]   ;;  %v1300_v8 = vld [vmem:[%s1657_s1 + $0xa8] sm:$0xff]   ;;  %s1151_s19 = sshll.u32 %s1668_s28, 3  ;;  %vm317_vm1 = vcmask 1040384   ;;  %vm627_vm4 = vcmask 1043456  }
   0xd   : > { %v1295_v3 = vld [vmem:[%s1657_s1 + $0x38] sm:$0xff]   ;;  %1239 = vmatprep.mubr.msk.bf16.mxu1 %vm1360_vm0, %v1359_v1  ;;  %1224 = vmatpush3.bf16.msra.mxu1 %v1294_v2  ;;  %v1298_v6 = vld [vmem:[%s1657_s1 + $0x30] sm:$0xff]   ;;  %v1301_v9 = vld [vmem:[%s1657_s1 + $0x28] sm:$0xff]   ;;  %s299_s30 = scalar_lea.vmem %s1656_s0, %s1151_s19  ;;  %vm318_vm2 = vsmask.f32 256  ;;  %s1086_s11 = sshll.u32 %s1668_s28, 2 }
   0xe   : > { %1153 = vmatpush3.bf16.msra.mxu0 %v1295_v3  ;;  %1225 = vmatprep.subr.bf16.mxu1 %v1359_v1  ;;  %v1302_v10 = vld [vmem:[%s1657_s1 + $0x60] sm:$0xff]   ;;  %v1305_v13 = vld [vmem:[%s1657_s1 + $0x58] sm:$0xff]   ;;  %v1308_v16 = vld [vmem:[%s1657_s1 + $0x50] sm:$0xff]   ;;  %vm628_vm5 = vsmask.f32 3328  ;;  %s303_s14 = scalar_lea.vmem %s1664_s8, %s1086_s11 }
   0xf   : > { %1154 = vmatprep.subr.bf16.mxu0 %v1296_v4  ;;  %v1303_v11 = vld [vmem:[%s1657_s1 + $0xa0] sm:$0xff]   ;;  %v1306_v14 = vld [vmem:[%s1657_s1 + $0x98] sm:$0xff]   ;;  %v1309_v17 = vld [vmem:[%s1657_s1 + $0x90] sm:$0xff]  }
  0x10   : > { %v1304_v12 = vld [vmem:[%s1657_s1 + $0x20] sm:$0xff]   ;;  %v1307_v15 = vld [vmem:[%s1657_s1 + $0x18] sm:$0xff]   ;;  %v1310_v18 = vld [vmem:[%s1657_s1 + $0x10] sm:$0xff]  }
  0x11   : > { %1226 = vmatpush3.bf16.msra.mxu1 %v1297_v5  ;;  %v1311_v19 = vld [vmem:[%s1657_s1 + $0x48] sm:$0xff]   ;;  %v1314_v22 = vld [vmem:[%s1657_s1 + $0x40] sm:$0xff]   ;;  %v1319_v30 = vld [vmem:[%s1660_s4 + $0x78] sm:$0xff]  }
  0x12   : > { %1155 = vmatpush3.bf16.msra.mxu0 %v1298_v6  ;;  %1227 = vmatprep.subr.bf16.mxu1 %v1359_v1  ;;  %v1312_v20 = vld [vmem:[%s1657_s1 + $0x88] sm:$0xff]   ;;  %v1499_v23 = vld [vmem:[%s299_s30] sm:$0xff]  ;;  %vm1515_vm3 = vmand %vm317_vm1, %vm318_vm2 }
  0x13   : > { %1156 = vmatprep.subr.bf16.mxu0 %v1299_v7  ;;  %v1313_v21 = vld [vmem:[%s1657_s1 + $0x8] sm:$0xff]   ;;  %v1315_v24 = vld [vmem:[%s1657_s1 + $0x80] sm:$0xff]   ;;  %v1088_v25 = vcombine.low %v1499_v23, %v1499_v23  ;;  %v1087_v26 = vcombine.high %v1499_v23, %v1499_v23  ;;  %v1320_v33 = vld [vmem:[%s1660_s4 + $0x38] sm:$0xff]  }
  0x14   : > { %v1316_v27 = vld [vmem:[%s1657_s1] sm:$0xff]   ;;  %v1321_v35 = vld [vmem:[%s1660_s4 + $0xb8] sm:$0xff]   ;;  %v1322_v36 = vld [vmem:[%s1660_s4 + $0x70] sm:$0xff]  }
  0x15   : > { %1228 = vmatpush3.bf16.msra.mxu1 %v1300_v8  ;;  %549 = vmatprep.mubr.bf16.mxu0 %v1088_v25  ;;  %v310_v28 = vshrl.u32 %v1087_v26, 16  ;;  %v313_v29 = vshll.u32 %v1087_v26, 16  ;;  %v1324_v38 = vld [vmem:[%s1660_s4 + $0xb0] sm:$0xff]   ;;  %v1325_v40 = vld [vmem:[%s1660_s4 + $0x68] sm:$0xff]   ;;  %v1328_v43 = vld [vmem:[%s1660_s4 + $0x60] sm:$0xff]  }
  0x16   : > { %1157 = vmatpush3.bf16.msra.mxu0 %v1301_v9  ;;  %1229 = vmatprep.subr.bf16.mxu1 %v1359_v1  ;;  %v1323_v39 = vld [vmem:[%s1660_s4 + $0x30] sm:$0xff]   ;;  %v1326_v41 = vld [vmem:[%s1660_s4 + $0x28] sm:$0xff]   ;;  %v1329_v44 = vld [vmem:[%s1660_s4 + $0x20] sm:$0xff]  }
  0x17   : > { %1158 = vmatprep.subr.bf16.mxu0 %v1302_v10  ;;  %v312_v31 = vrot.slane %v310_v28, 7  ;;  %v1327_v42 = vld [vmem:[%s1660_s4 + $0xa8] sm:$0xff]   ;;  %v1330_v45 = vld [vmem:[%s1660_s4 + $0xa0] sm:$0xff]   ;;  %v1331_v46 = vld [vmem:[%s1660_s4 + $0x58] sm:$0xff]  }
  0x18   : > { %v1332_v47 = vld [vmem:[%s1660_s4 + $0x18] sm:$0xff]   ;;  %v1334_v49 = vld [vmem:[%s1660_s4 + $0x50] sm:$0xff]   ;;  %v1337_v52 = vld [vmem:[%s1660_s4 + $0x48] sm:$0xff]  }
  0x19   : > { %1230 = vmatpush3.bf16.msra.mxu1 %v1303_v11  ;;  %v315_v34 = vor.u32 %v313_v29, %v312_v31  ;;  %v1333_v48 = vld [vmem:[%s1660_s4 + $0x98] sm:$0xff]   ;;  %v1335_v50 = vld [vmem:[%s1660_s4 + $0x10] sm:$0xff]   ;;  %v1338_v53 = vld [vmem:[%s1660_s4 + $0x8] sm:$0xff]  }
  0x1a   : > { %1159 = vmatpush3.bf16.msra.mxu0 %v1304_v12  ;;  %1231 = vmatprep.subr.bf16.mxu1 %v1359_v1  ;;  %v1336_v51 = vld [vmem:[%s1660_s4 + $0x90] sm:$0xff]   ;;  %v1339_v54 = vld [vmem:[%s1660_s4 + $0x88] sm:$0xff]   ;;  %v1340_v55 = vld [vmem:[%s1660_s4 + $0x40] sm:$0xff]  }
  0x1b   : > { %1160 = vmatprep.subr.bf16.mxu0 %v1305_v13  ;;  %v320_v37 = vsel %vm1515_vm3, 0, %v315_v34  ;;  %v1341_v56 = vld [vmem:[%s1660_s4] sm:$0xff]   ;;  %vm629_vm6 = vmand %vm627_vm4, %vm628_vm5  ;;  %v1348_v25 = vld [vmem:[%s1663_s7 + $0x10] sm:$0xff]  }
  0x1c   : > { %v1342_v57 = vld [vmem:[%s1660_s4 + $0x80] sm:$0xff]  }
  0x1d   : > { %1232 = vmatpush3.bf16.msra.mxu1 %v1306_v14  ;;  %v1113_v0 = vld [vmem:[%s1658_s2] ss:$0 sm:$0xff] }
  0x1e   : > { %1161 = vmatpush3.bf16.msra.mxu0 %v1307_v15  ;;  %1233 = vmatprep.subr.bf16.mxu1 %v1359_v1  ;;  %v1114_v6 = vld [vmem:[%s1659_s3] ss:$0 sm:$0xff] }
  0x1f   : > { %1162 = vmatprep.subr.bf16.mxu0 %v1308_v16 }
  0x21   : > { %1234 = vmatpush3.bf16.msra.mxu1 %v1309_v17  ;;  %v1343_v17 = vld [vmem:[%s1663_s7 + $0x38] sm:$0xff]  }
  0x22   : > { %1163 = vmatpush3.bf16.msra.mxu0 %v1310_v18  ;;  %1235 = vmatprep.subr.bf16.mxu1 %v1359_v1 }
  0x23   : > { %1164 = vmatprep.subr.bf16.mxu0 %v1311_v19 }
  0x25   : > { %1236 = vmatpush3.bf16.msra.mxu1 %v1312_v20  ;;  %v1344_v20 = vld [vmem:[%s1663_s7 + $0x30] sm:$0xff]  }
  0x26   : > { %1165 = vmatpush3.bf16.msra.mxu0 %v1313_v21  ;;  %1237 = vmatprep.subr.bf16.mxu1 %v1359_v1  ;;  %v1345_v21 = vld [vmem:[%s1663_s7 + $0x28] sm:$0xff]  }
  0x27   : > { %1166 = vmatprep.subr.bf16.mxu0 %v1314_v22  ;;  %v1346_v22 = vld [vmem:[%s1663_s7 + $0x20] sm:$0xff]  }
  0x29   : > { %1238 = vmatpush3.bf16.msra.mxu1 %v1315_v24  ;;  %v1347_v24 = vld [vmem:[%s1663_s7 + $0x18] sm:$0xff]  }
  0x2a   : > { %1167 = vmatpush3.bf16.msra.mxu0 %v1316_v27  ;;  %1243 = vmatprep.subr.bf16.mxu1 %v1359_v1  ;;  %v1350_v27 = vld [vmem:[%s1663_s7] sm:$0xff]  }
  0x2b   : > { %1183 = vmatprep.subr.bf16.mxu0 %v1319_v30 }
  0x2c   : > { %1240 = vmatmul.mubr.bf16.vlgmr.msra.gmra.mxu1 %v1087_v26  ;;  %v1349_v26 = vld [vmem:[%s1663_s7 + $0x8] sm:$0xff]  }
  0x2d   : > { %550 = vmatmul.mubr.bf16.vlgmr.msra.gmra.mxu0 %v320_v37  ;;  %1244 = vmatpush3.bf16.msra.mxu1 %v1321_v35 }
  0x2e   : > { %1184 = vmatpush3.bf16.msra.mxu0 %v1320_v33  ;;  %1245 = vmatprep.subr.bf16.mxu1 %v1359_v1 }
  0x2f   : > { %1185 = vmatprep.subr.bf16.mxu0 %v1322_v36  ;;  %1259 = vmatprep.mubr.msk.bf16.mxu1 %vm1360_vm0, %v1359_v1 }
  0x31   : > { %1246 = vmatpush3.bf16.msra.mxu1 %v1324_v38  ;;  %v1139_v38 = vld [vmem:[%s1661_s5] ss:$0 sm:$0xff] }
  0x32   : > { %1186 = vmatpush3.bf16.msra.mxu0 %v1323_v39  ;;  %1247 = vmatprep.subr.bf16.mxu1 %v1359_v1 }
  0x33   : > { %1187 = vmatprep.subr.bf16.mxu0 %v1325_v40 }
  0x35   : > { %1248 = vmatpush3.bf16.msra.mxu1 %v1327_v42 }
  0x36   : > { %1188 = vmatpush3.bf16.msra.mxu0 %v1326_v41  ;;  %1249 = vmatprep.subr.bf16.mxu1 %v1359_v1 }
  0x37   : > { %1189 = vmatprep.subr.bf16.mxu0 %v1328_v43 }
  0x39   : > { %1250 = vmatpush3.bf16.msra.mxu1 %v1330_v45 }
  0x3a   : > { %1190 = vmatpush3.bf16.msra.mxu0 %v1329_v44  ;;  %1251 = vmatprep.subr.bf16.mxu1 %v1359_v1 }
  0x3b   : > { %1191 = vmatprep.subr.bf16.mxu0 %v1331_v46 }
  0x3d   : > { %1252 = vmatpush3.bf16.msra.mxu1 %v1333_v48 }
  0x3e   : > { %1192 = vmatpush3.bf16.msra.mxu0 %v1332_v47  ;;  %1253 = vmatprep.subr.bf16.mxu1 %v1359_v1 }
  0x3f   : > { %1193 = vmatprep.subr.bf16.mxu0 %v1334_v49 }
  0x41   : > { %1254 = vmatpush3.bf16.msra.mxu1 %v1336_v51 }
  0x42   : > { %1194 = vmatpush3.bf16.msra.mxu0 %v1335_v50  ;;  %1255 = vmatprep.subr.bf16.mxu1 %v1359_v1 }
  0x43   : > { %1195 = vmatprep.subr.bf16.mxu0 %v1337_v52 }
  0x45   : > { %1256 = vmatpush3.bf16.msra.mxu1 %v1339_v54 }
  0x46   : > { %1196 = vmatpush3.bf16.msra.mxu0 %v1338_v53  ;;  %1257 = vmatprep.subr.bf16.mxu1 %v1359_v1 }
  0x47   : > { %1197 = vmatprep.subr.bf16.mxu0 %v1340_v55 }
  0x49   : > { %1258 = vmatpush3.bf16.msra.mxu1 %v1342_v57 }
  0x4a   : > { %1198 = vmatpush3.bf16.msra.mxu0 %v1341_v56 }
  0x4b   : > { %1263 = vmatprep.subr.bf16.mxu0 %v1359_v1 }
  0xec   : > { %v591_v58 = vpop.f32.mrf.mxu1 }
  0xed   : > { %v1168_v59 = vpop.f32.mrf.mxu0 }
  0xee   : > { %v1241_v60 = vpop.f32.mrf.mxu1 }
  0xef   : > { %v1169_v61 = vpop.f32.mrf.mxu0 }
  0xf0   : > { %v1170_v62 = vadd.f32 %v1169_v61, %v1168_v59  ;;  %v594_v63 = vpop.f32.mrf.mxu1 }
  0xf1   : > { %v1171_v2 = vpop.f32.mrf.mxu0 }
  0xf2   : > { %v592_v3 = vadd.f32 %v1170_v62, %v591_v58  ;;  %v1242_v4 = vpop.f32.mrf.mxu1 }
  0xf3   : > { %v1172_v5 = vpop.f32.mrf.mxu0 }
  0xf4   : > { %v604_v7 = vmul.f32 %v1113_v0, %v592_v3 }
  0xf6   : > { %v612_v8 = vadd.f32 %v1114_v6, %v604_v7 }
  0xf8   : > { %v613_v9 = vmax.f32 %v612_v8, 0.0 }
  0xfa   : > { %v614_v10 = vpack.c.bf16 %v613_v9, %v613_v9 }
  0xfc   : > { %v616_v11 = vshrl.u32 %v614_v10, 16  ;;  %855 = vmatprep.mubr.bf16.mxu0 %v614_v10  ;;  %v619_v12 = vshll.u32 %v614_v10, 16 }
  0xfe   : > { %v618_v13 = vrot.slane %v616_v11, 7  ;;  %v624_v14 = vrot.slane %v619_v12, 1 }
 0x100   : > { %v621_v15 = vor.u32 %v619_v12, %v618_v13  ;;  %v625_v16 = vor.u32 %v624_v14, %v616_v11 }
 0x102   : > { %v623_v18 = vsel %vm1515_vm3, 0, %v621_v15  ;;  %v630_v19 = vsel %vm629_vm6, %v625_v16, 0 }
 0x103   : > { %856 = vmatmul.mubr.bf16.vlgmr.msra.gmra.mxu0 %v623_v18  ;;  %1260 = vmatmul.mubr.bf16.vlgmr.msra.gmra.mxu1 %v630_v19 }
 0x104   : > { %1264 = vmatpush3.bf16.msra.mxu0 %v1343_v17  ;;  %1279 = vmatprep.mubr.msk.bf16.mxu0 %vm1360_vm0, %v1359_v1 }
 0x105   : > { %1265 = vmatprep.subr.bf16.mxu0 %v1359_v1 }
 0x108   : > { %1266 = vmatpush3.bf16.msra.mxu0 %v1344_v20 }
 0x109   : > { %1267 = vmatprep.subr.bf16.mxu0 %v1359_v1 }
 0x10c   : > { %1268 = vmatpush3.bf16.msra.mxu0 %v1345_v21 }
 0x10d   : > { %1269 = vmatprep.subr.bf16.mxu0 %v1359_v1 }
 0x110   : > { %1270 = vmatpush3.bf16.msra.mxu0 %v1346_v22 }
 0x111   : > { %1271 = vmatprep.subr.bf16.mxu0 %v1359_v1 }
 0x114   : > { %1272 = vmatpush3.bf16.msra.mxu0 %v1347_v24 }
 0x115   : > { %1273 = vmatprep.subr.bf16.mxu0 %v1359_v1 }
 0x118   : > { %1274 = vmatpush3.bf16.msra.mxu0 %v1348_v25 }
 0x119   : > { %1275 = vmatprep.subr.bf16.mxu0 %v1359_v1 }
 0x11c   : > { %1276 = vmatpush3.bf16.msra.mxu0 %v1349_v26 }
 0x11d   : > { %1277 = vmatprep.subr.bf16.mxu0 %v1359_v1  ;;  %v1140_v1 = vld [vmem:[%s1662_s6] ss:$0 sm:$0xff] }
 0x120   : > { %1278 = vmatpush3.bf16.msra.mxu0 %v1350_v27 }
 0x123   : > { %1280 = vmatmul.mubr.bf16.vlgmr.msra.gmra.mxu0 %v1499_v23 }
 0x1c3   : > { %v1199_v28 = vpop.f32.mrf.mxu0  ;;  %v897_v29 = vpop.f32.mrf.mxu1 }
 0x1c5   : > { %v1200_v30 = vpop.f32.mrf.mxu0  ;;  %v1261_v31 = vpop.f32.mrf.mxu1 }
 0x1c6   : > { %v1201_v36 = vadd.f32 %v1200_v30, %v1199_v28 }
 0x1c7   : > { %v1202_v32 = vpop.f32.mrf.mxu0  ;;  %v900_v33 = vpop.f32.mrf.mxu1 }
 0x1c8   : > { %v898_v37 = vadd.f32 %v1201_v36, %v897_v29 }
 0x1c9   : > { %v1203_v34 = vpop.f32.mrf.mxu0  ;;  %v1262_v35 = vpop.f32.mrf.mxu1 }
 0x1ca   : > { %v910_v39 = vmul.f32 %v1139_v38, %v898_v37 }
 0x1cc   : > { %v918_v23 = vadd.f32 %v1140_v1, %v910_v39 }
 0x1e3   : > { %v1017_v40 = vpop.f32.mrf.mxu0 }
 0x1e4   : > { %v1023_v41 = vadd.f32 %v1017_v40, %v918_v23 }
 0x1e5   : > { %v1281_v42 = vpop.f32.mrf.mxu0 }
 0x1e6   : > { %v1024_v43 = vpack.c.bf16 %v1023_v41, %v1023_v41 }
 0x1e7   : > { %v1020_v44 = vpop.f32.mrf.mxu0 }
 0x1e8   : > { %1025 = vst [vmem:[%s303_s14] sm:$0xf] %v1024_v43 }
 0x1e9   : > { %v1282_v45 = vpop.f32.mrf.mxu0 }
 0x1ea PF: > { %s18_s27 = sadd.s32 1, %s1357_s27  }
 0x1eb   : > { %p15_p4 = scmp.ge.s32.totalorder %s18_s27, 4  }
 0x1ed   :  { %17 = sbr.rel (!%p15_p4) target bundleno = 1 (0x1), region = 82 }

// kernel: cifar_resnet_forward.11
= control target key start
LH: loop header
LB: loop body
LE: loop exit
PB: predicated region body
PF: predicated region fallthrough
CT: control target
= control target key end

     0   :  { %s1337_s30 = smov 0   ;;  %s1567_s0 = inlined_call_operand.vmem [shape: bf16[2,8,128], index: 0, kind: input, shape index: {}]   ;;  %s1568_s1 = inlined_call_operand.vmem [shape: bf16[384,128], index: 1, kind: input, shape index: {}]   ;;  %s1569_s2 = inlined_call_operand.vmem [shape: f32[1,128], index: 2, kind: input, shape index: {}]   ;;  %s1570_s3 = inlined_call_operand.vmem [shape: f32[1,128], index: 3, kind: input, shape index: {}]   ;;  %s1571_s4 = inlined_call_operand.vmem [shape: bf16[384,128], index: 4, kind: input, shape index: {}]   ;;  %s1572_s5 = inlined_call_operand.vmem [shape: f32[1,128], index: 5, kind: input, shape index: {}]   ;;  %s1573_s6 = inlined_call_operand.vmem [shape: f32[1,128], index: 6, kind: input, shape index: {}]   ;;  %s1574_s7 = inlined_call_operand.vmem [shape: f32[1,128], index: 7, kind: input, shape index: {}]   ;;  %s1575_s8 = inlined_call_operand.vmem [shape: bf16[2,8,128], index: 8, kind: output, shape index: {0}]   ;;  %s1576_s9 = inlined_call_operand.vmem [shape: bf16[2,8,128], index: 9, kind: output, shape index: {1}]  }
   0x1 LB: > { %s1052_s10 = sadd.s32 4294967295, %s1283_s30   ;;  %p1056_p0 = scmp.ge.s32.totalorder %s1283_s30, 1  ;;  %s1283_s30 = sphi %s1337_s30, %s20_s30  }
   0x2   : > { %p289_p1 = scmp.lt.s32.totalorder %s1283_s30, 3 }
   0x4   : > { %p290_p2 = pnand %p1056_p0, %p289_p1 }
   0x5   : > { %p327_p3 = scmp.lt.s32.totalorder (!%p290_p2), %s1052_s10, 1 }
   0x6   : > { %293 = sbr.rel (%p290_p2) target bundleno = 469 (0x1d5), region = 52 }
   0xb   : > { %v1228_v0 = vld [vmem:[%s1568_s1 + $0x78] sm:$0xff]   ;;  %v1285_v1 = vmov 0.0   ;;  %vm1286_vm0 = vmmov 0   ;;  %v1231_v4 = vld [vmem:[%s1568_s1 + $0x70] sm:$0xff]   ;;  %v1234_v7 = vld [vmem:[%s1568_s1 + $0x68] sm:$0xff]   ;;  %s1582_s10 = smov (!%p327_p3, %s1052_s10), 1 }
   0xc   : > { %1178 = vmatprep.subr.bf16.mxu1 %v1285_v1  ;;  %v1229_v2 = vld [vmem:[%s1568_s1 + $0xb8] sm:$0xff]   ;;  %1116 = vmatprep.subr.bf16.mxu0 %v1228_v0  ;;  %v1232_v5 = vld [vmem:[%s1568_s1 + $0xb0] sm:$0xff]   ;;  %v1235_v8 = vld [vmem:[%s1568_s1 + $0xa8] sm:$0xff]   ;;  %s1404_s24 = sshll.u32 %s1582_s10, 2  ;;  %vm359_vm1 = vcmask 1043456   ;;  %vm352_vm3 = vcmask 1040384  }
   0xd   : > { %v1230_v3 = vld [vmem:[%s1568_s1 + $0x38] sm:$0xff]   ;;  %1194 = vmatprep.mubr.msk.bf16.mxu1 %vm1286_vm0, %v1285_v1  ;;  %1179 = vmatpush3.bf16.msra.mxu1 %v1229_v2  ;;  %v1233_v6 = vld [vmem:[%s1568_s1 + $0x30] sm:$0xff]   ;;  %v1236_v9 = vld [vmem:[%s1568_s1 + $0x28] sm:$0xff]   ;;  %s330_s13 = scalar_lea.vmem %s1567_s0, %s1404_s24  ;;  %vm360_vm2 = vsmask.f32 3328  ;;  %s338_s28 = scalar_lea.vmem %s1576_s9, %s1404_s24 }
   0xe   : > { %1117 = vmatpush3.bf16.msra.mxu0 %v1230_v3  ;;  %1180 = vmatprep.subr.bf16.mxu1 %v1285_v1  ;;  %v1237_v10 = vld [vmem:[%s1568_s1 + $0x60] sm:$0xff]   ;;  %v1240_v13 = vld [vmem:[%s1568_s1 + $0x58] sm:$0xff]   ;;  %v1243_v16 = vld [vmem:[%s1568_s1 + $0x50] sm:$0xff]   ;;  %vm353_vm4 = vsmask.f32 256  ;;  %s334_s10 = scalar_lea.vmem %s1575_s8, %s1404_s24 }
   0xf   : > { %1118 = vmatprep.subr.bf16.mxu0 %v1231_v4  ;;  %v1238_v11 = vld [vmem:[%s1568_s1 + $0xa0] sm:$0xff]   ;;  %v1241_v14 = vld [vmem:[%s1568_s1 + $0x98] sm:$0xff]   ;;  %v1244_v17 = vld [vmem:[%s1568_s1 + $0x90] sm:$0xff]  }
  0x10   : > { %v1239_v12 = vld [vmem:[%s1568_s1 + $0x20] sm:$0xff]   ;;  %v1242_v15 = vld [vmem:[%s1568_s1 + $0x18] sm:$0xff]   ;;  %v1245_v18 = vld [vmem:[%s1568_s1 + $0x10] sm:$0xff]  }
  0x11   : > { %1181 = vmatpush3.bf16.msra.mxu1 %v1232_v5  ;;  %v1246_v19 = vld [vmem:[%s1568_s1 + $0x48] sm:$0xff]   ;;  %v1427_v22 = vld [vmem:[%s330_s13] sm:$0xf]  ;;  %vm1441_vm5 = vmand %vm359_vm1, %vm360_vm2 }
  0x12   : > { %1119 = vmatpush3.bf16.msra.mxu0 %v1233_v6  ;;  %1182 = vmatprep.subr.bf16.mxu1 %v1285_v1  ;;  %v1247_v20 = vld [vmem:[%s1568_s1 + $0x88] sm:$0xff]   ;;  %v1249_v23 = vld [vmem:[%s1568_s1 + $0x40] sm:$0xff]   ;;  %v1060_v24 = vcombine.low %v1427_v22, %v1427_v22  ;;  %vm1446_vm6 = vmand %vm352_vm3, %vm353_vm4 }
  0x13   : > { %1120 = vmatprep.subr.bf16.mxu0 %v1234_v7  ;;  %v1248_v21 = vld [vmem:[%s1568_s1 + $0x8] sm:$0xff]   ;;  %588 = vmatprep.mubr.bf16.mxu0 %v1427_v22  ;;  %v1250_v25 = vld [vmem:[%s1568_s1 + $0x80] sm:$0xff]   ;;  %v1253_v33 = vld [vmem:[%s1571_s4 + $0x78] sm:$0xff]  }
  0x14   : > { %v1251_v26 = vld [vmem:[%s1568_s1] sm:$0xff]   ;;  %v348_v27 = vshll.u32 %v1060_v24, 16  ;;  %v345_v28 = vshrl.u32 %v1060_v24, 16  ;;  %v1254_v34 = vld [vmem:[%s1571_s4 + $0x38] sm:$0xff]   ;;  %v1256_v38 = vld [vmem:[%s1571_s4 + $0x70] sm:$0xff]  }
  0x15   : > { %1183 = vmatpush3.bf16.msra.mxu1 %v1235_v8  ;;  %v1255_v37 = vld [vmem:[%s1571_s4 + $0xb8] sm:$0xff]   ;;  %v1258_v41 = vld [vmem:[%s1571_s4 + $0xb0] sm:$0xff]   ;;  %v1259_v43 = vld [vmem:[%s1571_s4 + $0x68] sm:$0xff]  }
  0x16   : > { %1121 = vmatpush3.bf16.msra.mxu0 %v1236_v9  ;;  %1184 = vmatprep.subr.bf16.mxu1 %v1285_v1  ;;  %v356_v30 = vrot.slane %v348_v27, 1  ;;  %v347_v31 = vrot.slane %v345_v28, 7  ;;  %v1257_v42 = vld [vmem:[%s1571_s4 + $0x30] sm:$0xff]   ;;  %v1260_v44 = vld [vmem:[%s1571_s4 + $0x28] sm:$0xff]   ;;  %v1262_v46 = vld [vmem:[%s1571_s4 + $0x60] sm:$0xff]  }
  0x17   : > { %1122 = vmatprep.subr.bf16.mxu0 %v1237_v10  ;;  %v1261_v45 = vld [vmem:[%s1571_s4 + $0xa8] sm:$0xff]   ;;  %v1263_v47 = vld [vmem:[%s1571_s4 + $0x20] sm:$0xff]   ;;  %v1265_v49 = vld [vmem:[%s1571_s4 + $0x58] sm:$0xff]  }
  0x18   : > { %v357_v35 = vor.u32 %v356_v30, %v345_v28  ;;  %v350_v36 = vor.u32 %v348_v27, %v347_v31  ;;  %v1264_v48 = vld [vmem:[%s1571_s4 + $0xa0] sm:$0xff]   ;;  %v1266_v50 = vld [vmem:[%s1571_s4 + $0x18] sm:$0xff]   ;;  %v1268_v52 = vld [vmem:[%s1571_s4 + $0x50] sm:$0xff]  }
  0x19   : > { %1185 = vmatpush3.bf16.msra.mxu1 %v1238_v11  ;;  %v1267_v51 = vld [vmem:[%s1571_s4 + $0x98] sm:$0xff]   ;;  %v1269_v53 = vld [vmem:[%s1571_s4 + $0x10] sm:$0xff]   ;;  %v1271_v55 = vld [vmem:[%s1571_s4 + $0x48] sm:$0xff]  }
  0x1a   : > { %1123 = vmatpush3.bf16.msra.mxu0 %v1239_v12  ;;  %1186 = vmatprep.subr.bf16.mxu1 %v1285_v1  ;;  %v362_v39 = vsel %vm1441_vm5, %v357_v35, 0  ;;  %v355_v40 = vsel %vm1446_vm6, 0, %v350_v36  ;;  %v1270_v54 = vld [vmem:[%s1571_s4 + $0x90] sm:$0xff]   ;;  %v1272_v56 = vld [vmem:[%s1571_s4 + $0x8] sm:$0xff]   ;;  %v1274_v58 = vld [vmem:[%s1571_s4 + $0x40] sm:$0xff]  }
  0x1b   : > { %1124 = vmatprep.subr.bf16.mxu0 %v1240_v13  ;;  %v1273_v57 = vld [vmem:[%s1571_s4 + $0x88] sm:$0xff]   ;;  %v1275_v59 = vld [vmem:[%s1571_s4] sm:$0xff]  }
  0x1c   : > { %v1276_v60 = vld [vmem:[%s1571_s4 + $0x80] sm:$0xff]  }
  0x1d   : > { %1187 = vmatpush3.bf16.msra.mxu1 %v1241_v14  ;;  %v1085_v4 = vld [vmem:[%s1569_s2] ss:$0 sm:$0xff] }
  0x1e   : > { %1125 = vmatpush3.bf16.msra.mxu0 %v1242_v15  ;;  %1188 = vmatprep.subr.bf16.mxu1 %v1285_v1  ;;  %v1111_v27 = vld [vmem:[%s1572_s5] ss:$0 sm:$0xff] }
  0x1f   : > { %1126 = vmatprep.subr.bf16.mxu0 %v1243_v16  ;;  %v1112_v29 = vld [vmem:[%s1573_s6] ss:$0 sm:$0xff] }
  0x21   : > { %1189 = vmatpush3.bf16.msra.mxu1 %v1244_v17 }
  0x22   : > { %1127 = vmatpush3.bf16.msra.mxu0 %v1245_v18  ;;  %1190 = vmatprep.subr.bf16.mxu1 %v1285_v1 }
  0x23   : > { %1128 = vmatprep.subr.bf16.mxu0 %v1246_v19 }
  0x25   : > { %1191 = vmatpush3.bf16.msra.mxu1 %v1247_v20 }
  0x26   : > { %1129 = vmatpush3.bf16.msra.mxu0 %v1248_v21  ;;  %1192 = vmatprep.subr.bf16.mxu1 %v1285_v1 }
  0x27   : > { %1130 = vmatprep.subr.bf16.mxu0 %v1249_v23 }
  0x29   : > { %1193 = vmatpush3.bf16.msra.mxu1 %v1250_v25 }
  0x2a   : > { %1131 = vmatpush3.bf16.msra.mxu0 %v1251_v26  ;;  %1198 = vmatprep.subr.bf16.mxu1 %v1285_v1 }
  0x2b   : > { %1147 = vmatprep.subr.bf16.mxu0 %v1253_v33 }
  0x2c   : > { %1195 = vmatmul.mubr.bf16.vlgmr.msra.gmra.mxu1 %v362_v39 }
  0x2d   : > { %589 = vmatmul.mubr.bf16.vlgmr.msra.gmra.mxu0 %v355_v40  ;;  %1199 = vmatpush3.bf16.msra.mxu1 %v1255_v37  ;;  %v1113_v37 = vld [vmem:[%s1574_s7] ss:$0 sm:$0xff] }
  0x2e   : > { %1148 = vmatpush3.bf16.msra.mxu0 %v1254_v34  ;;  %1200 = vmatprep.subr.bf16.mxu1 %v1285_v1  ;;  %v363_v34 = vunpack.c.l.bf16 %v1427_v22 }
  0x2f   : > { %1149 = vmatprep.subr.bf16.mxu0 %v1256_v38  ;;  %1214 = vmatprep.mubr.msk.bf16.mxu1 %vm1286_vm0, %v1285_v1 }
  0x31   : > { %1201 = vmatpush3.bf16.msra.mxu1 %v1258_v41 }
  0x32   : > { %1150 = vmatpush3.bf16.msra.mxu0 %v1257_v42  ;;  %1202 = vmatprep.subr.bf16.mxu1 %v1285_v1 }
  0x33   : > { %1151 = vmatprep.subr.bf16.mxu0 %v1259_v43 }
  0x35   : > { %1203 = vmatpush3.bf16.msra.mxu1 %v1261_v45 }
  0x36   : > { %1152 = vmatpush3.bf16.msra.mxu0 %v1260_v44  ;;  %1204 = vmatprep.subr.bf16.mxu1 %v1285_v1 }
  0x37   : > { %1153 = vmatprep.subr.bf16.mxu0 %v1262_v46 }
  0x39   : > { %1205 = vmatpush3.bf16.msra.mxu1 %v1264_v48 }
  0x3a   : > { %1154 = vmatpush3.bf16.msra.mxu0 %v1263_v47  ;;  %1206 = vmatprep.subr.bf16.mxu1 %v1285_v1 }
  0x3b   : > { %1155 = vmatprep.subr.bf16.mxu0 %v1265_v49 }
  0x3d   : > { %1207 = vmatpush3.bf16.msra.mxu1 %v1267_v51 }
  0x3e   : > { %1156 = vmatpush3.bf16.msra.mxu0 %v1266_v50  ;;  %1208 = vmatprep.subr.bf16.mxu1 %v1285_v1 }
  0x3f   : > { %1157 = vmatprep.subr.bf16.mxu0 %v1268_v52 }
  0x41   : > { %1209 = vmatpush3.bf16.msra.mxu1 %v1270_v54 }
  0x42   : > { %1158 = vmatpush3.bf16.msra.mxu0 %v1269_v53  ;;  %1210 = vmatprep.subr.bf16.mxu1 %v1285_v1 }
  0x43   : > { %1159 = vmatprep.subr.bf16.mxu0 %v1271_v55 }
  0x45   : > { %1211 = vmatpush3.bf16.msra.mxu1 %v1273_v57 }
  0x46   : > { %1160 = vmatpush3.bf16.msra.mxu0 %v1272_v56  ;;  %1212 = vmatprep.subr.bf16.mxu1 %v1285_v1  ;;  %v1086_v1 = vld [vmem:[%s1570_s3] ss:$0 sm:$0xff] }
  0x47   : > { %1161 = vmatprep.subr.bf16.mxu0 %v1274_v58 }
  0x49   : > { %1213 = vmatpush3.bf16.msra.mxu1 %v1276_v60 }
  0x4a   : > { %1162 = vmatpush3.bf16.msra.mxu0 %v1275_v59 }
  0xec   : > { %v630_v61 = vpop.f32.mrf.mxu1 }
  0xed   : > { %v1132_v62 = vpop.f32.mrf.mxu0 }
  0xee   : > { %v1196_v63 = vpop.f32.mrf.mxu1 }
  0xef   : > { %v1133_v0 = vpop.f32.mrf.mxu0 }
  0xf0   : > { %v1134_v2 = vadd.f32 %v1133_v0, %v1132_v62  ;;  %v633_v3 = vpop.f32.mrf.mxu1 }
  0xf1   : > { %v1135_v5 = vpop.f32.mrf.mxu0 }
  0xf2   : > { %v631_v6 = vadd.f32 %v1134_v2, %v630_v61  ;;  %v1197_v7 = vpop.f32.mrf.mxu1 }
  0xf3   : > { %v1136_v8 = vpop.f32.mrf.mxu0 }
  0xf4   : > { %v643_v9 = vmul.f32 %v1085_v4, %v631_v6 }
  0xf6   : > { %v651_v10 = vadd.f32 %v1086_v1, %v643_v9 }
  0xf8   : > { %v652_v11 = vmax.f32 %v651_v10, 0.0 }
  0xfa   : > { %v653_v12 = vpack.c.bf16 %v652_v11, %v652_v11 }
  0xfc   : > { %v655_v13 = vshrl.u32 %v653_v12, 16  ;;  %891 = vmatprep.mubr.bf16.mxu0 %v653_v12  ;;  %v658_v14 = vshll.u32 %v653_v12, 16 }
  0xfe   : > { %v657_v15 = vrot.slane %v655_v13, 7  ;;  %v663_v16 = vrot.slane %v658_v14, 1 }
 0x100   : > { %v660_v17 = vor.u32 %v658_v14, %v657_v15  ;;  %v664_v18 = vor.u32 %v663_v16, %v655_v13 }
 0x102   : > { %v662_v19 = vsel %vm1446_vm6, 0, %v660_v17  ;;  %v666_v20 = vsel %vm1441_vm5, %v664_v18, 0 }
 0x103   : > { %892 = vmatmul.mubr.bf16.vlgmr.msra.gmra.mxu0 %v662_v19  ;;  %1215 = vmatmul.mubr.bf16.vlgmr.msra.gmra.mxu1 %v666_v20 }
 0x1c3   : > { %v1163_v21 = vpop.f32.mrf.mxu0  ;;  %v933_v23 = vpop.f32.mrf.mxu1 }
 0x1c5   : > { %v1164_v24 = vpop.f32.mrf.mxu0  ;;  %v1216_v25 = vpop.f32.mrf.mxu1 }
 0x1c6   : > { %v1165_v26 = vadd.f32 %v1164_v24, %v1163_v21 }
 0x1c7   : > { %v1166_v28 = vpop.f32.mrf.mxu0  ;;  %v936_v30 = vpop.f32.mrf.mxu1 }
 0x1c8   : > { %v934_v31 = vadd.f32 %v1165_v26, %v933_v23 }
 0x1c9   : > { %v1167_v32 = vpop.f32.mrf.mxu0  ;;  %v1217_v33 = vpop.f32.mrf.mxu1 }
 0x1ca   : > { %v946_v35 = vmul.f32 %v1111_v27, %v934_v31 }
 0x1cc   : > { %v954_v36 = vadd.f32 %v1112_v29, %v946_v35 }
 0x1ce   : > { %v955_v38 = vadd.f32 %v954_v36, %v363_v34 }
 0x1d0   : > { %v956_v39 = vpack.c.bf16 %v955_v38, %v955_v38  ;;  %v965_v40 = vmul.f32 %v1113_v37, %v955_v38 }
 0x1d2   : > { %957 = vst [vmem:[%s338_s28] sm:$0xf] %v956_v39  ;;  %v966_v41 = vpack.c.bf16 %v965_v40, %v965_v40 }
 0x1d4   : > { %967 = vst [vmem:[%s334_s10] sm:$0xf] %v966_v41 }
 0x1d5 PF: > { %s20_s30 = sadd.s32 1, %s1283_s30  }
 0x1d6   : > { %p17_p4 = scmp.ge.s32.totalorder %s20_s30, 4  }
 0x1d8   :  { %19 = sbr.rel (!%p17_p4) target bundleno = 1 (0x1), region = 94 }

// kernel: cifar_resnet_forward.12
= control target key start
LH: loop header
LB: loop body
LE: loop exit
PB: predicated region body
PF: predicated region fallthrough
CT: control target
= control target key end

     0   :  { %s1526_s13 = smov 0   ;;  %s1779_s0 = inlined_call_operand.vmem [shape: bf16[2,4,256], index: 0, kind: input, shape index: {}]   ;;  %s1780_s1 = inlined_call_operand.vmem [shape: bf16[384,128], index: 1, kind: input, shape index: {}]   ;;  %s1781_s2 = inlined_call_operand.vmem [shape: f32[1,128], index: 2, kind: input, shape index: {}]   ;;  %s1782_s3 = inlined_call_operand.vmem [shape: f32[1,128], index: 3, kind: input, shape index: {}]   ;;  %s1783_s4 = inlined_call_operand.vmem [shape: bf16[384,128], index: 4, kind: input, shape index: {}]   ;;  %s1784_s5 = inlined_call_operand.vmem [shape: f32[1,128], index: 5, kind: input, shape index: {}]   ;;  %s1785_s6 = inlined_call_operand.vmem [shape: f32[1,128], index: 6, kind: input, shape index: {}]   ;;  %s1786_s7 = inlined_call_operand.vmem [shape: bf16[128,128], index: 7, kind: input, shape index: {}]   ;;  %s1787_s8 = inlined_call_operand.vmem [shape: f32[1,128], index: 8, kind: input, shape index: {}]   ;;  %s1788_s9 = inlined_call_operand.vmem [shape: bf16[2,4,128], index: 9, kind: output, shape index: {0}]   ;;  %s1789_s10 = inlined_call_operand.vmem [shape: bf16[2,4,128], index: 10, kind: output, shape index: {1}]  }
   0x1 LB: > { %s1189_s14 = sadd.s32 4294967295, %s1466_s13   ;;  %p1193_p0 = scmp.ge.s32.totalorder %s1466_s13, 1  ;;  %s1466_s13 = sphi %s1526_s13, %s21_s13  }
   0x2   : > { %p315_p1 = scmp.lt.s32.totalorder %s1466_s13, 3 }
   0x4   : > { %p316_p2 = pnand %p1193_p0, %p315_p1 }
   0x5   : > { %p356_p3 = scmp.lt.s32.totalorder (!%p316_p2), %s1189_s14, 1 }
   0x6   : > { %319 = sbr.rel (%p316_p2) target bundleno = 492 (0x1ec), region = 56 }
   0xb   : > { %v1404_v0 = vld [vmem:[%s1780_s1 + $0x78] sm:$0xff]   ;;  %v1468_v1 = vmov 0.0   ;;  %vm1469_vm0 = vmmov 0   ;;  %v1407_v4 = vld [vmem:[%s1780_s1 + $0x70] sm:$0xff]   ;;  %v1410_v7 = vld [vmem:[%s1780_s1 + $0x68] sm:$0xff]   ;;  %s1793_s14 = smov (!%p356_p3, %s1189_s14), 1  ;;  %v375_v20 = vlaneseq }
   0xc   : > { %1333 = vmatprep.subr.bf16.mxu1 %v1468_v1  ;;  %v1405_v2 = vld [vmem:[%s1780_s1 + $0xb8] sm:$0xff]   ;;  %1262 = vmatprep.subr.bf16.mxu0 %v1404_v0  ;;  %v1408_v5 = vld [vmem:[%s1780_s1 + $0xb0] sm:$0xff]   ;;  %v1411_v8 = vld [vmem:[%s1780_s1 + $0xa8] sm:$0xff]   ;;  %s1261_s17 = sshll.u32 %s1793_s14, 2  ;;  %v1470_v24 = vmov 1983009808  }
   0xd   : > { %v1406_v3 = vld [vmem:[%s1780_s1 + $0x38] sm:$0xff]   ;;  %1349 = vmatprep.mubr.msk.bf16.mxu1 %vm1469_vm0, %v1468_v1  ;;  %1334 = vmatpush3.bf16.msra.mxu1 %v1405_v2  ;;  %v1409_v6 = vld [vmem:[%s1780_s1 + $0x30] sm:$0xff]   ;;  %v1412_v9 = vld [vmem:[%s1780_s1 + $0x28] sm:$0xff]   ;;  %s360_s26 = scalar_lea.vmem %s1779_s0, %s1261_s17  ;;  %v373_v25 = vunpack.c.l.s4 %v1470_v24  ;;  %v376_v26 = vshrl.u32 %v375_v20, 7  ;;  %vm389_vm1 = vsmask.f32 256 }
   0xe   : > { %1263 = vmatpush3.bf16.msra.mxu0 %v1406_v3  ;;  %1335 = vmatprep.subr.bf16.mxu1 %v1468_v1  ;;  %v1413_v10 = vld [vmem:[%s1780_s1 + $0x60] sm:$0xff]   ;;  %v1416_v13 = vld [vmem:[%s1780_s1 + $0x58] sm:$0xff]   ;;  %v1419_v16 = vld [vmem:[%s1780_s1 + $0x50] sm:$0xff]   ;;  %vm388_vm2 = vcmask 1040384   ;;  %vm696_vm4 = vcmask 1041408   ;;  %s1196_s11 = sshll.u32 %s1793_s14, 1 }
   0xf   : > { %1264 = vmatprep.subr.bf16.mxu0 %v1407_v4  ;;  %v1414_v11 = vld [vmem:[%s1780_s1 + $0xa0] sm:$0xff]   ;;  %v1417_v14 = vld [vmem:[%s1780_s1 + $0x98] sm:$0xff]   ;;  %v1420_v17 = vld [vmem:[%s1780_s1 + $0x90] sm:$0xff]   ;;  %v374_v29 = vunpack.c.0.s8 %v373_v25  ;;  %vm697_vm5 = vsmask.f32 1280  ;;  %s368_s18 = scalar_lea.vmem %s1789_s10, %s1196_s11  ;;  %s364_s21 = scalar_lea.vmem %s1788_s9, %s1196_s11 }
  0x10   : > { %v1415_v12 = vld [vmem:[%s1780_s1 + $0x20] sm:$0xff]   ;;  %v1418_v15 = vld [vmem:[%s1780_s1 + $0x18] sm:$0xff]   ;;  %v1421_v18 = vld [vmem:[%s1780_s1 + $0x10] sm:$0xff]  }
  0x11   : > { %1336 = vmatpush3.bf16.msra.mxu1 %v1408_v5  ;;  %v1422_v19 = vld [vmem:[%s1780_s1 + $0x48] sm:$0xff]   ;;  %v1425_v23 = vld [vmem:[%s1780_s1 + $0x40] sm:$0xff]   ;;  %v377_v31 = vsub.s32 %v374_v29, %v376_v26  ;;  %v1428_v32 = vld [vmem:[%s1783_s4 + $0x78] sm:$0xff]  }
  0x12   : > { %1265 = vmatpush3.bf16.msra.mxu0 %v1409_v6  ;;  %1337 = vmatprep.subr.bf16.mxu1 %v1468_v1  ;;  %v1423_v21 = vld [vmem:[%s1780_s1 + $0x88] sm:$0xff]   ;;  %v1426_v27 = vld [vmem:[%s1780_s1 + $0x80] sm:$0xff]   ;;  %v1430_v34 = vld [vmem:[%s1783_s4 + $0xb8] sm:$0xff]  }
  0x13   : > { %1266 = vmatprep.subr.bf16.mxu0 %v1410_v7  ;;  %v1424_v22 = vld [vmem:[%s1780_s1 + $0x8] sm:$0xff]   ;;  %v1427_v28 = vld [vmem:[%s1780_s1] sm:$0xff]   ;;  %v1433_v36 = vld [vmem:[%s1783_s4 + $0xb0] sm:$0xff]  }
  0x14   : > { %v1626_v30 = vld [vmem:[%s360_s26] sm:$0xf]  ;;  %vm1639_vm3 = vmand %vm388_vm2, %vm389_vm1  ;;  %v1429_v41 = vld [vmem:[%s1783_s4 + $0x38] sm:$0xff]  }
  0x15   : > { %1338 = vmatpush3.bf16.msra.mxu1 %v1411_v8  ;;  %v378_v33 = vrot.slane %v1626_v30, %v377_v31  ;;  %v1431_v42 = vld [vmem:[%s1783_s4 + $0x70] sm:$0xff]   ;;  %v1434_v46 = vld [vmem:[%s1783_s4 + $0x68] sm:$0xff]   ;;  %v1437_v49 = vld [vmem:[%s1783_s4 + $0x60] sm:$0xff]  }
  0x16   : > { %1267 = vmatpush3.bf16.msra.mxu0 %v1412_v9  ;;  %1339 = vmatprep.subr.bf16.mxu1 %v1468_v1  ;;  %v1432_v45 = vld [vmem:[%s1783_s4 + $0x30] sm:$0xff]   ;;  %v1435_v47 = vld [vmem:[%s1783_s4 + $0x28] sm:$0xff]   ;;  %v1438_v50 = vld [vmem:[%s1783_s4 + $0x20] sm:$0xff]  }
  0x17   : > { %1268 = vmatprep.subr.bf16.mxu0 %v1413_v10  ;;  %v379_v35 = vcombine.high %v378_v33, %v378_v33  ;;  %618 = vmatprep.mubr.bf16.mxu0 %v378_v33  ;;  %v1436_v48 = vld [vmem:[%s1783_s4 + $0xa8] sm:$0xff]   ;;  %v1439_v51 = vld [vmem:[%s1783_s4 + $0xa0] sm:$0xff]   ;;  %v1440_v52 = vld [vmem:[%s1783_s4 + $0x58] sm:$0xff]  }
  0x18   : > { %v1441_v53 = vld [vmem:[%s1783_s4 + $0x18] sm:$0xff]   ;;  %v1443_v55 = vld [vmem:[%s1783_s4 + $0x50] sm:$0xff]   ;;  %v1446_v58 = vld [vmem:[%s1783_s4 + $0x48] sm:$0xff]  }
  0x19   : > { %1340 = vmatpush3.bf16.msra.mxu1 %v1414_v11  ;;  %v381_v37 = vshrl.u32 %v379_v35, 16  ;;  %v384_v38 = vshll.u32 %v379_v35, 16  ;;  %v1442_v54 = vld [vmem:[%s1783_s4 + $0x98] sm:$0xff]   ;;  %v1444_v56 = vld [vmem:[%s1783_s4 + $0x10] sm:$0xff]   ;;  %v1447_v59 = vld [vmem:[%s1783_s4 + $0x8] sm:$0xff]  }
  0x1a   : > { %1269 = vmatpush3.bf16.msra.mxu0 %v1415_v12  ;;  %1341 = vmatprep.subr.bf16.mxu1 %v1468_v1  ;;  %v1445_v57 = vld [vmem:[%s1783_s4 + $0x90] sm:$0xff]   ;;  %v1448_v60 = vld [vmem:[%s1783_s4 + $0x88] sm:$0xff]   ;;  %v1449_v61 = vld [vmem:[%s1783_s4 + $0x40] sm:$0xff]  }
  0x1b   : > { %1270 = vmatprep.subr.bf16.mxu0 %v1416_v13  ;;  %v383_v40 = vrot.slane %v381_v37, 7  ;;  %v1450_v62 = vld [vmem:[%s1783_s4] sm:$0xff]   ;;  %vm698_vm6 = vmand %vm696_vm4, %vm697_vm5  ;;  %v1453_v26 = vld [vmem:[%s1786_s7 + $0x30] sm:$0xff]  }
  0x1c   : > { %v1451_v63 = vld [vmem:[%s1783_s4 + $0x80] sm:$0xff]   ;;  %v1456_v29 = vld [vmem:[%s1786_s7 + $0x18] sm:$0xff]   ;;  %v1457_v31 = vld [vmem:[%s1786_s7 + $0x10] sm:$0xff]  }
  0x1d   : > { %1342 = vmatpush3.bf16.msra.mxu1 %v1417_v14  ;;  %v386_v43 = vor.u32 %v384_v38, %v383_v40  ;;  %v1222_v8 = vld [vmem:[%s1781_s2] ss:$0 sm:$0xff] }
  0x1e   : > { %1271 = vmatpush3.bf16.msra.mxu0 %v1418_v15  ;;  %1343 = vmatprep.subr.bf16.mxu1 %v1468_v1  ;;  %v1223_v12 = vld [vmem:[%s1782_s3] ss:$0 sm:$0xff] }
  0x1f   : > { %1272 = vmatprep.subr.bf16.mxu0 %v1419_v16  ;;  %v391_v44 = vsel %vm1639_vm3, 0, %v386_v43  ;;  %v1459_v33 = vld [vmem:[%s1786_s7] sm:$0xff]  }
  0x21   : > { %1344 = vmatpush3.bf16.msra.mxu1 %v1420_v17 }
  0x22   : > { %1273 = vmatpush3.bf16.msra.mxu0 %v1421_v18  ;;  %1345 = vmatprep.subr.bf16.mxu1 %v1468_v1 }
  0x23   : > { %1274 = vmatprep.subr.bf16.mxu0 %v1422_v19 }
  0x25   : > { %1346 = vmatpush3.bf16.msra.mxu1 %v1423_v21 }
  0x26   : > { %1275 = vmatpush3.bf16.msra.mxu0 %v1424_v22  ;;  %1347 = vmatprep.subr.bf16.mxu1 %v1468_v1 }
  0x27   : > { %1276 = vmatprep.subr.bf16.mxu0 %v1425_v23  ;;  %v1452_v23 = vld [vmem:[%s1786_s7 + $0x38] sm:$0xff]  }
  0x29   : > { %1348 = vmatpush3.bf16.msra.mxu1 %v1426_v27  ;;  %v1454_v27 = vld [vmem:[%s1786_s7 + $0x28] sm:$0xff]  }
  0x2a   : > { %1277 = vmatpush3.bf16.msra.mxu0 %v1427_v28  ;;  %1353 = vmatprep.subr.bf16.mxu1 %v1468_v1  ;;  %v1455_v28 = vld [vmem:[%s1786_s7 + $0x20] sm:$0xff]  }
  0x2b   : > { %1293 = vmatprep.subr.bf16.mxu0 %v1428_v32  ;;  %v1458_v32 = vld [vmem:[%s1786_s7 + $0x8] sm:$0xff]  }
  0x2c   : > { %1350 = vmatmul.mubr.bf16.vlgmr.msra.gmra.mxu1 %v379_v35 }
  0x2d   : > { %1354 = vmatpush3.bf16.msra.mxu1 %v1430_v34  ;;  %1369 = vmatprep.mubr.msk.bf16.mxu1 %vm1469_vm0, %v1468_v1 }
  0x2e   : > { %1355 = vmatprep.subr.bf16.mxu1 %v1468_v1  ;;  %619 = vmatmul.mubr.bf16.vlgmr.msra.gmra.mxu0 %v391_v44  ;;  %v1248_v44 = vld [vmem:[%s1784_s5] ss:$0 sm:$0xff] }
  0x2f   : > { %1294 = vmatpush3.bf16.msra.mxu0 %v1429_v41 }
  0x30   : > { %1295 = vmatprep.subr.bf16.mxu0 %v1431_v42 }
  0x31   : > { %1356 = vmatpush3.bf16.msra.mxu1 %v1433_v36 }
  0x32   : > { %1357 = vmatprep.subr.bf16.mxu1 %v1468_v1 }
  0x33   : > { %1296 = vmatpush3.bf16.msra.mxu0 %v1432_v45 }
  0x34   : > { %1297 = vmatprep.subr.bf16.mxu0 %v1434_v46 }
  0x35   : > { %1358 = vmatpush3.bf16.msra.mxu1 %v1436_v48 }
  0x36   : > { %1359 = vmatprep.subr.bf16.mxu1 %v1468_v1 }
  0x37   : > { %1298 = vmatpush3.bf16.msra.mxu0 %v1435_v47  ;;  %v1258_v47 = vld [vmem:[%s1787_s8] ss:$0 sm:$0xff] }
  0x38   : > { %1299 = vmatprep.subr.bf16.mxu0 %v1437_v49 }
  0x39   : > { %1360 = vmatpush3.bf16.msra.mxu1 %v1439_v51 }
  0x3a   : > { %1361 = vmatprep.subr.bf16.mxu1 %v1468_v1 }
  0x3b   : > { %1300 = vmatpush3.bf16.msra.mxu0 %v1438_v50 }
  0x3c   : > { %1301 = vmatprep.subr.bf16.mxu0 %v1440_v52 }
  0x3d   : > { %1362 = vmatpush3.bf16.msra.mxu1 %v1442_v54 }
  0x3e   : > { %1363 = vmatprep.subr.bf16.mxu1 %v1468_v1 }
  0x3f   : > { %1302 = vmatpush3.bf16.msra.mxu0 %v1441_v53 }
  0x40   : > { %1303 = vmatprep.subr.bf16.mxu0 %v1443_v55 }
  0x41   : > { %1364 = vmatpush3.bf16.msra.mxu1 %v1445_v57 }
  0x42   : > { %1365 = vmatprep.subr.bf16.mxu1 %v1468_v1 }
  0x43   : > { %1304 = vmatpush3.bf16.msra.mxu0 %v1444_v56 }
  0x44   : > { %1305 = vmatprep.subr.bf16.mxu0 %v1446_v58 }
  0x45   : > { %1366 = vmatpush3.bf16.msra.mxu1 %v1448_v60 }
  0x46   : > { %1367 = vmatprep.subr.bf16.mxu1 %v1468_v1 }
  0x47   : > { %1306 = vmatpush3.bf16.msra.mxu0 %v1447_v59 }
  0x48   : > { %1307 = vmatprep.subr.bf16.mxu0 %v1449_v61 }
  0x49   : > { %1368 = vmatpush3.bf16.msra.mxu1 %v1451_v63 }
  0x4b   : > { %1308 = vmatpush3.bf16.msra.mxu0 %v1450_v62 }
  0x4c   : > { %1373 = vmatprep.subr.bf16.mxu0 %v1468_v1 }
  0xec   : > { %v660_v0 = vpop.f32.mrf.mxu1 }
  0xee   : > { %v1351_v2 = vpop.f32.mrf.mxu1  ;;  %v1278_v5 = vpop.f32.mrf.mxu0 }
  0xf0   : > { %v663_v3 = vpop.f32.mrf.mxu1  ;;  %v1279_v6 = vpop.f32.mrf.mxu0 }
  0xf1   : > { %v1280_v7 = vadd.f32 %v1279_v6, %v1278_v5 }
  0xf2   : > { %v1352_v4 = vpop.f32.mrf.mxu1  ;;  %v1281_v9 = vpop.f32.mrf.mxu0 }
  0xf3   : > { %v661_v10 = vadd.f32 %v1280_v7, %v660_v0 }
  0xf4   : > { %v1282_v11 = vpop.f32.mrf.mxu0 }
  0xf5   : > { %v673_v13 = vmul.f32 %v1222_v8, %v661_v10 }
  0xf7   : > { %v681_v14 = vadd.f32 %v1223_v12, %v673_v13 }
  0xf9   : > { %v682_v15 = vmax.f32 %v681_v14, 0.0 }
  0xfb   : > { %v683_v16 = vpack.c.bf16 %v682_v15, %v682_v15 }
  0xfd   : > { %v685_v17 = vshrl.u32 %v683_v16, 16  ;;  %924 = vmatprep.mubr.bf16.mxu0 %v683_v16  ;;  %v688_v18 = vshll.u32 %v683_v16, 16 }
  0xff   : > { %v687_v19 = vrot.slane %v685_v17, 7  ;;  %v693_v20 = vrot.slane %v688_v18, 1 }
 0x101   : > { %v690_v21 = vor.u32 %v688_v18, %v687_v19  ;;  %v694_v22 = vor.u32 %v693_v20, %v685_v17 }
 0x103   : > { %v692_v24 = vsel %vm1639_vm3, 0, %v690_v21  ;;  %v699_v25 = vsel %vm698_vm6, %v694_v22, 0 }
 0x104   : > { %925 = vmatmul.mubr.bf16.vlgmr.msra.gmra.mxu0 %v692_v24  ;;  %1370 = vmatmul.mubr.bf16.vlgmr.msra.gmra.mxu1 %v699_v25 }
 0x105   : > { %1374 = vmatpush3.bf16.msra.mxu0 %v1452_v23  ;;  %1389 = vmatprep.mubr.msk.bf16.mxu0 %vm1469_vm0, %v1468_v1 }
 0x106   : > { %1375 = vmatprep.subr.bf16.mxu0 %v1468_v1 }
 0x109   : > { %1376 = vmatpush3.bf16.msra.mxu0 %v1453_v26 }
 0x10a   : > { %1377 = vmatprep.subr.bf16.mxu0 %v1468_v1 }
 0x10d   : > { %1378 = vmatpush3.bf16.msra.mxu0 %v1454_v27 }
 0x10e   : > { %1379 = vmatprep.subr.bf16.mxu0 %v1468_v1 }
 0x111   : > { %1380 = vmatpush3.bf16.msra.mxu0 %v1455_v28 }
 0x112   : > { %1381 = vmatprep.subr.bf16.mxu0 %v1468_v1 }
 0x115   : > { %1382 = vmatpush3.bf16.msra.mxu0 %v1456_v29 }
 0x116   : > { %1383 = vmatprep.subr.bf16.mxu0 %v1468_v1 }
 0x119   : > { %1384 = vmatpush3.bf16.msra.mxu0 %v1457_v31 }
 0x11a   : > { %1385 = vmatprep.subr.bf16.mxu0 %v1468_v1 }
 0x11d   : > { %1386 = vmatpush3.bf16.msra.mxu0 %v1458_v32 }
 0x11e   : > { %1387 = vmatprep.subr.bf16.mxu0 %v1468_v1  ;;  %v1249_v1 = vld [vmem:[%s1785_s6] ss:$0 sm:$0xff] }
 0x121   : > { %1388 = vmatpush3.bf16.msra.mxu0 %v1459_v33 }
 0x124   : > { %1390 = vmatmul.mubr.bf16.vlgmr.msra.gmra.mxu0 %v1626_v30 }
 0x1c4   : > { %v1309_v34 = vpop.f32.mrf.mxu0  ;;  %v966_v35 = vpop.f32.mrf.mxu1 }
 0x1c6   : > { %v1310_v36 = vpop.f32.mrf.mxu0  ;;  %v1371_v37 = vpop.f32.mrf.mxu1 }
 0x1c7   : > { %v1311_v42 = vadd.f32 %v1310_v36, %v1309_v34 }
 0x1c8   : > { %v1312_v38 = vpop.f32.mrf.mxu0  ;;  %v969_v39 = vpop.f32.mrf.mxu1 }
 0x1c9   : > { %v967_v43 = vadd.f32 %v1311_v42, %v966_v35 }
 0x1ca   : > { %v1313_v40 = vpop.f32.mrf.mxu0  ;;  %v1372_v41 = vpop.f32.mrf.mxu1 }
 0x1cb   : > { %v979_v45 = vmul.f32 %v1248_v44, %v967_v43 }
 0x1cd   : > { %v987_v30 = vadd.f32 %v1249_v1, %v979_v45 }
 0x1e4   : > { %v1086_v46 = vpop.f32.mrf.mxu0 }
 0x1e5   : > { %v1092_v48 = vadd.f32 %v1086_v46, %v987_v30 }
 0x1e6   : > { %v1391_v49 = vpop.f32.mrf.mxu0 }
 0x1e7   : > { %v1093_v50 = vpack.c.bf16 %v1092_v48, %v1092_v48  ;;  %v1102_v51 = vmul.f32 %v1258_v47, %v1092_v48 }
 0x1e8   : > { %v1089_v52 = vpop.f32.mrf.mxu0 }
 0x1e9   : > { %1094 = vst [vmem:[%s368_s18] sm:$0x3] %v1093_v50  ;;  %v1103_v53 = vpack.c.bf16 %v1102_v51, %v1102_v51 }
 0x1ea   : > { %v1392_v54 = vpop.f32.mrf.mxu0 }
 0x1eb   : > { %1104 = vst [vmem:[%s364_s21] sm:$0x3] %v1103_v53 }
 0x1ec PF: > { %s21_s13 = sadd.s32 1, %s1466_s13  }
 0x1ed   : > { %p18_p4 = scmp.ge.s32.totalorder %s21_s13, 4  }
 0x1ef   :  { %20 = sbr.rel (!%p18_p4) target bundleno = 1 (0x1), region = 98 }

// kernel: cifar_resnet_forward.13
= control target key start
LH: loop header
LB: loop body
LE: loop exit
PB: predicated region body
PF: predicated region fallthrough
CT: control target
= control target key end

     0   :  { %s2338_s0 = inlined_call_operand.vmem [shape: bf16[2,4,128], index: 0, kind: input, shape index: {}]   ;;  %s2339_s1 = inlined_call_operand.vmem [shape: bf16[384,128], index: 1, kind: input, shape index: {}]   ;;  %s2340_s2 = inlined_call_operand.vmem [shape: f32[1,128], index: 2, kind: input, shape index: {}]   ;;  %s2341_s3 = inlined_call_operand.vmem [shape: f32[1,128], index: 3, kind: input, shape index: {}]   ;;  %s2342_s4 = inlined_call_operand.vmem [shape: bf16[384,128], index: 4, kind: input, shape index: {}]   ;;  %s2343_s5 = inlined_call_operand.vmem [shape: f32[1,128], index: 5, kind: input, shape index: {}]   ;;  %s2344_s6 = inlined_call_operand.vmem [shape: f32[1,128], index: 6, kind: input, shape index: {}]   ;;  %s2345_s7 = inlined_call_operand.vmem [shape: f32[1,128], index: 7, kind: input, shape index: {}]   ;;  %s2346_s8 = inlined_call_operand.vmem [shape: f32[128,32], index: 8, kind: input, shape index: {}]   ;;  %s2347_s9 = inlined_call_operand.vmem [shape: f32[1,32], index: 9, kind: input, shape index: {}]   ;;  %s2348_s10 = inlined_call_operand.vmem [shape: bf16[2,4,128], index: 10, kind: output, shape index: {0}]   ;;  %s2349_s11 = inlined_call_operand.hbm [shape: f32[2,1,32], index: 11, kind: output, shape index: {1}]   ;;  %s2350_s12 = inlined_call_operand.hbm [shape: f32[2,1,32], index: 12, kind: output, shape index: {2}]  }
   0x1   :  { %2353 = sst [smem:[#allocation10_spill]] %s2338_s0 }
   0x2   :  { %2354 = sst [smem:[#allocation11_spill]] %s2339_s1 }
   0x3   :  { %2355 = sst [smem:[#allocation12_spill]] %s2340_s2 }
   0x4   :  { %18 = vsyncpa [#allocation3], 0 }
   0x5   :  { %20 = vsyncpa [#allocation3 + $0x1], 0 }
   0x6   :  { %21 = vsyncpa [#allocation5], 0 }
   0x7   :  { %23 = vsyncpa [#allocation5 + $0x1], 0  ;;  %s1909_s21 = smov 0   ;;  %s1911_s22 = smov 0  }
   0x8   :  { %s1913_s23 = smov 0   ;;  %s1915_s24 = smov 0  }
   0x9 LB: > { %2356 = sst [smem:[#allocation8_spill]] %s1833_s23  ;;  %s1930_s25 = sadd.s32 4294967295, %s1837_s24   ;;  %s1837_s24 = sphi %s1915_s24, %s2372_s24   ;;  %s1833_s23 = sphi %s1913_s23, %s2369_s23   ;;  %s1829_s22 = sphi %s1911_s22, %s2371_s22   ;;  %s1825_s21 = sphi %s1909_s21, %s2370_s21  }
   0xa   : > { %s1383_s26 = sadd.s32 4294967294, %s1837_s24   ;;  %s1934_s27 = sadd.s32 1, %s1837_s24  }
   0xb   : > { %s277_s28 = sadd.s32 1, %s1833_s23  ;;  %s274_s29 = ssub.s32 %s1837_s24, %s1934_s27 }
   0xc   : > { %p287_p0 = scmp.ne.s32.totalorder %s1833_s23, %s1829_s22  ;;  %p275_p1 = scmp.eq.s32.totalorder %s274_s29, 0 }
   0xd   : > { %p288_p2 = scmp.eq.s32.totalorder %s1930_s25, 1  ;;  %p293_p3 = scmp.ne.s32.totalorder %s1829_s22, %s1825_s21 }
   0xe   : > { %p294_p4 = scmp.eq.s32.totalorder %s1383_s26, 1  ;;  %p1386_p7 = scmp.ge.s32.totalorder %s1837_s24, 1 }
   0xf   : > { %s1945_s30 = scalar_select %p275_p1, %s1833_s23, %s277_s28  }
  0x10   : > { %p1947_p5 = por %p288_p2, %p287_p0  ;;  %p1951_p6 = por %p294_p4, %p293_p3 }
  0x11   : > { %2357 = sst [smem:[#allocation9_spill]] %s1945_s30  ;;  %p372_p8 = scmp.lt.s32.totalorder %s1837_s24, 3 }
  0x13   : > { %p373_p9 = pnand %p1386_p7, %p372_p8 }
  0x14   : > { %s2360_s1 = sld [smem:[#allocation11_spill]] (!%p373_p9)  ;;  %p420_p10 = scmp.lt.s32.totalorder (!%p373_p9), %s1930_s25, 1 }
  0x15   : > { %376 = sbr.rel (%p373_p9) target bundleno = 726 (0x2d6), region = 60  ;;  %s2361_s0 = sld [smem:[#allocation10_spill]] (!%p373_p9) }
  0x16   : > { %s2366_s2 = sld [smem:[#allocation12_spill]] (!%p373_p9)  ;;  %s1442_s19 = sshll.u32 (!%p373_p9), %s1930_s25, 4 }
  0x1a   : > { %v1699_v0 = vld [vmem:[%s2360_s1 + $0x78] sm:$0xff]   ;;  %v1839_v1 = vmov 0.0   ;;  %vm1840_vm0 = vmmov 0   ;;  %v1702_v4 = vld [vmem:[%s2360_s1 + $0x70] sm:$0xff]   ;;  %v1705_v7 = vld [vmem:[%s2360_s1 + $0x68] sm:$0xff]   ;;  %s2004_s29 = scalar_select %p420_p10, %s1930_s25, 1  ;;  %v434_v20 = vlaneseq }
  0x1b   : > { %1542 = vmatprep.subr.bf16.mxu1 %v1839_v1  ;;  %v1700_v2 = vld [vmem:[%s2360_s1 + $0xb8] sm:$0xff]   ;;  %1446 = vmatprep.subr.bf16.mxu0 %v1699_v0  ;;  %v1703_v5 = vld [vmem:[%s2360_s1 + $0xb0] sm:$0xff]   ;;  %v1706_v8 = vld [vmem:[%s2360_s1 + $0xa8] sm:$0xff]   ;;  %v1841_v25 = vmov 1983009808   ;;  %vm453_vm1 = vcmask 1041408  }
  0x1c   : > { %v1701_v3 = vld [vmem:[%s2360_s1 + $0x38] sm:$0xff]   ;;  %1558 = vmatprep.mubr.msk.bf16.mxu1 %vm1840_vm0, %v1839_v1  ;;  %1543 = vmatpush3.bf16.msra.mxu1 %v1700_v2  ;;  %v1704_v6 = vld [vmem:[%s2360_s1 + $0x30] sm:$0xff]   ;;  %v1707_v9 = vld [vmem:[%s2360_s1 + $0x28] sm:$0xff]   ;;  %s2352_s26 = sshll.u32 %s2004_s29, 1  ;;  %v432_v26 = vunpack.c.l.s4 %v1841_v25  ;;  %v435_v27 = vshrl.u32 %v434_v20, 7  ;;  %vm446_vm3 = vcmask 1040384  }
  0x1d   : > { %1447 = vmatpush3.bf16.msra.mxu0 %v1701_v3  ;;  %1544 = vmatprep.subr.bf16.mxu1 %v1839_v1  ;;  %v1708_v10 = vld [vmem:[%s2360_s1 + $0x60] sm:$0xff]   ;;  %v1711_v13 = vld [vmem:[%s2360_s1 + $0x58] sm:$0xff]   ;;  %v1714_v16 = vld [vmem:[%s2360_s1 + $0x50] sm:$0xff]   ;;  %s423_s23 = scalar_lea.vmem %s2361_s0, %s2352_s26  ;;  %vm454_vm2 = vsmask.f32 1280  ;;  %vm1060_vm7 = vcmask 1043456  }
  0x1e   : > { %1448 = vmatprep.subr.bf16.mxu0 %v1702_v4  ;;  %v1709_v11 = vld [vmem:[%s2360_s1 + $0xa0] sm:$0xff]   ;;  %v1712_v14 = vld [vmem:[%s2360_s1 + $0x98] sm:$0xff]   ;;  %v1715_v17 = vld [vmem:[%s2360_s1 + $0x90] sm:$0xff]   ;;  %v433_v29 = vunpack.c.0.s8 %v432_v26  ;;  %vm447_vm4 = vsmask.f32 256  ;;  %s2367_s26 = sshll.u32 %s2004_s29, 1 }
  0x1f   : > { %v1710_v12 = vld [vmem:[%s2360_s1 + $0x20] sm:$0xff]   ;;  %v1713_v15 = vld [vmem:[%s2360_s1 + $0x18] sm:$0xff]   ;;  %v1716_v18 = vld [vmem:[%s2360_s1 + $0x10] sm:$0xff]   ;;  %s427_s18 = scalar_lea.vmem %s2348_s10, %s2367_s26  ;;  %s2257_s29 = sand.u32 1, %s1829_s22   ;;  %vm1236_vm8 = vcmask 253952  }
  0x20   : > { %1545 = vmatpush3.bf16.msra.mxu1 %v1703_v5  ;;  %v1717_v19 = vld [vmem:[%s2360_s1 + $0x48] sm:$0xff]   ;;  %v2039_v23 = vld [vmem:[%s423_s23] sm:$0x3]  ;;  %v436_v31 = vsub.s32 %v433_v29, %v435_v27  ;;  %v1723_v32 = vld [vmem:[%s2342_s4 + $0x78] sm:$0xff]   ;;  %s413_s30 = scalar_lea.vmem [#allocation2], %s2257_s29  ;;  %s419_s15 = scalar_lea.vmem [#allocation4], %s2257_s29 }
  0x21   : > { %1449 = vmatpush3.bf16.msra.mxu0 %v1704_v6  ;;  %1546 = vmatprep.subr.bf16.mxu1 %v1839_v1  ;;  %v1718_v21 = vld [vmem:[%s2360_s1 + $0x88] sm:$0xff]   ;;  %v1720_v24 = vld [vmem:[%s2360_s1 + $0x40] sm:$0xff]   ;;  %vm2057_vm5 = vmand %vm453_vm1, %vm454_vm2  ;;  %s1263_s28 = sshll.u32 %s413_s30, 4  ;;  %s1276_s26 = sshll.u32 %s419_s15, 4  ;;  %s2270_s28 = int_to_ptr.vmem [resolvable:$true] %s1263_s28  ;;  %s2277_s26 = int_to_ptr.vmem [resolvable:$true] %s1276_s26 }
  0x22   : > { %1450 = vmatprep.subr.bf16.mxu0 %v1705_v7  ;;  %v1719_v22 = vld [vmem:[%s2360_s1 + $0x8] sm:$0xff]   ;;  %682 = vmatprep.mubr.bf16.mxu0 %v2039_v23  ;;  %v1721_v28 = vld [vmem:[%s2360_s1 + $0x80] sm:$0xff]   ;;  %v437_v33 = vrot.slane %v2039_v23, %v436_v31  ;;  %vm2061_vm6 = vmand %vm446_vm3, %vm447_vm4  ;;  %s2275_s23 = scalar_lea.hbm %s2350_s12, %s1442_s19  ;;  %s1244_s16 = scalar_lea.sflag [#allocation3], %s2257_s29 }
  0x23   : > { %v1722_v30 = vld [vmem:[%s2360_s1] sm:$0xff]   ;;  %v1724_v40 = vld [vmem:[%s2342_s4 + $0x38] sm:$0xff]   ;;  %v1726_v42 = vld [vmem:[%s2342_s4 + $0x70] sm:$0xff]   ;;  %s1747_s17 = scalar_lea.vmem %s2270_s28, 16  ;;  %s1842_s0 = smov [#allocation2]  }
  0x24   : > { %1547 = vmatpush3.bf16.msra.mxu1 %v1706_v8  ;;  %v442_v34 = vshll.u32 %v437_v33, 16  ;;  %v439_v35 = vshrl.u32 %v437_v33, 16  ;;  %v1725_v41 = vld [vmem:[%s2342_s4 + $0xb8] sm:$0xff]   ;;  %v1727_v47 = vld [vmem:[%s2342_s4 + $0x30] sm:$0xff]   ;;  %v1729_v49 = vld [vmem:[%s2342_s4 + $0x68] sm:$0xff]   ;;  %p1748_p11 = scmp.ne.s32.totalorder %s2270_s28, %s1747_s17  ;;  %s1751_s1 = sshll.u32 %s1842_s0, 4  ;;  %s1752_s1 = int_to_ptr.vmem [resolvable:$false] %s1751_s1 }
  0x25   : > { %1451 = vmatpush3.bf16.msra.mxu0 %v1707_v9  ;;  %1548 = vmatprep.subr.bf16.mxu1 %v1839_v1  ;;  %v1728_v48 = vld [vmem:[%s2342_s4 + $0xb0] sm:$0xff]   ;;  %v1730_v50 = vld [vmem:[%s2342_s4 + $0x28] sm:$0xff]   ;;  %v1732_v52 = vld [vmem:[%s2342_s4 + $0x60] sm:$0xff]   ;;  %p1754_p0 = scmp.lt.s32.totalorder %s2270_s28, %s1752_s1 }
  0x26   : > { %1452 = vmatprep.subr.bf16.mxu0 %v1708_v10  ;;  %v450_v37 = vrot.slane %v442_v34, 1  ;;  %v441_v38 = vrot.slane %v439_v35, 7  ;;  %v1731_v51 = vld [vmem:[%s2342_s4 + $0xa8] sm:$0xff]   ;;  %v1733_v53 = vld [vmem:[%s2342_s4 + $0x20] sm:$0xff]   ;;  %v1735_v55 = vld [vmem:[%s2342_s4 + $0x58] sm:$0xff]   ;;  %p1749_p12 = pnand %p1748_p11, %p1947_p5 }
  0x27   : > { %v1734_v54 = vld [vmem:[%s2342_s4 + $0xa0] sm:$0xff]   ;;  %v1736_v56 = vld [vmem:[%s2342_s4 + $0x18] sm:$0xff]   ;;  %v1738_v58 = vld [vmem:[%s2342_s4 + $0x50] sm:$0xff]  }
  0x28   : > { %1549 = vmatpush3.bf16.msra.mxu1 %v1709_v11  ;;  %v451_v43 = vor.u32 %v450_v37, %v439_v35  ;;  %v444_v44 = vor.u32 %v442_v34, %v441_v38  ;;  %v1737_v57 = vld [vmem:[%s2342_s4 + $0x98] sm:$0xff]   ;;  %v1739_v59 = vld [vmem:[%s2342_s4 + $0x10] sm:$0xff]   ;;  %v1741_v61 = vld [vmem:[%s2342_s4 + $0x48] sm:$0xff]   ;;  %p1750_p13 = pneg %p1749_p12 }
  0x29   : > { %1453 = vmatpush3.bf16.msra.mxu0 %v1710_v12  ;;  %1550 = vmatprep.subr.bf16.mxu1 %v1839_v1  ;;  %v1740_v60 = vld [vmem:[%s2342_s4 + $0x90] sm:$0xff]   ;;  %v1742_v62 = vld [vmem:[%s2342_s4 + $0x8] sm:$0xff]   ;;  %v1744_v0 = vld [vmem:[%s2342_s4 + $0x40] sm:$0xff]  }
  0x2a   : > { %1454 = vmatprep.subr.bf16.mxu0 %v1711_v13  ;;  %v456_v45 = vsel %vm2057_vm5, %v451_v43, 0  ;;  %v449_v46 = vsel %vm2061_vm6, 0, %v444_v44  ;;  %v1743_v63 = vld [vmem:[%s2342_s4 + $0x88] sm:$0xff]   ;;  %v1745_v2 = vld [vmem:[%s2342_s4] sm:$0xff]   ;;  %v1091_v27 = vld [vmem:[%s2346_s8 + $0x78] sm:$0xff] }
  0x2b   : > { %v1746_v3 = vld [vmem:[%s2342_s4 + $0x80] sm:$0xff]   ;;  %v1089_v31 = vld [vmem:[%s2346_s8 + $0x68] sm:$0xff]  ;;  %v1087_v33 = vld [vmem:[%s2346_s8 + $0x58] sm:$0xff] }
  0x2c   : > { %1551 = vmatpush3.bf16.msra.mxu1 %v1712_v14  ;;  %v1413_v9 = vld [vmem:[%s2366_s2] ss:$0 sm:$0xff]  ;;  %v1086_v34 = vld [vmem:[%s2346_s8 + $0x50] sm:$0xff]  ;;  %v1085_v35 = vld [vmem:[%s2346_s8 + $0x48] sm:$0xff]  ;;  %s1753_s2 = scalar_lea.vmem %s1752_s1, 32 }
  0x2d   : > { %1455 = vmatpush3.bf16.msra.mxu0 %v1713_v15  ;;  %1552 = vmatprep.subr.bf16.mxu1 %v1839_v1  ;;  %v1414_v15 = vld [vmem:[%s2341_s3] ss:$0 sm:$0xff]  ;;  %v1083_v37 = vld [vmem:[%s2346_s8 + $0x38] sm:$0xff]  ;;  %v1082_v38 = vld [vmem:[%s2346_s8 + $0x30] sm:$0xff]  ;;  %p1755_p1 = scmp.lt.s32.totalorder %s1753_s2, %s1747_s17 }
  0x2e   : > { %1456 = vmatprep.subr.bf16.mxu0 %v1714_v16  ;;  %v1084_v36 = vld [vmem:[%s2346_s8 + $0x40] sm:$0xff]  ;;  %v1081_v39 = vld [vmem:[%s2346_s8 + $0x28] sm:$0xff] }
  0x2f   : > { %v1077_v43 = vld [vmem:[%s2346_s8 + $0x8] sm:$0xff]  ;;  %v1076_v44 = vld [vmem:[%s2346_s8] sm:$0xff]  ;;  %p1756_p2 = por %p1755_p1, %p1754_p0 }
  0x30   : > { %1553 = vmatpush3.bf16.msra.mxu1 %v1715_v17 }
  0x31   : > { %1457 = vmatpush3.bf16.msra.mxu0 %v1716_v18  ;;  %1554 = vmatprep.subr.bf16.mxu1 %v1839_v1  ;;  %p1757_p3 = pnand %p1756_p2, %p1750_p13 }
  0x32   : > { %1458 = vmatprep.subr.bf16.mxu0 %v1717_v19 }
  0x34   : > { %1555 = vmatpush3.bf16.msra.mxu1 %v1718_v21 }
  0x35   : > { %1459 = vmatpush3.bf16.msra.mxu0 %v1719_v22  ;;  %1556 = vmatprep.subr.bf16.mxu1 %v1839_v1 }
  0x36   : > { %1460 = vmatprep.subr.bf16.mxu0 %v1720_v24 }
  0x38   : > { %1557 = vmatpush3.bf16.msra.mxu1 %v1721_v28 }
  0x39   : > { %1461 = vmatpush3.bf16.msra.mxu0 %v1722_v30  ;;  %1562 = vmatprep.subr.bf16.mxu1 %v1839_v1  ;;  %v1090_v30 = vld [vmem:[%s2346_s8 + $0x70] sm:$0xff] }
  0x3a   : > { %1477 = vmatprep.subr.bf16.mxu0 %v1723_v32  ;;  %v1088_v32 = vld [vmem:[%s2346_s8 + $0x60] sm:$0xff] }
  0x3b   : > { %1559 = vmatmul.mubr.bf16.vlgmr.msra.gmra.mxu1 %v456_v45 }
  0x3c   : > { %683 = vmatmul.mubr.bf16.vlgmr.msra.gmra.mxu0 %v449_v46  ;;  %1563 = vmatpush3.bf16.msra.mxu1 %v1725_v41  ;;  %v1079_v41 = vld [vmem:[%s2346_s8 + $0x18] sm:$0xff] }
  0x3d   : > { %1478 = vmatpush3.bf16.msra.mxu0 %v1724_v40  ;;  %1564 = vmatprep.subr.bf16.mxu1 %v1839_v1  ;;  %v1080_v40 = vld [vmem:[%s2346_s8 + $0x20] sm:$0xff] }
  0x3e   : > { %1479 = vmatprep.subr.bf16.mxu0 %v1726_v42  ;;  %1578 = vmatprep.mubr.msk.bf16.mxu1 %vm1840_vm0, %v1839_v1  ;;  %v1078_v42 = vld [vmem:[%s2346_s8 + $0x10] sm:$0xff] }
  0x40   : > { %1565 = vmatpush3.bf16.msra.mxu1 %v1728_v48 }
  0x41   : > { %1480 = vmatpush3.bf16.msra.mxu0 %v1727_v47  ;;  %1566 = vmatprep.subr.bf16.mxu1 %v1839_v1 }
  0x42   : > { %1481 = vmatprep.subr.bf16.mxu0 %v1729_v49 }
  0x44   : > { %1567 = vmatpush3.bf16.msra.mxu1 %v1731_v51 }
  0x45   : > { %1482 = vmatpush3.bf16.msra.mxu0 %v1730_v50  ;;  %1568 = vmatprep.subr.bf16.mxu1 %v1839_v1  ;;  %v1439_v50 = vld [vmem:[%s2343_s5] ss:$0 sm:$0xff] }
  0x46   : > { %1483 = vmatprep.subr.bf16.mxu0 %v1732_v52 }
  0x48   : > { %1569 = vmatpush3.bf16.msra.mxu1 %v1734_v54  ;;  %v1440_v54 = vld [vmem:[%s2344_s6] ss:$0 sm:$0xff] }
  0x49   : > { %1484 = vmatpush3.bf16.msra.mxu0 %v1733_v53  ;;  %1570 = vmatprep.subr.bf16.mxu1 %v1839_v1 }
  0x4a   : > { %1485 = vmatprep.subr.bf16.mxu0 %v1735_v55 }
  0x4c   : > { %1571 = vmatpush3.bf16.msra.mxu1 %v1737_v57 }
  0x4d   : > { %1486 = vmatpush3.bf16.msra.mxu0 %v1736_v56  ;;  %1572 = vmatprep.subr.bf16.mxu1 %v1839_v1  ;;  %v457_v56 = vunpack.c.l.bf16 %v2039_v23 }
  0x4e   : > { %1487 = vmatprep.subr.bf16.mxu0 %v1738_v58 }
  0x50   : > { %1573 = vmatpush3.bf16.msra.mxu1 %v1740_v60 }
  0x51   : > { %1488 = vmatpush3.bf16.msra.mxu0 %v1739_v59  ;;  %1574 = vmatprep.subr.bf16.mxu1 %v1839_v1  ;;  %v1441_v59 = vld [vmem:[%s2345_s7] ss:$0 sm:$0xff] }
  0x52   : > { %1489 = vmatprep.subr.bf16.mxu0 %v1741_v61 }
  0x54   : > { %1575 = vmatpush3.bf16.msra.mxu1 %v1743_v63 }
  0x55   : > { %1490 = vmatpush3.bf16.msra.mxu0 %v1742_v62  ;;  %1576 = vmatprep.subr.bf16.mxu1 %v1839_v1 }
  0x56   : > { %1491 = vmatprep.subr.bf16.mxu0 %v1744_v0 }
  0x58   : > { %1577 = vmatpush3.bf16.msra.mxu1 %v1746_v3 }
  0x59   : > { %1492 = vmatpush3.bf16.msra.mxu0 %v1745_v2  ;;  %1617 = vmatprep.subr.mxu1 %v1839_v1 }
  0x5a   : > { %1582 = vmatprep.subr.mxu0 %v1839_v1 }
  0xfb   : > { %v724_v4 = vpop.f32.mrf.mxu1 }
  0xfc   : > { %v1462_v5 = vpop.f32.mrf.mxu0 }
  0xfd   : > { %v1560_v6 = vpop.f32.mrf.mxu1 }
  0xfe   : > { %v1463_v7 = vpop.f32.mrf.mxu0 }
  0xff   : > { %v1464_v8 = vadd.f32 %v1463_v7, %v1462_v5  ;;  %v727_v10 = vpop.f32.mrf.mxu1 }
 0x100   : > { %v1465_v11 = vpop.f32.mrf.mxu0 }
 0x101   : > { %v725_v12 = vadd.f32 %v1464_v8, %v724_v4  ;;  %v1561_v13 = vpop.f32.mrf.mxu1 }
 0x102   : > { %v1466_v14 = vpop.f32.mrf.mxu0 }
 0x103   : > { %v737_v16 = vmul.f32 %v1413_v9, %v725_v12 }
 0x105   : > { %v745_v17 = vadd.f32 %v1414_v15, %v737_v16  ;;  %v1234_v15 = vld [vmem:[%s2347_s9] sm:$0x1] }
 0x107   : > { %v746_v18 = vmax.f32 %v745_v17, 0.0 }
 0x109   : > { %v747_v19 = vpack.c.bf16 %v746_v18, %v746_v18 }
 0x10b   : > { %v749_v20 = vshrl.u32 %v747_v19, 16  ;;  %985 = vmatprep.mubr.bf16.mxu0 %v747_v19  ;;  %v752_v21 = vshll.u32 %v747_v19, 16 }
 0x10d   : > { %v751_v22 = vrot.slane %v749_v20, 7  ;;  %v757_v24 = vrot.slane %v752_v21, 1 }
 0x10f   : > { %v754_v25 = vor.u32 %v752_v21, %v751_v22  ;;  %v758_v26 = vor.u32 %v757_v24, %v749_v20 }
 0x111   : > { %v756_v28 = vsel %vm2061_vm6, 0, %v754_v25  ;;  %v760_v29 = vsel %vm2057_vm5, %v758_v26, 0 }
 0x112   : > { %986 = vmatmul.mubr.bf16.vlgmr.msra.gmra.mxu0 %v756_v28  ;;  %1579 = vmatmul.mubr.bf16.vlgmr.msra.gmra.mxu1 %v760_v29 }
 0x113   : > { %1583 = vmatpush3.msra.mxu0 %v1091_v27  ;;  %1618 = vmatpush3.msra.mxu1 %v1091_v27 }
 0x114   : > { %1584 = vmatprep.subr.mxu0 %v1839_v1  ;;  %1619 = vmatprep.subr.mxu1 %v1839_v1 }
 0x115   : > { %1585 = vmatpush3.msra.mxu0 %v1090_v30  ;;  %1620 = vmatpush3.msra.mxu1 %v1090_v30 }
 0x116   : > { %1586 = vmatprep.subr.mxu0 %v1839_v1  ;;  %1621 = vmatprep.subr.mxu1 %v1839_v1 }
 0x117   : > { %1614 = vmatprep.mubr.msk.f32.mxu0 %vm1840_vm0, %v1839_v1  ;;  %1649 = vmatprep.mubr.msk.f32.mxu1 %vm1840_vm0, %v1839_v1 }
 0x118   : > { %1587 = vmatpush3.msra.mxu0 %v1089_v31  ;;  %1622 = vmatpush3.msra.mxu1 %v1089_v31 }
 0x119   : > { %1588 = vmatprep.subr.mxu0 %v1839_v1  ;;  %1623 = vmatprep.subr.mxu1 %v1839_v1 }
 0x11a   : > { %1589 = vmatpush3.msra.mxu0 %v1088_v32  ;;  %1624 = vmatpush3.msra.mxu1 %v1088_v32 }
 0x11b   : > { %1590 = vmatprep.subr.mxu0 %v1839_v1  ;;  %1625 = vmatprep.subr.mxu1 %v1839_v1 }
 0x11c   : > { %1591 = vmatpush3.msra.mxu0 %v1087_v33  ;;  %1626 = vmatpush3.msra.mxu1 %v1087_v33 }
 0x11d   : > { %1592 = vmatprep.subr.mxu0 %v1839_v1  ;;  %1627 = vmatprep.subr.mxu1 %v1839_v1 }
 0x11e   : > { %1593 = vmatpush3.msra.mxu0 %v1086_v34  ;;  %1628 = vmatpush3.msra.mxu1 %v1086_v34 }
 0x11f   : > { %1594 = vmatprep.subr.mxu0 %v1839_v1  ;;  %1629 = vmatprep.subr.mxu1 %v1839_v1 }
 0x120   : > { %1595 = vmatpush3.msra.mxu0 %v1085_v35  ;;  %1630 = vmatpush3.msra.mxu1 %v1085_v35 }
 0x121   : > { %1596 = vmatprep.subr.mxu0 %v1839_v1  ;;  %1631 = vmatprep.subr.mxu1 %v1839_v1 }
 0x122   : > { %1597 = vmatpush3.msra.mxu0 %v1084_v36  ;;  %1632 = vmatpush3.msra.mxu1 %v1084_v36 }
 0x123   : > { %1598 = vmatprep.subr.mxu0 %v1839_v1  ;;  %1633 = vmatprep.subr.mxu1 %v1839_v1 }
 0x124   : > { %1599 = vmatpush3.msra.mxu0 %v1083_v37  ;;  %1634 = vmatpush3.msra.mxu1 %v1083_v37 }
 0x125   : > { %1600 = vmatprep.subr.mxu0 %v1839_v1  ;;  %1635 = vmatprep.subr.mxu1 %v1839_v1 }
 0x126   : > { %1601 = vmatpush3.msra.mxu0 %v1082_v38  ;;  %1636 = vmatpush3.msra.mxu1 %v1082_v38 }
 0x127   : > { %1602 = vmatprep.subr.mxu0 %v1839_v1  ;;  %1637 = vmatprep.subr.mxu1 %v1839_v1 }
 0x128   : > { %1603 = vmatpush3.msra.mxu0 %v1081_v39  ;;  %1638 = vmatpush3.msra.mxu1 %v1081_v39 }
 0x129   : > { %1604 = vmatprep.subr.mxu0 %v1839_v1  ;;  %1639 = vmatprep.subr.mxu1 %v1839_v1 }
 0x12a   : > { %1605 = vmatpush3.msra.mxu0 %v1080_v40  ;;  %1640 = vmatpush3.msra.mxu1 %v1080_v40 }
 0x12b   : > { %1606 = vmatprep.subr.mxu0 %v1839_v1  ;;  %1641 = vmatprep.subr.mxu1 %v1839_v1 }
 0x12c   : > { %1607 = vmatpush3.msra.mxu0 %v1079_v41  ;;  %1642 = vmatpush3.msra.mxu1 %v1079_v41 }
 0x12d   : > { %1608 = vmatprep.subr.mxu0 %v1839_v1  ;;  %1643 = vmatprep.subr.mxu1 %v1839_v1 }
 0x12e   : > { %1609 = vmatpush3.msra.mxu0 %v1078_v42  ;;  %1644 = vmatpush3.msra.mxu1 %v1078_v42 }
 0x12f   : > { %1610 = vmatprep.subr.mxu0 %v1839_v1  ;;  %1645 = vmatprep.subr.mxu1 %v1839_v1 }
 0x130   : > { %1611 = vmatpush3.msra.mxu0 %v1077_v43  ;;  %1646 = vmatpush3.msra.mxu1 %v1077_v43 }
 0x131   : > { %1612 = vmatprep.subr.mxu0 %v1839_v1  ;;  %1647 = vmatprep.subr.mxu1 %v1839_v1 }
 0x132   : > { %1613 = vmatpush3.msra.mxu0 %v1076_v44  ;;  %1648 = vmatpush3.msra.mxu1 %v1076_v44 }
 0x1d2   : > { %v1493_v45 = vpop.f32.mrf.mxu0  ;;  %v1027_v46 = vpop.f32.mrf.mxu1 }
 0x1d4   : > { %v1494_v47 = vpop.f32.mrf.mxu0  ;;  %v1580_v48 = vpop.f32.mrf.mxu1 }
 0x1d5   : > { %v1495_v49 = vadd.f32 %v1494_v47, %v1493_v45 }
 0x1d6   : > { %v1496_v51 = vpop.f32.mrf.mxu0  ;;  %v1030_v52 = vpop.f32.mrf.mxu1 }
 0x1d7   : > { %v1028_v53 = vadd.f32 %v1495_v49, %v1027_v46 }
 0x1d8   : > { %v1497_v1 = vpop.f32.mrf.mxu0  ;;  %v1581_v55 = vpop.f32.mrf.mxu1 }
 0x1d9   : > { %v1040_v57 = vmul.f32 %v1439_v50, %v1028_v53 }
 0x1db   : > { %v1048_v58 = vadd.f32 %v1440_v54, %v1040_v57 }
 0x1dd   : > { %v1049_v60 = vadd.f32 %v1048_v58, %v457_v56 }
 0x1df   : > { %v1057_v61 = vmul.f32 %v1441_v59, %v1049_v60 }
 0x1e1   : > { %v1058_v62 = vpack.c.bf16 %v1057_v61, %v1057_v61  ;;  %v1061_v63 = vsel %vm1060_vm7, %v1057_v61, 0.0  ;;  %v1068_v0 = vmax.f32 %v1057_v61, 0.0 }
 0x1e2   : > { %v1062_v2 = vrot.slane %v1061_v63, 4 }
 0x1e3   : > { %1059 = vst [vmem:[%s427_s18] sm:$0x3] %v1058_v62  ;;  %v1069_v23 = vsel %vm1060_vm7, %v1068_v0, 0.0  ;;  %s2268_s18 = scalar_lea.hbm %s2349_s11, %s1442_s19 }
 0x1e4   : > { %v1063_v3 = vadd.f32 %v1062_v2, %v1061_v63  ;;  %v1070_v4 = vrot.slane %v1069_v23, 4 }
 0x1e6   : > { %v1064_v5 = vrot.slane %v1063_v3, 2  ;;  %v1071_v6 = vadd.f32 %v1070_v4, %v1069_v23 }
 0x1e8   : > { %v1065_v7 = vadd.f32 %v1064_v5, %v1063_v3  ;;  %v1072_v8 = vrot.slane %v1071_v6, 2 }
 0x1ea   : > { %v1066_v9 = vrot.slane %v1065_v7, 1  ;;  %v1073_v10 = vadd.f32 %v1072_v8, %v1071_v6 }
 0x1ec   : > { %v1067_v11 = vadd.f32 %v1066_v9, %v1065_v7  ;;  %v1074_v12 = vrot.slane %v1073_v10, 1 }
 0x1ee   : > { %1615 = vmatmul.mubr.f32.vlgmr.msra.gmra.mxu0 %v1067_v11  ;;  %v1075_v13 = vadd.f32 %v1074_v12, %v1073_v10 }
 0x1f0   : > { %1650 = vmatmul.mubr.f32.vlgmr.msra.gmra.mxu1 %v1075_v13 }
 0x2ae   : > { %v1158_v14 = vpop.f32.mrf.mxu0 }
 0x2af   : > { %v1162_v16 = vmul.f32 0.0625, %v1158_v14 }
 0x2b0   : > { %v1616_v17 = vpop.f32.mrf.mxu0  ;;  %v1229_v18 = vpop.f32.mrf.mxu1 }
 0x2b1   : > { %v1235_v19 = vmul.f32 %v1234_v15, %v1162_v16  ;;  %v1233_v20 = vmul.f32 0.0625, %v1229_v18 }
 0x2b2   : > { %v1651_v21 = vpop.f32.mrf.mxu1 }
 0x2b3   : > { %1237 = vst.msk [vmem:[%s413_s30] sm:$0x1] %vm1236_vm8, %v1235_v19  ;;  %1238 = vst.msk [vmem:[%s419_s15] sm:$0x1] %vm1236_vm8, %v1233_v20 }
 0x2b4   : > { %1760 = shalt.err (!%p1757_p3)
}
 0x2b5   : > { %s1761_s19 = scalar_lea.hbm %s2268_s18, 16  ;;  %s1765_s0 = scalar_lea.hbm %s2349_s11, 32 }
 0x2b6   : > { %p1762_p4 = scmp.ne.s32.totalorder %s2268_s18, %s1761_s19  ;;  %p1766_p9 = scmp.lt.s32.totalorder %s2268_s18, %s2349_s11 }
 0x2b7   : > { %p1767_p10 = scmp.lt.s32.totalorder %s1765_s0, %s1761_s19 }
 0x2b8   : > { %p1763_p7 = pnand %p1762_p4, %p1947_p5 }
 0x2b9   : > { %p1768_p11 = por %p1767_p10, %p1766_p9 }
 0x2ba   : > { %p1764_p8 = pneg %p1763_p7 }
 0x2bc   : > { %p1769_p12 = pnand %p1768_p11, %p1764_p8 }
 0x2be   : > { %1772 = shalt.err (!%p1769_p12)
}
 0x2bf   : > { %1652 = dma.vmem_to_hbm [thread:$0]  (%p1947_p5), %s2270_s28, 16, %s2268_s18, %s1244_s16  }
 0x2c0   : > { %s1248_s1 = scalar_lea.sflag [#allocation5], %s2257_s29  ;;  %s1773_s2 = scalar_lea.vmem %s2277_s26, 16 }
 0x2c1   : > { %p1774_p13 = scmp.ne.s32.totalorder %s2277_s26, %s1773_s2  ;;  %s1843_s17 = smov [#allocation4]  }
 0x2c2   : > { %s1777_s19 = sshll.u32 %s1843_s17, 4  ;;  %s1778_s19 = int_to_ptr.vmem [resolvable:$false] %s1777_s19 }
 0x2c3   : > { %p1775_p0 = pnand %p1774_p13, %p1947_p5  ;;  %s1779_s30 = scalar_lea.vmem %s1778_s19, 32 }
 0x2c4   : > { %p1780_p2 = scmp.lt.s32.totalorder %s2277_s26, %s1778_s19  ;;  %p1781_p3 = scmp.lt.s32.totalorder %s1779_s30, %s1773_s2 }
 0x2c5   : > { %p1776_p1 = pneg %p1775_p0 }
 0x2c6   : > { %p1782_p4 = por %p1781_p3, %p1780_p2 }
 0x2c8   : > { %p1783_p7 = pnand %p1782_p4, %p1776_p1 }
 0x2ca   : > { %1786 = shalt.err (!%p1783_p7)
}
 0x2cb   : > { %s1787_s28 = scalar_lea.hbm %s2275_s23, 16  ;;  %s1791_s16 = scalar_lea.hbm %s2350_s12, 32 }
 0x2cc   : > { %p1788_p8 = scmp.ne.s32.totalorder %s2275_s23, %s1787_s28  ;;  %p1792_p11 = scmp.lt.s32.totalorder %s2275_s23, %s2350_s12 }
 0x2cd   : > { %p1793_p12 = scmp.lt.s32.totalorder %s1791_s16, %s1787_s28 }
 0x2ce   : > { %p1789_p9 = pnand %p1788_p8, %p1947_p5 }
 0x2cf   : > { %p1794_p13 = por %p1793_p12, %p1792_p11 }
 0x2d0   : > { %p1790_p10 = pneg %p1789_p9 }
 0x2d2   : > { %p1795_p0 = pnand %p1794_p13, %p1790_p10 }
 0x2d4   : > { %1798 = shalt.err (!%p1795_p0)
}
 0x2d5   : > { %1653 = dma.vmem_to_hbm [thread:$0]  (%p1947_p5), %s2277_s26, 16, %s2275_s23, %s1248_s1  }
 0x2d6 PF: > { %p1663_p1 = scmp.ge.s32.totalorder %s1837_s24, 2  ;;  %s1295_s25 = sand.u32 1, %s1825_s21  }
 0x2d7   : > { %s1296_s20 = scalar_lea.sflag [#allocation3], %s1295_s25 }
 0x2d8   : > { %p1657_p2 = pnand %p1663_p1, %p1951_p6 }
 0x2da   : > { %p1658_p3 = pneg %p1657_p2 }
 0x2dc   : > { %1816 = dma.done.wait (%p1658_p3), %s1296_s20, 16  }
 0x2dd   : > { %1818 = vsyncadd (%p1658_p3), %s1296_s20, 4294967280  ;;  %s1304_s2 = scalar_lea.sflag [#allocation5], %s1295_s25 }
 0x2de   : > { %1820 = dma.done.wait (%p1658_p3), %s1304_s2, 16  }
 0x2df   : > { %1822 = vsyncadd (%p1658_p3), %s1304_s2, 4294967280  ;;  %s2368_s13 = sld [smem:[#allocation8_spill]]  ;;  %p26_p5 = scmp.ge.s32.totalorder %s1934_s27, 4  }
 0x2e0   : > { %s2369_s23 = sld [smem:[#allocation9_spill]]  ;;  %s2370_s21 = smov %s1829_s22 }
 0x2e1   : > { %s2372_s24 = smov %s1934_s27  ;;  %28 = sbr.rel (!%p26_p5) target bundleno = 9 (0x9), region = 124 }
 0x2e5   : > { %s2371_s22 = smov %s2368_s13 }
 0x2e6   :  { %1308 = vsyncpa [#allocation3], 1 }
 0x2e7   :  { %1310 = vsyncpa [#allocation3 + $0x1], 1 }
 0x2e8   :  { %1311 = vsyncpa [#allocation5], 1 }
 0x2e9   :  { %1313 = vsyncpa [#allocation5 + $0x1], 1 }

</bundles_post_ra>
